<compile_context>
chip_gen: v7x
topology: tpu7x:2x2x1
jax: 0.10.0
libtpu: 0.0.40
codegen_flags: <defaults>
</compile_context>

<pallas_src>
import functools
import math

import jax
import jax.numpy as jnp
from jax.experimental import pallas as pl
from jax.experimental.pallas import tpu as pltpu


def _round_down(x, m):
    return (x // m) * m


def _glnorm_kernel(s_ref, su_ref, sv_ref, u_ref, v_ref, ou_ref, ov_ref, *, n, r, eps):
    # s_ref  : (C, n) f32, constant block-sum matrix S[i*r + a, i] = 1 (resident).
    # su_ref : (P, C) f32 scale tile, repeats every l rows (resident).
    # u_ref / v_ref / ou_ref / ov_ref : (TBL, C) data tiles, C = n*r, lane
    #   k = i*r + a  <->  U[i, a].
    xu = u_ref[...].astype(jnp.float32)
    xv = v_ref[...].astype(jnp.float32)
    tbl, c = xu.shape
    S = s_ref[...]

    # trace(UᵀU VᵀV) = ||U Vᵀ||_F² = Σ_{i,j} (Σ_a U[i,a] V[j,a])².
    # For each group shift m, a single lane rotation (multiple of r, so the
    # intra-group offset a is preserved) aligns group i of U with group
    # (i∓m) mod n of V; over m = 0..n-1 every ordered pair (i, j) is visited
    # exactly once, so the rotation direction is irrelevant.  The r-lane group
    # sums go through one MXU matmul against S; squares accumulate per
    # (row, group) and the single cross-lane reduce is hoisted after the loop.
    acc = jnp.zeros((tbl, n), jnp.float32)
    for m in range(n):
        vr = xv if m == 0 else pltpu.roll(xv, m * r, axis=1)
        gm = jnp.dot(xu * vr, S,
                     preferred_element_type=jnp.float32,
                     precision=jax.lax.Precision.HIGHEST)      # (TBL, n)
        acc = acc + gm * gm

    s = jnp.sum(acc, axis=1, keepdims=True)        # (TBL, 1)  = trace term
    inv = jax.lax.rsqrt(jnp.sqrt(s) + eps)         # 1 / sqrt(norms)

    # Scale expansion: the (P, C) tile repeats every P rows; splitting the row
    # (sublane) dim by P (a multiple of 8) is a tile-aligned, data-movement-free
    # reshape, so the broadcast multiply reuses one resident scale slab.
    p = su_ref.shape[0]
    ou = xu.reshape(tbl // p, p, c) * su_ref[...][None]
    ov = xv.reshape(tbl // p, p, c) * sv_ref[...][None]
    ou_ref[...] = (ou.reshape(tbl, c) * inv).astype(ou_ref.dtype)
    ov_ref[...] = (ov.reshape(tbl, c) * inv).astype(ov_ref.dtype)


def glnorm(u, v, scale_u, scale_v, eps=1e-6, block_rows=1024):
    b, l, n, r = u.shape
    assert v.shape == (b, l, n, r)
    assert scale_u.shape == (1, l, n, 1) and scale_v.shape == (1, l, n, 1)

    C = n * r
    BL = b * l
    P = (8 * l) // math.gcd(8, l)          # lcm(8, l): sublane-aligned scale period

    uf = u.reshape(BL, C)
    vf = v.reshape(BL, C)

    # Pad only when there are fewer rows than one period tile (tiny copy).
    # Otherwise ragged row counts are handled by a partial last grid block
    # (masked writeback) — no full-array pad/slice HBM passes.
    rows = BL
    if rows < P:
        uf = jnp.pad(uf, ((0, P - rows), (0, 0)))
        vf = jnp.pad(vf, ((0, P - rows), (0, 0)))
        rows = P

    # Rows per grid step: a multiple of P, as large as block_rows allows, but
    # keep at least 2 grid blocks when possible (v7x has 2 TensorCores).
    TBL = max(P, _round_down(min(block_rows, rows), P))
    if rows >= 2 * P and 2 * TBL > rows:
        TBL = max(P, _round_down(rows // 2, P))
    num_blocks = pl.cdiv(rows, TBL)

    # Constant block-sum matrix S[i*r + a, i] = 1, kept resident in VMEM.
    S = (jnp.arange(C, dtype=jnp.int32)[:, None] // r
         == jnp.arange(n, dtype=jnp.int32)[None, :]).astype(jnp.float32)

    # One (P, C) scale tile (pattern repeats every l rows), expanded in-kernel.
    def prep_scale(sc):
        sc = jnp.broadcast_to(sc.reshape(l, n, 1), (l, n, r)).reshape(l, C)
        return jnp.tile(sc, (P // l, 1)).astype(jnp.float32)

    su = prep_scale(scale_u)
    sv = prep_scale(scale_v)

    data_spec = pl.BlockSpec((TBL, C), lambda g: (g, 0))
    s_spec = pl.BlockSpec((C, n), lambda g: (0, 0))
    scale_spec = pl.BlockSpec((P, C), lambda g: (0, 0))

    kernel = functools.partial(_glnorm_kernel, n=n, r=r, eps=eps)

    out_u, out_v = pl.pallas_call(
        kernel,
        out_shape=(
            jax.ShapeDtypeStruct((rows, C), u.dtype),
            jax.ShapeDtypeStruct((rows, C), v.dtype),
        ),
        grid_spec=pltpu.PrefetchScalarGridSpec(
            num_scalar_prefetch=0,
            grid=(num_blocks,),
            in_specs=[s_spec, scale_spec, scale_spec, data_spec, data_spec],
            out_specs=(data_spec, data_spec),
        ),
        compiler_params=pltpu.CompilerParams(
            dimension_semantics=("parallel",),
        ),
    )(S, su, sv, uf, vf)

    if rows != BL:
        out_u = out_u[:BL]
        out_v = out_v[:BL]
    return out_u.reshape(b, l, n, r), out_v.reshape(b, l, n, r)


def glnorm_ref(u, v, scale_u, scale_v, eps=1e-6):
    """Pure-JAX reference mirroring the PyTorch forward (no matmuls, so it is
    exactly f32 regardless of the backend's default dot precision)."""
    uu = jnp.sum(u[..., :, :, None] * u[..., :, None, :], axis=-3)  # (b,l,r,r)
    vv = jnp.sum(v[..., :, :, None] * v[..., :, None, :], axis=-3)  # (b,l,r,r)
    norms = jnp.sqrt(jnp.sum(uu * vv, axis=(-1, -2)))[..., None, None] + eps
    return scale_u * u / jnp.sqrt(norms), scale_v * v / jnp.sqrt(norms)


if __name__ == "__main__":
    # Small shapes consistent with the module: GLNorm(n=16, l=4), b=2, r=8.
    b, l, n, r = 2, 4, 16, 8
    key = jax.random.PRNGKey(0)
    ku, kv, ks1, ks2 = jax.random.split(key, 4)
    u = jax.random.normal(ku, (b, l, n, r), dtype=jnp.float32)
    v = jax.random.normal(kv, (b, l, n, r), dtype=jnp.float32)

    # Parameters are ones at init; perturb them so the scale path is exercised.
    scale_u = 1.0 + 0.1 * jax.random.normal(ks1, (1, l, n, 1), dtype=jnp.float32)
    scale_v = 1.0 + 0.1 * jax.random.normal(ks2, (1, l, n, 1), dtype=jnp.float32)

    out_u, out_v = glnorm(u, v, scale_u, scale_v)
    jax.block_until_ready((out_u, out_v))

    ref_u, ref_v = glnorm_ref(u, v, scale_u, scale_v)
    assert out_u.shape == u.shape and out_v.shape == v.shape
    assert jnp.allclose(out_u, ref_u, atol=1e-4, rtol=1e-4), "u mismatch"
    assert jnp.allclose(out_v, ref_v, atol=1e-4, rtol=1e-4), "v mismatch"

    print("KERNEL_OK")
</pallas_src>

<mosaic_0001>
module attributes {stable_mosaic.version = 11 : i64} {
  func.func @_glnorm_kernel(%arg0: i32, %arg1: memref<128x16xf32, #tpu.memory_space<vmem>>, %arg2: memref<8x128xf32, #tpu.memory_space<vmem>>, %arg3: memref<8x128xf32, #tpu.memory_space<vmem>>, %arg4: memref<8x128xf32, #tpu.memory_space<vmem>>, %arg5: memref<8x128xf32, #tpu.memory_space<vmem>>, %arg6: memref<8x128xf32, #tpu.memory_space<vmem>>, %arg7: memref<8x128xf32, #tpu.memory_space<vmem>>) attributes {dimension_semantics = [#tpu.dimension_semantics<parallel>], iteration_bounds = array<i64: 1>, scalar_prefetch = 0 : i64, scratch_operands = 0 : i64, tpu.core_type = #tpu.core_type<tc>, window_params = [{pipeline_mode = #tpu.pipeline_mode<synchronous>, transform_indices = @transform_0, window_bounds = array<i64: 128, 16>}, {pipeline_mode = #tpu.pipeline_mode<synchronous>, transform_indices = @transform_1, window_bounds = array<i64: 8, 128>}, {pipeline_mode = #tpu.pipeline_mode<synchronous>, transform_indices = @transform_2, window_bounds = array<i64: 8, 128>}, {transform_indices = @transform_3, window_bounds = array<i64: 8, 128>}, {transform_indices = @transform_4, window_bounds = array<i64: 8, 128>}, {transform_indices = @transform_5, window_bounds = array<i64: 8, 128>}, {transform_indices = @transform_6, window_bounds = array<i64: 8, 128>}]} {
    %c0 = arith.constant 0 : index
    %c0_0 = arith.constant 0 : index
    %0 = vector.load %arg4[%c0, %c0_0] : memref<8x128xf32, #tpu.memory_space<vmem>>, vector<8x128xf32>
    %c0_1 = arith.constant 0 : index
    %c0_2 = arith.constant 0 : index
    %1 = vector.load %arg5[%c0_1, %c0_2] : memref<8x128xf32, #tpu.memory_space<vmem>>, vector<8x128xf32>
    %c0_3 = arith.constant 0 : index
    %c0_4 = arith.constant 0 : index
    %2 = vector.load %arg1[%c0_3, %c0_4] : memref<128x16xf32, #tpu.memory_space<vmem>>, vector<128x16xf32>
    %cst = arith.constant 0.000000e+00 : f32
    %3 = vector.broadcast %cst : f32 to vector<8x16xf32>
    %4 = arith.mulf %0, %1 : vector<8x128xf32>
    %cst_5 = arith.constant dense<0.000000e+00> : vector<8x16xf32>
    %5 = tpu.matmul %4, %2, %cst_5 {dimension_numbers = #tpu.dot_dimension_numbers<[1], [0], [0], [1], [0, 0, 1, 1], [], []>, precision = #tpu.contract_precision<fp32>} : vector<8x128xf32>, vector<128x16xf32>, vector<8x16xf32> -> vector<8x16xf32>
    %6 = arith.mulf %5, %5 : vector<8x16xf32>
    %7 = arith.addf %3, %6 : vector<8x16xf32>
    %c8_i32 = arith.constant 8 : i32
    %8 = tpu.dynamic_rotate %1 by %c8_i32 dim 1 : vector<8x128xf32>, i32 -> vector<8x128xf32>
    %9 = arith.mulf %0, %8 : vector<8x128xf32>
    %cst_6 = arith.constant dense<0.000000e+00> : vector<8x16xf32>
    %10 = tpu.matmul %9, %2, %cst_6 {dimension_numbers = #tpu.dot_dimension_numbers<[1], [0], [0], [1], [0, 0, 1, 1], [], []>, precision = #tpu.contract_precision<fp32>} : vector<8x128xf32>, vector<128x16xf32>, vector<8x16xf32> -> vector<8x16xf32>
    %11 = arith.mulf %10, %10 : vector<8x16xf32>
    %12 = arith.addf %7, %11 : vector<8x16xf32>
    %c16_i32 = arith.constant 16 : i32
    %13 = tpu.dynamic_rotate %1 by %c16_i32 dim 1 : vector<8x128xf32>, i32 -> vector<8x128xf32>
    %14 = arith.mulf %0, %13 : vector<8x128xf32>
    %cst_7 = arith.constant dense<0.000000e+00> : vector<8x16xf32>
    %15 = tpu.matmul %14, %2, %cst_7 {dimension_numbers = #tpu.dot_dimension_numbers<[1], [0], [0], [1], [0, 0, 1, 1], [], []>, precision = #tpu.contract_precision<fp32>} : vector<8x128xf32>, vector<128x16xf32>, vector<8x16xf32> -> vector<8x16xf32>
    %16 = arith.mulf %15, %15 : vector<8x16xf32>
    %17 = arith.addf %12, %16 : vector<8x16xf32>
    %c24_i32 = arith.constant 24 : i32
    %18 = tpu.dynamic_rotate %1 by %c24_i32 dim 1 : vector<8x128xf32>, i32 -> vector<8x128xf32>
    %19 = arith.mulf %0, %18 : vector<8x128xf32>
    %cst_8 = arith.constant dense<0.000000e+00> : vector<8x16xf32>
    %20 = tpu.matmul %19, %2, %cst_8 {dimension_numbers = #tpu.dot_dimension_numbers<[1], [0], [0], [1], [0, 0, 1, 1], [], []>, precision = #tpu.contract_precision<fp32>} : vector<8x128xf32>, vector<128x16xf32>, vector<8x16xf32> -> vector<8x16xf32>
    %21 = arith.mulf %20, %20 : vector<8x16xf32>
    %22 = arith.addf %17, %21 : vector<8x16xf32>
    %c32_i32 = arith.constant 32 : i32
    %23 = tpu.dynamic_rotate %1 by %c32_i32 dim 1 : vector<8x128xf32>, i32 -> vector<8x128xf32>
    %24 = arith.mulf %0, %23 : vector<8x128xf32>
    %cst_9 = arith.constant dense<0.000000e+00> : vector<8x16xf32>
    %25 = tpu.matmul %24, %2, %cst_9 {dimension_numbers = #tpu.dot_dimension_numbers<[1], [0], [0], [1], [0, 0, 1, 1], [], []>, precision = #tpu.contract_precision<fp32>} : vector<8x128xf32>, vector<128x16xf32>, vector<8x16xf32> -> vector<8x16xf32>
    %26 = arith.mulf %25, %25 : vector<8x16xf32>
    %27 = arith.addf %22, %26 : vector<8x16xf32>
    %c40_i32 = arith.constant 40 : i32
    %28 = tpu.dynamic_rotate %1 by %c40_i32 dim 1 : vector<8x128xf32>, i32 -> vector<8x128xf32>
    %29 = arith.mulf %0, %28 : vector<8x128xf32>
    %cst_10 = arith.constant dense<0.000000e+00> : vector<8x16xf32>
    %30 = tpu.matmul %29, %2, %cst_10 {dimension_numbers = #tpu.dot_dimension_numbers<[1], [0], [0], [1], [0, 0, 1, 1], [], []>, precision = #tpu.contract_precision<fp32>} : vector<8x128xf32>, vector<128x16xf32>, vector<8x16xf32> -> vector<8x16xf32>
    %31 = arith.mulf %30, %30 : vector<8x16xf32>
    %32 = arith.addf %27, %31 : vector<8x16xf32>
    %c48_i32 = arith.constant 48 : i32
    %33 = tpu.dynamic_rotate %1 by %c48_i32 dim 1 : vector<8x128xf32>, i32 -> vector<8x128xf32>
    %34 = arith.mulf %0, %33 : vector<8x128xf32>
    %cst_11 = arith.constant dense<0.000000e+00> : vector<8x16xf32>
    %35 = tpu.matmul %34, %2, %cst_11 {dimension_numbers = #tpu.dot_dimension_numbers<[1], [0], [0], [1], [0, 0, 1, 1], [], []>, precision = #tpu.contract_precision<fp32>} : vector<8x128xf32>, vector<128x16xf32>, vector<8x16xf32> -> vector<8x16xf32>
    %36 = arith.mulf %35, %35 : vector<8x16xf32>
    %37 = arith.addf %32, %36 : vector<8x16xf32>
    %c56_i32 = arith.constant 56 : i32
    %38 = tpu.dynamic_rotate %1 by %c56_i32 dim 1 : vector<8x128xf32>, i32 -> vector<8x128xf32>
    %39 = arith.mulf %0, %38 : vector<8x128xf32>
    %cst_12 = arith.constant dense<0.000000e+00> : vector<8x16xf32>
    %40 = tpu.matmul %39, %2, %cst_12 {dimension_numbers = #tpu.dot_dimension_numbers<[1], [0], [0], [1], [0, 0, 1, 1], [], []>, precision = #tpu.contract_precision<fp32>} : vector<8x128xf32>, vector<128x16xf32>, vector<8x16xf32> -> vector<8x16xf32>
    %41 = arith.mulf %40, %40 : vector<8x16xf32>
    %42 = arith.addf %37, %41 : vector<8x16xf32>
    %c64_i32 = arith.constant 64 : i32
    %43 = tpu.dynamic_rotate %1 by %c64_i32 dim 1 : vector<8x128xf32>, i32 -> vector<8x128xf32>
    %44 = arith.mulf %0, %43 : vector<8x128xf32>
    %cst_13 = arith.constant dense<0.000000e+00> : vector<8x16xf32>
    %45 = tpu.matmul %44, %2, %cst_13 {dimension_numbers = #tpu.dot_dimension_numbers<[1], [0], [0], [1], [0, 0, 1, 1], [], []>, precision = #tpu.contract_precision<fp32>} : vector<8x128xf32>, vector<128x16xf32>, vector<8x16xf32> -> vector<8x16xf32>
    %46 = arith.mulf %45, %45 : vector<8x16xf32>
    %47 = arith.addf %42, %46 : vector<8x16xf32>
    %c72_i32 = arith.constant 72 : i32
    %48 = tpu.dynamic_rotate %1 by %c72_i32 dim 1 : vector<8x128xf32>, i32 -> vector<8x128xf32>
    %49 = arith.mulf %0, %48 : vector<8x128xf32>
    %cst_14 = arith.constant dense<0.000000e+00> : vector<8x16xf32>
    %50 = tpu.matmul %49, %2, %cst_14 {dimension_numbers = #tpu.dot_dimension_numbers<[1], [0], [0], [1], [0, 0, 1, 1], [], []>, precision = #tpu.contract_precision<fp32>} : vector<8x128xf32>, vector<128x16xf32>, vector<8x16xf32> -> vector<8x16xf32>
    %51 = arith.mulf %50, %50 : vector<8x16xf32>
    %52 = arith.addf %47, %51 : vector<8x16xf32>
    %c80_i32 = arith.constant 80 : i32
    %53 = tpu.dynamic_rotate %1 by %c80_i32 dim 1 : vector<8x128xf32>, i32 -> vector<8x128xf32>
    %54 = arith.mulf %0, %53 : vector<8x128xf32>
    %cst_15 = arith.constant dense<0.000000e+00> : vector<8x16xf32>
    %55 = tpu.matmul %54, %2, %cst_15 {dimension_numbers = #tpu.dot_dimension_numbers<[1], [0], [0], [1], [0, 0, 1, 1], [], []>, precision = #tpu.contract_precision<fp32>} : vector<8x128xf32>, vector<128x16xf32>, vector<8x16xf32> -> vector<8x16xf32>
    %56 = arith.mulf %55, %55 : vector<8x16xf32>
    %57 = arith.addf %52, %56 : vector<8x16xf32>
    %c88_i32 = arith.constant 88 : i32
    %58 = tpu.dynamic_rotate %1 by %c88_i32 dim 1 : vector<8x128xf32>, i32 -> vector<8x128xf32>
    %59 = arith.mulf %0, %58 : vector<8x128xf32>
    %cst_16 = arith.constant dense<0.000000e+00> : vector<8x16xf32>
    %60 = tpu.matmul %59, %2, %cst_16 {dimension_numbers = #tpu.dot_dimension_numbers<[1], [0], [0], [1], [0, 0, 1, 1], [], []>, precision = #tpu.contract_precision<fp32>} : vector<8x128xf32>, vector<128x16xf32>, vector<8x16xf32> -> vector<8x16xf32>
    %61 = arith.mulf %60, %60 : vector<8x16xf32>
    %62 = arith.addf %57, %61 : vector<8x16xf32>
    %c96_i32 = arith.constant 96 : i32
    %63 = tpu.dynamic_rotate %1 by %c96_i32 dim 1 : vector<8x128xf32>, i32 -> vector<8x128xf32>
    %64 = arith.mulf %0, %63 : vector<8x128xf32>
    %cst_17 = arith.constant dense<0.000000e+00> : vector<8x16xf32>
    %65 = tpu.matmul %64, %2, %cst_17 {dimension_numbers = #tpu.dot_dimension_numbers<[1], [0], [0], [1], [0, 0, 1, 1], [], []>, precision = #tpu.contract_precision<fp32>} : vector<8x128xf32>, vector<128x16xf32>, vector<8x16xf32> -> vector<8x16xf32>
    %66 = arith.mulf %65, %65 : vector<8x16xf32>
    %67 = arith.addf %62, %66 : vector<8x16xf32>
    %c104_i32 = arith.constant 104 : i32
    %68 = tpu.dynamic_rotate %1 by %c104_i32 dim 1 : vector<8x128xf32>, i32 -> vector<8x128xf32>
    %69 = arith.mulf %0, %68 : vector<8x128xf32>
    %cst_18 = arith.constant dense<0.000000e+00> : vector<8x16xf32>
    %70 = tpu.matmul %69, %2, %cst_18 {dimension_numbers = #tpu.dot_dimension_numbers<[1], [0], [0], [1], [0, 0, 1, 1], [], []>, precision = #tpu.contract_precision<fp32>} : vector<8x128xf32>, vector<128x16xf32>, vector<8x16xf32> -> vector<8x16xf32>
    %71 = arith.mulf %70, %70 : vector<8x16xf32>
    %72 = arith.addf %67, %71 : vector<8x16xf32>
    %c112_i32 = arith.constant 112 : i32
    %73 = tpu.dynamic_rotate %1 by %c112_i32 dim 1 : vector<8x128xf32>, i32 -> vector<8x128xf32>
    %74 = arith.mulf %0, %73 : vector<8x128xf32>
    %cst_19 = arith.constant dense<0.000000e+00> : vector<8x16xf32>
    %75 = tpu.matmul %74, %2, %cst_19 {dimension_numbers = #tpu.dot_dimension_numbers<[1], [0], [0], [1], [0, 0, 1, 1], [], []>, precision = #tpu.contract_precision<fp32>} : vector<8x128xf32>, vector<128x16xf32>, vector<8x16xf32> -> vector<8x16xf32>
    %76 = arith.mulf %75, %75 : vector<8x16xf32>
    %77 = arith.addf %72, %76 : vector<8x16xf32>
    %c120_i32 = arith.constant 120 : i32
    %78 = tpu.dynamic_rotate %1 by %c120_i32 dim 1 : vector<8x128xf32>, i32 -> vector<8x128xf32>
    %79 = arith.mulf %0, %78 : vector<8x128xf32>
    %cst_20 = arith.constant dense<0.000000e+00> : vector<8x16xf32>
    %80 = tpu.matmul %79, %2, %cst_20 {dimension_numbers = #tpu.dot_dimension_numbers<[1], [0], [0], [1], [0, 0, 1, 1], [], []>, precision = #tpu.contract_precision<fp32>} : vector<8x128xf32>, vector<128x16xf32>, vector<8x16xf32> -> vector<8x16xf32>
    %81 = arith.mulf %80, %80 : vector<8x16xf32>
    %82 = arith.addf %77, %81 : vector<8x16xf32>
    %cst_21 = arith.constant dense<0.000000e+00> : vector<8xf32>
    %83 = vector.multi_reduction <add>, %82, %cst_21 [1] : vector<8x16xf32> to vector<8xf32>
    %84 = vector.shape_cast %83 : vector<8xf32> to vector<8x1xf32>
    %85 = math.sqrt %84 : vector<8x1xf32>
    %cst_22 = arith.constant 9.99999997E-7 : f32
    %86 = vector.broadcast %cst_22 : f32 to vector<8x1xf32>
    %87 = arith.addf %85, %86 : vector<8x1xf32>
    %88 = math.rsqrt %87 : vector<8x1xf32>
    %89 = vector.shape_cast %0 : vector<8x128xf32> to vector<1x8x128xf32>
    %c0_23 = arith.constant 0 : index
    %c0_24 = arith.constant 0 : index
    %90 = vector.load %arg2[%c0_23, %c0_24] : memref<8x128xf32, #tpu.memory_space<vmem>>, vector<8x128xf32>
    %91 = vector.shape_cast %90 : vector<8x128xf32> to vector<1x8x128xf32>
    %92 = arith.mulf %89, %91 : vector<1x8x128xf32>
    %93 = vector.shape_cast %1 : vector<8x128xf32> to vector<1x8x128xf32>
    %c0_25 = arith.constant 0 : index
    %c0_26 = arith.constant 0 : index
    %94 = vector.load %arg3[%c0_25, %c0_26] : memref<8x128xf32, #tpu.memory_space<vmem>>, vector<8x128xf32>
    %95 = vector.shape_cast %94 : vector<8x128xf32> to vector<1x8x128xf32>
    %96 = arith.mulf %93, %95 : vector<1x8x128xf32>
    %97 = vector.shape_cast %92 : vector<1x8x128xf32> to vector<8x128xf32>
    %98 = vector.broadcast %88 : vector<8x1xf32> to vector<8x128xf32>
    %99 = arith.mulf %97, %98 : vector<8x128xf32>
    %c0_27 = arith.constant 0 : index
    %c0_28 = arith.constant 0 : index
    %100 = vector.load %arg6[%c0_27, %c0_28] : memref<8x128xf32, #tpu.memory_space<vmem>>, vector<8x128xf32>
    tpu.vector_store %arg6[%c0_27, %c0_28], %99 {strides = array<i32>} : memref<8x128xf32, #tpu.memory_space<vmem>>, vector<8x128xf32>,
    %101 = vector.shape_cast %96 : vector<1x8x128xf32> to vector<8x128xf32>
    %102 = vector.broadcast %88 : vector<8x1xf32> to vector<8x128xf32>
    %103 = arith.mulf %101, %102 : vector<8x128xf32>
    %c0_29 = arith.constant 0 : index
    %c0_30 = arith.constant 0 : index
    %104 = vector.load %arg7[%c0_29, %c0_30] : memref<8x128xf32, #tpu.memory_space<vmem>>, vector<8x128xf32>
    tpu.vector_store %arg7[%c0_29, %c0_30], %103 {strides = array<i32>} : memref<8x128xf32, #tpu.memory_space<vmem>>, vector<8x128xf32>,
    return
  }
  func.func @transform_0(%arg0: i32) -> (i32, i32) {
    %c0_i32 = arith.constant 0 : i32
    %c0_i32_0 = arith.constant 0 : i32
    %c0_i32_1 = arith.constant 0 : i32
    return %c0_i32, %c0_i32_0 : i32, i32
  }
  func.func @transform_1(%arg0: i32) -> (i32, i32) {
    %c0_i32 = arith.constant 0 : i32
    %c0_i32_0 = arith.constant 0 : i32
    %c0_i32_1 = arith.constant 0 : i32
    return %c0_i32, %c0_i32_0 : i32, i32
  }
  func.func @transform_2(%arg0: i32) -> (i32, i32) {
    %c0_i32 = arith.constant 0 : i32
    %c0_i32_0 = arith.constant 0 : i32
    %c0_i32_1 = arith.constant 0 : i32
    return %c0_i32, %c0_i32_0 : i32, i32
  }
  func.func @transform_3(%arg0: i32) -> (i32, i32) {
    %c0_i32 = arith.constant 0 : i32
    %c0_i32_0 = arith.constant 0 : i32
    return %arg0, %c0_i32 : i32, i32
  }
  func.func @transform_4(%arg0: i32) -> (i32, i32) {
    %c0_i32 = arith.constant 0 : i32
    %c0_i32_0 = arith.constant 0 : i32
    return %arg0, %c0_i32 : i32, i32
  }
  func.func @transform_5(%arg0: i32) -> (i32, i32) {
    %c0_i32 = arith.constant 0 : i32
    %c0_i32_0 = arith.constant 0 : i32
    return %arg0, %c0_i32 : i32, i32
  }
  func.func @transform_6(%arg0: i32) -> (i32, i32) {
    %c0_i32 = arith.constant 0 : i32
    %c0_i32_0 = arith.constant 0 : i32
    return %arg0, %c0_i32 : i32, i32
  }
}

</mosaic_0001>

<bundles_post_ra>
// kernel: tpu_custom_call.1
= control target key start
LH: loop header
LB: loop body
LE: loop exit
PB: predicated region body
PF: predicated region fallthrough
CT: control target
= control target key end

     0   :  { %12 = vsyncpa [#allocation3], 0  ;;  %s17959_s27 = smov 8   ;;  %v17960_v3 = vmov 0.0|0.0   ;;  %vm17961_vm0 = vmmov 0   ;;  %v17962_v12 = vmov 0.0   ;;  %s20320_s0 = inlined_call_operand.vmem [shape: f32[128,16], index: 0, kind: input, shape index: {}]   ;;  %s20321_s1 = inlined_call_operand.vmem [shape: f32[8,128], index: 1, kind: input, shape index: {}]   ;;  %s20322_s2 = inlined_call_operand.vmem [shape: f32[8,128], index: 2, kind: input, shape index: {}]   ;;  %s20323_s3 = inlined_call_operand.vmem [shape: f32[8,128], index: 3, kind: input, shape index: {}]   ;;  %s20324_s4 = inlined_call_operand.vmem [shape: f32[8,128], index: 4, kind: input, shape index: {}]   ;;  %s20325_s5 = inlined_call_operand.hbm [shape: f32[8,128], index: 5, kind: output, shape index: {0}]   ;;  %s20326_s6 = inlined_call_operand.hbm [shape: f32[8,128], index: 6, kind: output, shape index: {1}]  }
   0x1   :  { %v18017_v0 = vld [vmem:[%s20324_s4] sm:$0xff]  ;;  %v27_v2 = vld [vmem:[%s20320_s0 + $0x8] sm:$0xff]  ;;  %15417 = vmatprep.subr.bf16.mxu0 %v17960_v3  ;;  %v28_v6 = vld [vmem:[%s20320_s0 + $0x10] sm:$0xff]  ;;  %12089 = vmatprep.mubr.msk.f32.mxu0 %vm17961_vm0, %v17962_v12 }
   0x2   :  { %v26_v1 = vld [vmem:[%s20320_s0] sm:$0xff]  ;;  %686 = vrot.lane.b32.xlu0 %v18017_v0, %s17959_s27  ;;  %v47_v5 = vand.u32 4294901760, %v27_v2  ;;  %v29_v7 = vld [vmem:[%s20320_s0 + $0x18] sm:$0xff]  ;;  %v50_v8 = vand.u32 4294901760, %v28_v6  ;;  %v18039_v11 = vld [vmem:[%s20320_s0 + $0x28] sm:$0xff]  ;;  %15561 = vmatprep.subr.bf16.mxu1 %v17960_v3 }
   0x3   :  { %v44_v4 = vand.u32 4294901760, %v26_v1  ;;  %v53_v9 = vand.u32 4294901760, %v29_v7  ;;  %v30_v10 = vld [vmem:[%s20320_s0 + $0x20] sm:$0xff]  ;;  %12299 = vmatprep.mubr.msk.f32.mxu1 %vm17961_vm0, %v17962_v12  ;;  %v59_v16 = vand.u32 4294901760, %v18039_v11  ;;  %v32_v17 = vld [vmem:[%s20320_s0 + $0x30] sm:$0xff]  ;;  %v18060_v18 = vld [vmem:[%s20320_s0 + $0x38] sm:$0xff] }
   0x4   :  { %v56_v15 = vand.u32 4294901760, %v30_v10 }
   0x5   :  { %v18044_v13 = vpack.c.bf16 %v47_v5, %v44_v4  ;;  %v18049_v14 = vpack.c.bf16 %v53_v9, %v50_v8 }
   0x7   :  { %15419 = vmatpush3.bf16.msra.mxu0 %v18044_v13  ;;  %15563 = vmatpush3.bf16.msra.mxu1 %v18044_v13 }
   0x8   :  { %15420 = vmatprep.subr.bf16.mxu0 %v17960_v3  ;;  %15564 = vmatprep.subr.bf16.mxu1 %v17960_v3 }
   0x9   :  { %13 = vsyncpa [#allocation5], 0  ;;  %v18066_v19 = vld [vmem:[%s20323_s3] sm:$0xff]  ;;  %s17963_s18 = smov 16   ;;  %v18070_v20 = vpack.c.bf16 %v59_v16, %v56_v15  ;;  %v62_v21 = vand.u32 4294901760, %v32_v17  ;;  %v65_v22 = vand.u32 4294901760, %v18060_v18  ;;  %v18109_v36 = vsub.f32 %v26_v1, %v44_v4 }
   0xa   :  { %1332 = vrot.lane.b32.xlu0 %v18017_v0, %s17963_s18  ;;  %v34_v23 = vld [vmem:[%s20320_s0 + $0x40] sm:$0xff]  ;;  %v35_v24 = vld [vmem:[%s20320_s0 + $0x48] sm:$0xff]  ;;  %v42_v25 = vmul.f32 %v18017_v0, %v18066_v19  ;;  %v36_v26 = vld [vmem:[%s20320_s0 + $0x50] sm:$0xff]  ;;  %v18111_v37 = vsub.f32 %v27_v2, %v47_v5  ;;  %v18114_v42 = vsub.f32 %v28_v6, %v50_v8  ;;  %v18119_v46 = vsub.f32 %v29_v7, %v53_v9  ;;  %s17965_s11 = smov 32   ;;  %s17966_s12 = smov 40  }
   0xb   :  { %15422 = vmatpush3.bf16.msra.mxu0 %v18049_v14  ;;  %15566 = vmatpush3.bf16.msra.mxu1 %v18049_v14  ;;  %v18088_v27 = vpack.c.bf16 %v65_v22, %v62_v21  ;;  %v68_v28 = vand.u32 4294901760, %v34_v23  ;;  %v71_v29 = vand.u32 4294901760, %v35_v24  ;;  %v37_v30 = vld [vmem:[%s20320_s0 + $0x58] sm:$0xff]  ;;  %v38_v31 = vld [vmem:[%s20320_s0 + $0x60] sm:$0xff]  ;;  %v39_v32 = vld [vmem:[%s20320_s0 + $0x68] sm:$0xff]  ;;  %v74_v38 = vand.u32 4294901760, %v36_v26 }
   0xc   :  { %15423 = vmatprep.subr.bf16.mxu0 %v17960_v3  ;;  %15567 = vmatprep.subr.bf16.mxu1 %v17960_v3  ;;  %v40_v33 = vld [vmem:[%s20320_s0 + $0x70] sm:$0xff]  ;;  %v41_v34 = vld [vmem:[%s20320_s0 + $0x78] sm:$0xff]  ;;  %v18107_v35 = vand.u32 4294901760, %v42_v25  ;;  %v77_v39 = vand.u32 4294901760, %v37_v30  ;;  %v80_v40 = vand.u32 4294901760, %v38_v31  ;;  %v83_v41 = vand.u32 4294901760, %v39_v32 }
   0xd   :  { %v18117_v43 = vpack.c.bf16 %v71_v29, %v68_v28  ;;  %v86_v44 = vand.u32 4294901760, %v40_v33  ;;  %v89_v45 = vand.u32 4294901760, %v41_v34  ;;  %v137_v48 = vand.u32 4294901760, %v18109_v36  ;;  %s17964_s0 = smov 24   ;;  %s17967_s15 = smov 48  }
   0xe   :  { %v18124_v47 = vsub.f32 %v42_v25, %v18107_v35  ;;  %v144_v49 = vand.u32 4294901760, %v18111_v37  ;;  %v18128_v50 = vsub.f32 %v30_v10, %v56_v15  ;;  %v18131_v51 = vpack.c.bf16 %v77_v39, %v74_v38  ;;  %1978 = vrot.lane.b32.xlu1 %v18017_v0, %s17964_s0  ;;  %3270 = vrot.lane.b32.xlu0 %v18017_v0, %s17966_s12  ;;  %s17968_s18 = smov 56   ;;  %s17969_s19 = smov 64  }
   0xf   :  { %15425 = vmatpush3.bf16.msra.mxu0 %v18070_v20  ;;  %15569 = vmatpush3.bf16.msra.mxu1 %v18070_v20  ;;  %v18133_v52 = vpack.c.bf16 %v83_v41, %v80_v40  ;;  %v151_v53 = vand.u32 4294901760, %v18114_v42  ;;  %v18137_v54 = vpack.c.bf16 %v89_v45, %v86_v44  ;;  %v158_v55 = vand.u32 4294901760, %v18119_v46  ;;  %s17970_s20 = smov 72   ;;  %s17971_s21 = smov 80  }
  0x10   :  { %15426 = vmatprep.subr.bf16.mxu0 %v17960_v3  ;;  %15570 = vmatprep.subr.bf16.mxu1 %v17960_v3  ;;  %v18141_v56 = vsub.f32 %v18039_v11, %v59_v16  ;;  %v18143_v57 = vsub.f32 %v32_v17, %v62_v21  ;;  %v126_v58 = vand.u32 4294901760, %v18124_v47  ;;  %v138_v59 = vsub.f32 %v18109_v36, %v137_v48  ;;  %s17972_s24 = smov 88   ;;  %s17973_s27 = smov 96  }
  0x11   :  { %v145_v60 = vsub.f32 %v18111_v37, %v144_v49  ;;  %v165_v61 = vand.u32 4294901760, %v18128_v50  ;;  %v18153_v62 = vsub.f32 %v18060_v18, %v65_v22  ;;  %v18155_v63 = vsub.f32 %v34_v23, %v68_v28  ;;  %s17974_s28 = smov 104   ;;  %s17975_s29 = smov 112  }
  0x12   :  { %v18157_v1 = vsub.f32 %v35_v24, %v71_v29  ;;  %v18159_v2 = vsub.f32 %v36_v26, %v74_v38  ;;  %v152_v4 = vsub.f32 %v18114_v42, %v151_v53  ;;  %v18162_v5 = vsub.f32 %v37_v30, %v77_v39  ;;  %2624 = vrot.lane.b32.xlu1 %v18017_v0, %s17965_s11  ;;  %s17976_s30 = smov 120   ;;  %s17977_s13 = smov [#allocation2]  }
  0x13   :  { %15428 = vmatpush3.bf16.msra.mxu0 %v18088_v27  ;;  %15572 = vmatpush3.bf16.msra.mxu1 %v18088_v27  ;;  %v18164_v6 = vsub.f32 %v38_v31, %v80_v40  ;;  %v18166_v7 = vsub.f32 %v39_v32, %v83_v41  ;;  %v159_v8 = vsub.f32 %v18119_v46, %v158_v55  ;;  %v172_v9 = vand.u32 4294901760, %v18141_v56  ;;  %s10403_s14 = sshll.u32 %s17977_s13, 4  ;;  %s10404_s14 = int_to_ptr.vmem [resolvable:$true] %s10403_s14 }
  0x14   :  { %15429 = vmatprep.subr.bf16.mxu0 %v17960_v3  ;;  %15573 = vmatprep.subr.bf16.mxu1 %v17960_v3  ;;  %v179_v10 = vand.u32 4294901760, %v18143_v57  ;;  %v18172_v11 = vsub.f32 %v40_v33, %v86_v44  ;;  %v127_v15 = vsub.f32 %v18124_v47, %v126_v58  ;;  %v139_v16 = vand.u32 4294901760, %v138_v59  ;;  %p17916_p1 = scmp.lt.s32.totalorder %s10404_s14, %s10404_s14 }
  0x15   :  { %v146_v17 = vand.u32 4294901760, %v145_v60  ;;  %v18179_v18 = vsub.f32 %v41_v34, %v89_v45  ;;  %v186_v21 = vand.u32 4294901760, %v18153_v62  ;;  %v193_v22 = vand.u32 4294901760, %v18155_v63 }
  0x16   :  { %v200_v23 = vand.u32 4294901760, %v18157_v1  ;;  %v207_v24 = vand.u32 4294901760, %v18159_v2  ;;  %v214_v25 = vand.u32 4294901760, %v18162_v5  ;;  %v221_v26 = vand.u32 4294901760, %v18164_v6 }
  0x17   :  { %15431 = vmatpush3.bf16.msra.mxu0 %v18117_v43  ;;  %15575 = vmatpush3.bf16.msra.mxu1 %v18117_v43  ;;  %v228_v28 = vand.u32 4294901760, %v18166_v7  ;;  %v18189_v29 = vpack.c.bf16 %v144_v49, %v137_v48  ;;  %v235_v30 = vand.u32 4294901760, %v18172_v11  ;;  %v18194_v31 = vpack.c.bf16 %v158_v55, %v151_v53 }
  0x18   :  { %15432 = vmatprep.subr.bf16.mxu0 %v17960_v3  ;;  %15576 = vmatprep.subr.bf16.mxu1 %v17960_v3  ;;  %v18196_v32 = vpack.c.bf16 %v172_v9, %v165_v61  ;;  %v18198_v33 = vpack.c.bf16 %v186_v21, %v179_v10  ;;  %v242_v34 = vand.u32 4294901760, %v18179_v18  ;;  %v18203_v38 = vpack.c.bf16 %v200_v23, %v193_v22 }
  0x19   :  { %v18205_v39 = vpack.c.bf16 %v214_v25, %v207_v24  ;;  %v18207_v40 = vpack.c.bf16 %v228_v28, %v221_v26  ;;  %v128_v41 = vand.u32 4294901760, %v127_v15  ;;  %v166_v44 = vsub.f32 %v18128_v50, %v165_v61 }
  0x1a   :  { %v18210_v45 = vpack.c.bf16 %v242_v34, %v235_v30  ;;  %v18213_v48 = vpack.c.bf16 %v146_v17, %v139_v16  ;;  %v153_v49 = vand.u32 4294901760, %v152_v4  ;;  %v160_v53 = vand.u32 4294901760, %v159_v8 }
  0x1b   :  { %15434 = vmatpush3.bf16.msra.mxu0 %v18131_v51  ;;  %15578 = vmatpush3.bf16.msra.mxu1 %v18131_v51  ;;  %v173_v55 = vsub.f32 %v18141_v56, %v172_v9  ;;  %v180_v59 = vsub.f32 %v18143_v57, %v179_v10  ;;  %v167_v61 = vand.u32 4294901760, %v166_v44  ;;  %v187_v4 = vsub.f32 %v18153_v62, %v186_v21 }
  0x1c   :  { %15435 = vmatprep.subr.bf16.mxu0 %v17960_v3  ;;  %15579 = vmatprep.subr.bf16.mxu1 %v17960_v3  ;;  %v18221_v60 = vpack.c.bf16 %v160_v53, %v153_v49  ;;  %v194_v10 = vsub.f32 %v18155_v63, %v193_v22  ;;  %v201_v17 = vsub.f32 %v18157_v1, %v200_v23  ;;  %vm10376_vm1 = vcmask 130048  }
  0x1d   :  { %v174_v15 = vand.u32 4294901760, %v173_v55  ;;  %v181_v8 = vand.u32 4294901760, %v180_v59  ;;  %v188_v16 = vand.u32 4294901760, %v187_v4  ;;  %v215_v53 = vsub.f32 %v18162_v5, %v214_v25 }
  0x1e   :  { %v195_v44 = vand.u32 4294901760, %v194_v10  ;;  %v202_v49 = vand.u32 4294901760, %v201_v17  ;;  %v222_v55 = vsub.f32 %v18164_v6, %v221_v26  ;;  %v236_v4 = vsub.f32 %v18172_v11, %v235_v30 }
  0x1f   :  { %15437 = vmatpush3.bf16.msra.mxu0 %v18133_v52  ;;  %15581 = vmatpush3.bf16.msra.mxu1 %v18133_v52  ;;  %v18228_v9 = vpack.c.bf16 %v174_v15, %v167_v61  ;;  %v18235_v21 = vpack.c.bf16 %v188_v16, %v181_v8  ;;  %v216_v59 = vand.u32 4294901760, %v215_v53  ;;  %v243_v26 = vsub.f32 %v18179_v18, %v242_v34 }
  0x20   :  { %15438 = vmatprep.subr.bf16.mxu0 %v17960_v3  ;;  %15582 = vmatprep.subr.bf16.mxu1 %v17960_v3  ;;  %v18241_v22 = vpack.c.bf16 %v202_v49, %v195_v44  ;;  %v223_v61 = vand.u32 4294901760, %v222_v55  ;;  %v237_v16 = vand.u32 4294901760, %v236_v4  ;;  %v18263_v30 = vpack.c.bf16 %v18111_v37, %v18109_v36 }
  0x21   :  { %v18270_v34 = vpack.c.bf16 %v18119_v46, %v18114_v42  ;;  %v18278_v36 = vpack.c.bf16 %v18141_v56, %v18128_v50  ;;  %v18284_v37 = vpack.c.bf16 %v18153_v62, %v18143_v57  ;;  %v18290_v42 = vpack.c.bf16 %v18157_v1, %v18155_v63 }
  0x22   :  { %v18296_v46 = vpack.c.bf16 %v18162_v5, %v18159_v2  ;;  %v18302_v50 = vpack.c.bf16 %v18166_v7, %v18164_v6  ;;  %v18308_v56 = vpack.c.bf16 %v18179_v18, %v18172_v11 }
  0x23   :  { %15440 = vmatpush3.bf16.msra.mxu0 %v18137_v54  ;;  %15584 = vmatpush3.bf16.msra.mxu1 %v18137_v54 }
  0x24   :  { %15441 = vmatprep.subr.bf16.mxu0 %v17960_v3  ;;  %15585 = vmatprep.subr.bf16.mxu1 %v17960_v3 }
  0x26   :  { %12090 = vmatmul.mubr.f32.vlgmr.msra.gmra.mrb[0].mxu0 %v128_v41  ;;  %v208_v41 = vsub.f32 %v18159_v2, %v207_v24  ;;  %v229_v24 = vsub.f32 %v18166_v7, %v228_v28  ;;  %v244_v28 = vand.u32 4294901760, %v243_v26 }
  0x27   :  { %15443 = vmatpush3.bf16.msra.mxu0 %v18213_v48  ;;  %12124 = vmatprep.mubr.msk.f32.mxu0 %vm17961_vm0, %v17962_v12 }
  0x28   :  { %15444 = vmatprep.subr.bf16.mxu0 %v17960_v3  ;;  %v209_v23 = vand.u32 4294901760, %v208_v41  ;;  %v230_v25 = vand.u32 4294901760, %v229_v24  ;;  %v18256_v10 = vpack.c.bf16 %v244_v28, %v237_v16  ;;  %v18693_v24 = vld [vmem:[%s20323_s3] sm:$0xff] }
  0x2a   :  { %v18246_v15 = vpack.c.bf16 %v216_v59, %v209_v23  ;;  %v18252_v8 = vpack.c.bf16 %v230_v25, %v223_v61  ;;  %v18645_v23 = vld [vmem:[%s20324_s4] sm:$0xff] }
  0x2b   :  { %15446 = vmatpush3.bf16.msra.mxu0 %v18221_v60  ;;  %3916 = vrot.lane.b32.xlu1 %v18645_v23, %s17967_s15  ;;  %s17978_s15 = smov [#allocation4]  }
  0x2c   :  { %15447 = vmatprep.subr.bf16.mxu0 %v17960_v3  ;;  %4562 = vrot.lane.b32.xlu0 %v18645_v23, %s17968_s18  ;;  %s10413_s16 = sshll.u32 %s17978_s15, 4  ;;  %s10414_s16 = int_to_ptr.vmem [resolvable:$true] %s10413_s16 }
  0x2f   :  { %15449 = vmatpush3.bf16.msra.mxu0 %v18228_v9  ;;  %5208 = vrot.lane.b32.xlu1 %v18645_v23, %s17969_s19 }
  0x30   :  { %15450 = vmatprep.subr.bf16.mxu0 %v17960_v3  ;;  %5854 = vrot.lane.b32.xlu0 %v18645_v23, %s17970_s20 }
  0x33   :  { %15452 = vmatpush3.bf16.msra.mxu0 %v18235_v21  ;;  %6500 = vrot.lane.b32.xlu1 %v18645_v23, %s17971_s21 }
  0x34   :  { %15453 = vmatprep.subr.bf16.mxu0 %v17960_v3 }
  0x37   :  { %15455 = vmatpush3.bf16.msra.mxu0 %v18241_v22 }
  0x38   :  { %15456 = vmatprep.subr.bf16.mxu0 %v17960_v3 }
  0x3b   :  { %15458 = vmatpush3.bf16.msra.mxu0 %v18246_v15 }
  0x3c   :  { %15459 = vmatprep.subr.bf16.mxu0 %v17960_v3 }
  0x3f   :  { %15461 = vmatpush3.bf16.msra.mxu0 %v18252_v8 }
  0x40   :  { %15462 = vmatprep.subr.bf16.mxu0 %v17960_v3 }
  0x43   :  { %15464 = vmatpush3.bf16.msra.mxu0 %v18256_v10 }
  0x44   :  { %15465 = vmatprep.subr.bf16.mxu0 %v17960_v3 }
  0x46   :  { %12125 = vmatmul.mubr.f32.vlgmr.msra.gmra.mrb[0].mxu0 %v18107_v35 }
  0x47   :  { %15467 = vmatpush3.bf16.msra.mxu0 %v18263_v30  ;;  %12159 = vmatprep.mubr.msk.f32.mxu0 %vm17961_vm0, %v17962_v12 }
  0x48   :  { %15468 = vmatprep.subr.bf16.mxu0 %v17960_v3 }
  0x4b   :  { %15470 = vmatpush3.bf16.msra.mxu0 %v18270_v34 }
  0x4c   :  { %15471 = vmatprep.subr.bf16.mxu0 %v17960_v3 }
  0x4f   :  { %15473 = vmatpush3.bf16.msra.mxu0 %v18278_v36 }
  0x50   :  { %15474 = vmatprep.subr.bf16.mxu0 %v17960_v3 }
  0x53   :  { %15476 = vmatpush3.bf16.msra.mxu0 %v18284_v37 }
  0x54   :  { %15477 = vmatprep.subr.bf16.mxu0 %v17960_v3 }
  0x57   :  { %15479 = vmatpush3.bf16.msra.mxu0 %v18290_v42 }
  0x58   :  { %15480 = vmatprep.subr.bf16.mxu0 %v17960_v3 }
  0x5b   :  { %15482 = vmatpush3.bf16.msra.mxu0 %v18296_v46 }
  0x5c   :  { %15483 = vmatprep.subr.bf16.mxu0 %v17960_v3 }
  0x5f   :  { %15485 = vmatpush3.bf16.msra.mxu0 %v18302_v50 }
  0x60   :  { %15486 = vmatprep.subr.bf16.mxu0 %v17960_v3 }
  0x63   :  { %15488 = vmatpush3.bf16.msra.mxu0 %v18308_v56 }
  0x64   :  { %15489 = vmatprep.subr.bf16.mxu0 %v17960_v3 }
  0x66   :  { %12160 = vmatmul.mubr.f32.vlgmr.msra.gmra.mrb[0].mxu0 %v18124_v47 }
  0x67   :  { %15491 = vmatpush3.bf16.msra.mxu0 %v18044_v13  ;;  %12194 = vmatprep.mubr.msk.f32.mxu0 %vm17961_vm0, %v17962_v12 }
  0x68   :  { %15492 = vmatprep.subr.bf16.mxu0 %v17960_v3 }
  0x6b   :  { %15494 = vmatpush3.bf16.msra.mxu0 %v18049_v14 }
  0x6c   :  { %15495 = vmatprep.subr.bf16.mxu0 %v17960_v3 }
  0x6f   :  { %15497 = vmatpush3.bf16.msra.mxu0 %v18070_v20 }
  0x70   :  { %15498 = vmatprep.subr.bf16.mxu0 %v17960_v3 }
  0x73   :  { %15500 = vmatpush3.bf16.msra.mxu0 %v18088_v27 }
  0x74   :  { %15501 = vmatprep.subr.bf16.mxu0 %v17960_v3  ;;  %v687_v57 = vpop.permute.xlu0 %686 }
  0x75   :  { %v688_v62 = vmul.f32 %v687_v57, %v18066_v19 }
  0x77   :  { %15503 = vmatpush3.bf16.msra.mxu0 %v18117_v43  ;;  %v18326_v63 = vand.u32 4294901760, %v688_v62 }
  0x78   :  { %15504 = vmatprep.subr.bf16.mxu0 %v17960_v3 }
  0x79   :  { %v18330_v1 = vsub.f32 %v688_v62, %v18326_v63 }
  0x7b   :  { %15506 = vmatpush3.bf16.msra.mxu0 %v18131_v51  ;;  %v772_v2 = vand.u32 4294901760, %v18330_v1 }
  0x7c   :  { %15507 = vmatprep.subr.bf16.mxu0 %v17960_v3  ;;  %v1333_v47 = vpop.permute.xlu0 %1332 }
  0x7d   :  { %v773_v5 = vsub.f32 %v18330_v1, %v772_v2 }
  0x7f   :  { %15509 = vmatpush3.bf16.msra.mxu0 %v18133_v52  ;;  %v774_v6 = vand.u32 4294901760, %v773_v5 }
  0x80   :  { %15510 = vmatprep.subr.bf16.mxu0 %v17960_v3  ;;  %v1979_v0 = vpop.permute.xlu1 %1978 }
  0x81   :  { %12300 = vmatmul.mubr.f32.vlgmr.msra.gmra.mrb[0].mxu1 %v774_v6  ;;  %v1980_v41 = vmul.f32 %v1979_v0, %v18066_v19 }
  0x82   :  { %15587 = vmatpush3.bf16.msra.mxu1 %v18213_v48  ;;  %12334 = vmatprep.mubr.msk.f32.mxu1 %vm17961_vm0, %v17962_v12 }
  0x83   :  { %15512 = vmatpush3.bf16.msra.mxu0 %v18137_v54  ;;  %15588 = vmatprep.subr.bf16.mxu1 %v17960_v3  ;;  %v18563_v44 = vand.u32 4294901760, %v1980_v41 }
  0x84   :  { %15513 = vmatprep.subr.bf16.mxu0 %v17960_v3  ;;  %v2625_v59 = vpop.permute.xlu1 %2624 }
  0x85   :  { %v18570_v49 = vsub.f32 %v1980_v41, %v18563_v44  ;;  %v2626_v61 = vmul.f32 %v18693_v24, %v2625_v59 }
  0x86   :  { %12195 = vmatmul.mubr.f32.vlgmr.msra.gmra.mrb[0].mxu0 %v126_v58  ;;  %15590 = vmatpush3.bf16.msra.mxu1 %v18221_v60 }
  0x87   :  { %15515 = vmatpush3.bf16.msra.mxu0 %v18189_v29  ;;  %15591 = vmatprep.subr.bf16.mxu1 %v17960_v3  ;;  %v18700_v25 = vand.u32 4294901760, %v2626_v61 }
  0x88   :  { %15516 = vmatprep.subr.bf16.mxu0 %v17960_v3  ;;  %12229 = vmatprep.mubr.msk.f32.mxu0 %vm17961_vm0, %v17962_v12 }
  0x89   :  { %v18707_v4 = vsub.f32 %v2626_v61, %v18700_v25 }
  0x8a   :  { %15593 = vmatpush3.bf16.msra.mxu1 %v18228_v9 }
  0x8b   :  { %15518 = vmatpush3.bf16.msra.mxu0 %v18194_v31  ;;  %15594 = vmatprep.subr.bf16.mxu1 %v17960_v3  ;;  %v2710_v16 = vand.u32 4294901760, %v18707_v4 }
  0x8c   :  { %15519 = vmatprep.subr.bf16.mxu0 %v17960_v3 }
  0x8d   :  { %v2711_v57 = vsub.f32 %v18707_v4, %v2710_v16 }
  0x8e   :  { %15596 = vmatpush3.bf16.msra.mxu1 %v18235_v21 }
  0x8f   :  { %15521 = vmatpush3.bf16.msra.mxu0 %v18196_v32  ;;  %15597 = vmatprep.subr.bf16.mxu1 %v17960_v3  ;;  %v2712_v62 = vand.u32 4294901760, %v2711_v57 }
  0x90   :  { %15522 = vmatprep.subr.bf16.mxu0 %v17960_v3 }
  0x92   :  { %15599 = vmatpush3.bf16.msra.mxu1 %v18241_v22 }
  0x93   :  { %15524 = vmatpush3.bf16.msra.mxu0 %v18198_v33  ;;  %15600 = vmatprep.subr.bf16.mxu1 %v17960_v3 }
  0x94   :  { %15525 = vmatprep.subr.bf16.mxu0 %v17960_v3 }
  0x96   :  { %15602 = vmatpush3.bf16.msra.mxu1 %v18246_v15 }
  0x97   :  { %15527 = vmatpush3.bf16.msra.mxu0 %v18203_v38  ;;  %15603 = vmatprep.subr.bf16.mxu1 %v17960_v3 }
  0x98   :  { %15528 = vmatprep.subr.bf16.mxu0 %v17960_v3 }
  0x9a   :  { %15605 = vmatpush3.bf16.msra.mxu1 %v18252_v8 }
  0x9b   :  { %15530 = vmatpush3.bf16.msra.mxu0 %v18205_v39  ;;  %15606 = vmatprep.subr.bf16.mxu1 %v17960_v3 }
  0x9c   :  { %15531 = vmatprep.subr.bf16.mxu0 %v17960_v3 }
  0x9d   :  { %v3917_v0 = vpop.permute.xlu1 %3916 }
  0x9e   :  { %15608 = vmatpush3.bf16.msra.mxu1 %v18256_v10  ;;  %v3918_v41 = vmul.f32 %v18693_v24, %v3917_v0 }
  0x9f   :  { %15533 = vmatpush3.bf16.msra.mxu0 %v18207_v40  ;;  %15609 = vmatprep.subr.bf16.mxu1 %v17960_v3 }
  0xa0   :  { %15534 = vmatprep.subr.bf16.mxu0 %v17960_v3 }
  0xa1   :  { %12335 = vmatmul.mubr.f32.vlgmr.msra.gmra.mrb[0].mxu1 %v18326_v63  ;;  %v5209_v23 = vpop.permute.xlu1 %5208 }
  0xa2   :  { %15611 = vmatpush3.bf16.msra.mxu1 %v18263_v30  ;;  %12369 = vmatprep.mubr.msk.f32.mxu1 %vm17961_vm0, %v17962_v12 }
  0xa3   :  { %15536 = vmatpush3.bf16.msra.mxu0 %v18210_v45  ;;  %15612 = vmatprep.subr.bf16.mxu1 %v17960_v3 }
  0xa4   :  { %15537 = vmatprep.subr.bf16.mxu0 %v17960_v3 }
  0xa6   :  { %12230 = vmatmul.mubr.f32.vlgmr.msra.gmra.mrb[0].mxu0 %v18107_v35  ;;  %15614 = vmatpush3.bf16.msra.mxu1 %v18270_v34 }
  0xa7   :  { %15539 = vmatpush3.bf16.msra.mxu0 %v18044_v13  ;;  %15615 = vmatprep.subr.bf16.mxu1 %v17960_v3 }
  0xa8   :  { %15540 = vmatprep.subr.bf16.mxu0 %v17960_v3  ;;  %12264 = vmatprep.mubr.msk.f32.mxu0 %vm17961_vm0, %v17962_v12 }
  0xaa   :  { %15617 = vmatpush3.bf16.msra.mxu1 %v18278_v36 }
  0xab   :  { %15542 = vmatpush3.bf16.msra.mxu0 %v18049_v14  ;;  %15618 = vmatprep.subr.bf16.mxu1 %v17960_v3 }
  0xac   :  { %15543 = vmatprep.subr.bf16.mxu0 %v17960_v3 }
  0xae   :  { %15620 = vmatpush3.bf16.msra.mxu1 %v18284_v37 }
  0xaf   :  { %15545 = vmatpush3.bf16.msra.mxu0 %v18070_v20  ;;  %15621 = vmatprep.subr.bf16.mxu1 %v17960_v3 }
  0xb0   :  { %15546 = vmatprep.subr.bf16.mxu0 %v17960_v3 }
  0xb2   :  { %15623 = vmatpush3.bf16.msra.mxu1 %v18290_v42 }
  0xb3   :  { %15548 = vmatpush3.bf16.msra.mxu0 %v18088_v27  ;;  %15624 = vmatprep.subr.bf16.mxu1 %v17960_v3 }
  0xb4   :  { %15549 = vmatprep.subr.bf16.mxu0 %v17960_v3 }
  0xb6   :  { %15626 = vmatpush3.bf16.msra.mxu1 %v18296_v46 }
  0xb7   :  { %15551 = vmatpush3.bf16.msra.mxu0 %v18117_v43  ;;  %15627 = vmatprep.subr.bf16.mxu1 %v17960_v3 }
  0xb8   :  { %15552 = vmatprep.subr.bf16.mxu0 %v17960_v3 }
  0xba   :  { %15629 = vmatpush3.bf16.msra.mxu1 %v18302_v50 }
  0xbb   :  { %15554 = vmatpush3.bf16.msra.mxu0 %v18131_v51  ;;  %15630 = vmatprep.subr.bf16.mxu1 %v17960_v3 }
  0xbc   :  { %15555 = vmatprep.subr.bf16.mxu0 %v17960_v3 }
  0xbe   :  { %15632 = vmatpush3.bf16.msra.mxu1 %v18308_v56 }
  0xbf   :  { %15557 = vmatpush3.bf16.msra.mxu0 %v18133_v52  ;;  %15633 = vmatprep.subr.bf16.mxu1 %v17960_v3 }
  0xc0   :  { %15558 = vmatprep.subr.bf16.mxu0 %v17960_v3 }
  0xc1   :  { %12370 = vmatmul.mubr.f32.vlgmr.msra.gmra.mrb[0].mxu1 %v18330_v1 }
  0xc2   :  { %15635 = vmatpush3.bf16.msra.mxu1 %v18044_v13  ;;  %12404 = vmatprep.mubr.msk.f32.mxu1 %vm17961_vm0, %v17962_v12 }
  0xc3   :  { %15560 = vmatpush3.bf16.msra.mxu0 %v18137_v54  ;;  %15636 = vmatprep.subr.bf16.mxu1 %v17960_v3 }
  0xc4   :  { %15705 = vmatprep.subr.bf16.mxu0 %v17960_v3 }
  0xc6   :  { %12265 = vmatmul.mubr.f32.vlgmr.msra.gmra.mrb[0].mxu0 %v18107_v35  ;;  %15638 = vmatpush3.bf16.msra.mxu1 %v18049_v14  ;;  %v1334_v35 = vmul.f32 %v1333_v47, %v18066_v19  ;;  %v2064_v19 = vand.u32 4294901760, %v18570_v49 }
  0xc7   :  { %15707 = vmatpush3.bf16.msra.mxu0 %v18044_v13  ;;  %15639 = vmatprep.subr.bf16.mxu1 %v17960_v3 }
  0xc8   :  { %15708 = vmatprep.subr.bf16.mxu0 %v17960_v3  ;;  %12509 = vmatprep.mubr.msk.f32.mxu0 %vm17961_vm0, %v17962_v12  ;;  %v18440_v58 = vand.u32 4294901760, %v1334_v35  ;;  %v2065_v53 = vsub.f32 %v18570_v49, %v2064_v19 }
  0xca   :  { %15641 = vmatpush3.bf16.msra.mxu1 %v18070_v20  ;;  %v18447_v7 = vsub.f32 %v1334_v35, %v18440_v58  ;;  %v2066_v55 = vand.u32 4294901760, %v2065_v53 }
  0xcb   :  { %15710 = vmatpush3.bf16.msra.mxu0 %v18049_v14  ;;  %15642 = vmatprep.subr.bf16.mxu1 %v17960_v3 }
  0xcc   :  { %15711 = vmatprep.subr.bf16.mxu0 %v17960_v3  ;;  %v1418_v11 = vand.u32 4294901760, %v18447_v7 }
  0xce   :  { %15644 = vmatpush3.bf16.msra.mxu1 %v18088_v27  ;;  %v1419_v18 = vsub.f32 %v18447_v7, %v1418_v11 }
  0xcf   :  { %15713 = vmatpush3.bf16.msra.mxu0 %v18070_v20  ;;  %15645 = vmatprep.subr.bf16.mxu1 %v17960_v3 }
  0xd0   :  { %15714 = vmatprep.subr.bf16.mxu0 %v17960_v3  ;;  %v1420_v17 = vand.u32 4294901760, %v1419_v18 }
  0xd2   :  { %15647 = vmatpush3.bf16.msra.mxu1 %v18117_v43 }
  0xd3   :  { %15716 = vmatpush3.bf16.msra.mxu0 %v18088_v27  ;;  %15648 = vmatprep.subr.bf16.mxu1 %v17960_v3 }
  0xd4   :  { %15717 = vmatprep.subr.bf16.mxu0 %v17960_v3 }
  0xd6   :  { %15650 = vmatpush3.bf16.msra.mxu1 %v18131_v51 }
  0xd7   :  { %15719 = vmatpush3.bf16.msra.mxu0 %v18117_v43  ;;  %15651 = vmatprep.subr.bf16.mxu1 %v17960_v3 }
  0xd8   :  { %15720 = vmatprep.subr.bf16.mxu0 %v17960_v3 }
  0xda   :  { %15653 = vmatpush3.bf16.msra.mxu1 %v18133_v52 }
  0xdb   :  { %15722 = vmatpush3.bf16.msra.mxu0 %v18131_v51  ;;  %15654 = vmatprep.subr.bf16.mxu1 %v17960_v3 }
  0xdc   :  { %15723 = vmatprep.subr.bf16.mxu0 %v17960_v3 }
  0xde   :  { %15656 = vmatpush3.bf16.msra.mxu1 %v18137_v54 }
  0xdf   :  { %15725 = vmatpush3.bf16.msra.mxu0 %v18133_v52  ;;  %15657 = vmatprep.subr.bf16.mxu1 %v17960_v3 }
  0xe0   :  { %15726 = vmatprep.subr.bf16.mxu0 %v17960_v3 }
  0xe1   :  { %12405 = vmatmul.mubr.f32.vlgmr.msra.gmra.mrb[0].mxu1 %v772_v2 }
  0xe2   :  { %15659 = vmatpush3.bf16.msra.mxu1 %v18189_v29  ;;  %12439 = vmatprep.mubr.msk.f32.mxu1 %vm17961_vm0, %v17962_v12 }
  0xe3   :  { %15728 = vmatpush3.bf16.msra.mxu0 %v18137_v54  ;;  %15660 = vmatprep.subr.bf16.mxu1 %v17960_v3 }
  0xe4   :  { %15729 = vmatprep.subr.bf16.mxu0 %v17960_v3 }
  0xe6   :  { %12510 = vmatmul.mubr.f32.vlgmr.msra.gmra.mrb[2].mxu0 %v1420_v17  ;;  %15662 = vmatpush3.bf16.msra.mxu1 %v18194_v31 }
  0xe7   :  { %15731 = vmatpush3.bf16.msra.mxu0 %v18213_v48  ;;  %15663 = vmatprep.subr.bf16.mxu1 %v17960_v3 }
  0xe8   :  { %15732 = vmatprep.subr.bf16.mxu0 %v17960_v3  ;;  %12544 = vmatprep.mubr.msk.f32.mxu0 %vm17961_vm0, %v17962_v12 }
  0xea   :  { %15665 = vmatpush3.bf16.msra.mxu1 %v18196_v32 }
  0xeb   :  { %15734 = vmatpush3.bf16.msra.mxu0 %v18221_v60  ;;  %15666 = vmatprep.subr.bf16.mxu1 %v17960_v3 }
  0xec   :  { %15735 = vmatprep.subr.bf16.mxu0 %v17960_v3 }
  0xee   :  { %15668 = vmatpush3.bf16.msra.mxu1 %v18198_v33 }
  0xef   :  { %15737 = vmatpush3.bf16.msra.mxu0 %v18228_v9  ;;  %15669 = vmatprep.subr.bf16.mxu1 %v17960_v3 }
  0xf0   :  { %15738 = vmatprep.subr.bf16.mxu0 %v17960_v3 }
  0xf2   :  { %15671 = vmatpush3.bf16.msra.mxu1 %v18203_v38 }
  0xf3   :  { %15740 = vmatpush3.bf16.msra.mxu0 %v18235_v21  ;;  %15672 = vmatprep.subr.bf16.mxu1 %v17960_v3 }
  0xf4   :  { %15741 = vmatprep.subr.bf16.mxu0 %v17960_v3 }
  0xf6   :  { %15674 = vmatpush3.bf16.msra.mxu1 %v18205_v39 }
  0xf7   :  { %15743 = vmatpush3.bf16.msra.mxu0 %v18241_v22  ;;  %15675 = vmatprep.subr.bf16.mxu1 %v17960_v3 }
  0xf8   :  { %15744 = vmatprep.subr.bf16.mxu0 %v17960_v3 }
  0xfa   :  { %15677 = vmatpush3.bf16.msra.mxu1 %v18207_v40 }
  0xfb   :  { %15746 = vmatpush3.bf16.msra.mxu0 %v18246_v15  ;;  %15678 = vmatprep.subr.bf16.mxu1 %v17960_v3 }
  0xfc   :  { %15747 = vmatprep.subr.bf16.mxu0 %v17960_v3 }
  0xfe   :  { %15680 = vmatpush3.bf16.msra.mxu1 %v18210_v45 }
  0xff   :  { %15749 = vmatpush3.bf16.msra.mxu0 %v18252_v8  ;;  %15681 = vmatprep.subr.bf16.mxu1 %v17960_v3 }
 0x100   :  { %15750 = vmatprep.subr.bf16.mxu0 %v17960_v3 }
 0x101   :  { %12440 = vmatmul.mubr.f32.vlgmr.msra.gmra.mrb[0].mxu1 %v18326_v63 }
 0x102   :  { %15683 = vmatpush3.bf16.msra.mxu1 %v18044_v13  ;;  %12474 = vmatprep.mubr.msk.f32.mxu1 %vm17961_vm0, %v17962_v12 }
 0x103   :  { %15752 = vmatpush3.bf16.msra.mxu0 %v18256_v10  ;;  %15684 = vmatprep.subr.bf16.mxu1 %v17960_v3 }
 0x104   :  { %15753 = vmatprep.subr.bf16.mxu0 %v17960_v3 }
 0x106   :  { %12545 = vmatmul.mubr.f32.vlgmr.msra.gmra.mrb[2].mxu0 %v18440_v58  ;;  %15686 = vmatpush3.bf16.msra.mxu1 %v18049_v14 }
 0x107   :  { %15755 = vmatpush3.bf16.msra.mxu0 %v18263_v30  ;;  %15687 = vmatprep.subr.bf16.mxu1 %v17960_v3 }
 0x108   :  { %15756 = vmatprep.subr.bf16.mxu0 %v17960_v3  ;;  %12579 = vmatprep.mubr.msk.f32.mxu0 %vm17961_vm0, %v17962_v12 }
 0x10a   :  { %15689 = vmatpush3.bf16.msra.mxu1 %v18070_v20 }
 0x10b   :  { %15758 = vmatpush3.bf16.msra.mxu0 %v18270_v34  ;;  %15690 = vmatprep.subr.bf16.mxu1 %v17960_v3 }
 0x10c   :  { %15759 = vmatprep.subr.bf16.mxu0 %v17960_v3 }
 0x10e   :  { %15692 = vmatpush3.bf16.msra.mxu1 %v18088_v27 }
 0x10f   :  { %15761 = vmatpush3.bf16.msra.mxu0 %v18278_v36  ;;  %15693 = vmatprep.subr.bf16.mxu1 %v17960_v3 }
 0x110   :  { %15762 = vmatprep.subr.bf16.mxu0 %v17960_v3 }
 0x112   :  { %15695 = vmatpush3.bf16.msra.mxu1 %v18117_v43 }
 0x113   :  { %15764 = vmatpush3.bf16.msra.mxu0 %v18284_v37  ;;  %15696 = vmatprep.subr.bf16.mxu1 %v17960_v3 }
 0x114   :  { %15765 = vmatprep.subr.bf16.mxu0 %v17960_v3 }
 0x116   :  { %15698 = vmatpush3.bf16.msra.mxu1 %v18131_v51 }
 0x117   :  { %15767 = vmatpush3.bf16.msra.mxu0 %v18290_v42  ;;  %15699 = vmatprep.subr.bf16.mxu1 %v17960_v3 }
 0x118   :  { %15768 = vmatprep.subr.bf16.mxu0 %v17960_v3 }
 0x11a   :  { %15701 = vmatpush3.bf16.msra.mxu1 %v18133_v52 }
 0x11b   :  { %15770 = vmatpush3.bf16.msra.mxu0 %v18296_v46  ;;  %15702 = vmatprep.subr.bf16.mxu1 %v17960_v3 }
 0x11c   :  { %15771 = vmatprep.subr.bf16.mxu0 %v17960_v3 }
 0x11e   :  { %15704 = vmatpush3.bf16.msra.mxu1 %v18137_v54 }
 0x11f   :  { %15773 = vmatpush3.bf16.msra.mxu0 %v18302_v50  ;;  %15849 = vmatprep.subr.bf16.mxu1 %v17960_v3 }
 0x120   :  { %15774 = vmatprep.subr.bf16.mxu0 %v17960_v3 }
 0x121   :  { %12475 = vmatmul.mubr.f32.vlgmr.msra.gmra.mrb[0].mxu1 %v18326_v63  ;;  %v3271_v63 = vpop.permute.xlu0 %3270 }
 0x122   :  { %15851 = vmatpush3.bf16.msra.mxu1 %v18044_v13  ;;  %12719 = vmatprep.mubr.msk.f32.mxu1 %vm17961_vm0, %v17962_v12  ;;  %v3272_v1 = vmul.f32 %v18693_v24, %v3271_v63 }
 0x123   :  { %15776 = vmatpush3.bf16.msra.mxu0 %v18308_v56  ;;  %15852 = vmatprep.subr.bf16.mxu1 %v17960_v3 }
 0x124   :  { %15777 = vmatprep.subr.bf16.mxu0 %v17960_v3  ;;  %v18825_v2 = vand.u32 4294901760, %v3272_v1 }
 0x126   :  { %12580 = vmatmul.mubr.f32.vlgmr.msra.gmra.mrb[2].mxu0 %v18447_v7  ;;  %15854 = vmatpush3.bf16.msra.mxu1 %v18049_v14  ;;  %v18832_v5 = vsub.f32 %v3272_v1, %v18825_v2 }
 0x127   :  { %15779 = vmatpush3.bf16.msra.mxu0 %v18044_v13  ;;  %15855 = vmatprep.subr.bf16.mxu1 %v17960_v3 }
 0x128   :  { %15780 = vmatprep.subr.bf16.mxu0 %v17960_v3  ;;  %12614 = vmatprep.mubr.msk.f32.mxu0 %vm17961_vm0, %v17962_v12  ;;  %v3356_v7 = vand.u32 4294901760, %v18832_v5 }
 0x12a   :  { %15857 = vmatpush3.bf16.msra.mxu1 %v18070_v20  ;;  %v3357_v18 = vsub.f32 %v18832_v5, %v3356_v7 }
 0x12b   :  { %15782 = vmatpush3.bf16.msra.mxu0 %v18049_v14  ;;  %15858 = vmatprep.subr.bf16.mxu1 %v17960_v3 }
 0x12c   :  { %15783 = vmatprep.subr.bf16.mxu0 %v17960_v3  ;;  %v3358_v17 = vand.u32 4294901760, %v3357_v18 }
 0x12e   :  { %15860 = vmatpush3.bf16.msra.mxu1 %v18088_v27 }
 0x12f   :  { %15785 = vmatpush3.bf16.msra.mxu0 %v18070_v20  ;;  %15861 = vmatprep.subr.bf16.mxu1 %v17960_v3 }
 0x130   :  { %15786 = vmatprep.subr.bf16.mxu0 %v17960_v3 }
 0x132   :  { %15863 = vmatpush3.bf16.msra.mxu1 %v18117_v43 }
 0x133   :  { %15788 = vmatpush3.bf16.msra.mxu0 %v18088_v27  ;;  %15864 = vmatprep.subr.bf16.mxu1 %v17960_v3 }
 0x134   :  { %15789 = vmatprep.subr.bf16.mxu0 %v17960_v3 }
 0x136   :  { %15866 = vmatpush3.bf16.msra.mxu1 %v18131_v51 }
 0x137   :  { %15791 = vmatpush3.bf16.msra.mxu0 %v18117_v43  ;;  %15867 = vmatprep.subr.bf16.mxu1 %v17960_v3 }
 0x138   :  { %15792 = vmatprep.subr.bf16.mxu0 %v17960_v3 }
 0x13a   :  { %15869 = vmatpush3.bf16.msra.mxu1 %v18133_v52 }
 0x13b   :  { %15794 = vmatpush3.bf16.msra.mxu0 %v18131_v51  ;;  %15870 = vmatprep.subr.bf16.mxu1 %v17960_v3 }
 0x13c   :  { %15795 = vmatprep.subr.bf16.mxu0 %v17960_v3 }
 0x13e   :  { %15872 = vmatpush3.bf16.msra.mxu1 %v18137_v54 }
 0x13f   :  { %15797 = vmatpush3.bf16.msra.mxu0 %v18133_v52  ;;  %15873 = vmatprep.subr.bf16.mxu1 %v17960_v3 }
 0x140   :  { %15798 = vmatprep.subr.bf16.mxu0 %v17960_v3 }
 0x141   :  { %12720 = vmatmul.mubr.f32.vlgmr.msra.gmra.mrb[2].mxu1 %v2066_v55 }
 0x142   :  { %15875 = vmatpush3.bf16.msra.mxu1 %v18213_v48  ;;  %12754 = vmatprep.mubr.msk.f32.mxu1 %vm17961_vm0, %v17962_v12 }
 0x143   :  { %15800 = vmatpush3.bf16.msra.mxu0 %v18137_v54  ;;  %15876 = vmatprep.subr.bf16.mxu1 %v17960_v3 }
 0x144   :  { %15801 = vmatprep.subr.bf16.mxu0 %v17960_v3 }
 0x146   :  { %12615 = vmatmul.mubr.f32.vlgmr.msra.gmra.mrb[2].mxu0 %v1418_v11  ;;  %15878 = vmatpush3.bf16.msra.mxu1 %v18221_v60 }
 0x147   :  { %15803 = vmatpush3.bf16.msra.mxu0 %v18189_v29  ;;  %15879 = vmatprep.subr.bf16.mxu1 %v17960_v3 }
 0x148   :  { %15804 = vmatprep.subr.bf16.mxu0 %v17960_v3  ;;  %12649 = vmatprep.mubr.msk.f32.mxu0 %vm17961_vm0, %v17962_v12 }
 0x14a   :  { %15881 = vmatpush3.bf16.msra.mxu1 %v18228_v9 }
 0x14b   :  { %15806 = vmatpush3.bf16.msra.mxu0 %v18194_v31  ;;  %15882 = vmatprep.subr.bf16.mxu1 %v17960_v3 }
 0x14c   :  { %15807 = vmatprep.subr.bf16.mxu0 %v17960_v3 }
 0x14e   :  { %15884 = vmatpush3.bf16.msra.mxu1 %v18235_v21 }
 0x14f   :  { %15809 = vmatpush3.bf16.msra.mxu0 %v18196_v32  ;;  %15885 = vmatprep.subr.bf16.mxu1 %v17960_v3 }
 0x150   :  { %15810 = vmatprep.subr.bf16.mxu0 %v17960_v3 }
 0x152   :  { %15887 = vmatpush3.bf16.msra.mxu1 %v18241_v22 }
 0x153   :  { %15812 = vmatpush3.bf16.msra.mxu0 %v18198_v33  ;;  %15888 = vmatprep.subr.bf16.mxu1 %v17960_v3 }
 0x154   :  { %15813 = vmatprep.subr.bf16.mxu0 %v17960_v3 }
 0x156   :  { %15890 = vmatpush3.bf16.msra.mxu1 %v18246_v15 }
 0x157   :  { %15815 = vmatpush3.bf16.msra.mxu0 %v18203_v38  ;;  %15891 = vmatprep.subr.bf16.mxu1 %v17960_v3 }
 0x158   :  { %15816 = vmatprep.subr.bf16.mxu0 %v17960_v3 }
 0x15a   :  { %15893 = vmatpush3.bf16.msra.mxu1 %v18252_v8 }
 0x15b   :  { %15818 = vmatpush3.bf16.msra.mxu0 %v18205_v39  ;;  %15894 = vmatprep.subr.bf16.mxu1 %v17960_v3 }
 0x15c   :  { %15819 = vmatprep.subr.bf16.mxu0 %v17960_v3 }
 0x15e   :  { %15896 = vmatpush3.bf16.msra.mxu1 %v18256_v10 }
 0x15f   :  { %15821 = vmatpush3.bf16.msra.mxu0 %v18207_v40  ;;  %15897 = vmatprep.subr.bf16.mxu1 %v17960_v3 }
 0x160   :  { %15822 = vmatprep.subr.bf16.mxu0 %v17960_v3 }
 0x161   :  { %12755 = vmatmul.mubr.f32.vlgmr.msra.gmra.mrb[2].mxu1 %v18563_v44 }
 0x162   :  { %15899 = vmatpush3.bf16.msra.mxu1 %v18263_v30  ;;  %12789 = vmatprep.mubr.msk.f32.mxu1 %vm17961_vm0, %v17962_v12 }
 0x163   :  { %15824 = vmatpush3.bf16.msra.mxu0 %v18210_v45  ;;  %15900 = vmatprep.subr.bf16.mxu1 %v17960_v3 }
 0x164   :  { %15825 = vmatprep.subr.bf16.mxu0 %v17960_v3 }
 0x166   :  { %12650 = vmatmul.mubr.f32.vlgmr.msra.gmra.mrb[2].mxu0 %v18440_v58  ;;  %15902 = vmatpush3.bf16.msra.mxu1 %v18270_v34 }
 0x167   :  { %15827 = vmatpush3.bf16.msra.mxu0 %v18044_v13  ;;  %15903 = vmatprep.subr.bf16.mxu1 %v17960_v3 }
 0x168   :  { %15828 = vmatprep.subr.bf16.mxu0 %v17960_v3  ;;  %12684 = vmatprep.mubr.msk.f32.mxu0 %vm17961_vm0, %v17962_v12 }
 0x16a   :  { %15905 = vmatpush3.bf16.msra.mxu1 %v18278_v36 }
 0x16b   :  { %15830 = vmatpush3.bf16.msra.mxu0 %v18049_v14  ;;  %15906 = vmatprep.subr.bf16.mxu1 %v17960_v3 }
 0x16c   :  { %15831 = vmatprep.subr.bf16.mxu0 %v17960_v3 }
 0x16e   :  { %15908 = vmatpush3.bf16.msra.mxu1 %v18284_v37 }
 0x16f   :  { %15833 = vmatpush3.bf16.msra.mxu0 %v18070_v20  ;;  %15909 = vmatprep.subr.bf16.mxu1 %v17960_v3 }
 0x170   :  { %15834 = vmatprep.subr.bf16.mxu0 %v17960_v3 }
 0x172   :  { %15911 = vmatpush3.bf16.msra.mxu1 %v18290_v42 }
 0x173   :  { %15836 = vmatpush3.bf16.msra.mxu0 %v18088_v27  ;;  %15912 = vmatprep.subr.bf16.mxu1 %v17960_v3 }
 0x174   :  { %15837 = vmatprep.subr.bf16.mxu0 %v17960_v3 }
 0x176   :  { %15914 = vmatpush3.bf16.msra.mxu1 %v18296_v46 }
 0x177   :  { %15839 = vmatpush3.bf16.msra.mxu0 %v18117_v43  ;;  %15915 = vmatprep.subr.bf16.mxu1 %v17960_v3 }
 0x178   :  { %15840 = vmatprep.subr.bf16.mxu0 %v17960_v3 }
 0x17a   :  { %15917 = vmatpush3.bf16.msra.mxu1 %v18302_v50 }
 0x17b   :  { %15842 = vmatpush3.bf16.msra.mxu0 %v18131_v51  ;;  %15918 = vmatprep.subr.bf16.mxu1 %v17960_v3 }
 0x17c   :  { %15843 = vmatprep.subr.bf16.mxu0 %v17960_v3 }
 0x17e   :  { %15920 = vmatpush3.bf16.msra.mxu1 %v18308_v56 }
 0x17f   :  { %15845 = vmatpush3.bf16.msra.mxu0 %v18133_v52  ;;  %15921 = vmatprep.subr.bf16.mxu1 %v17960_v3 }
 0x180   :  { %15846 = vmatprep.subr.bf16.mxu0 %v17960_v3 }
 0x181   :  { %12790 = vmatmul.mubr.f32.vlgmr.msra.gmra.mrb[2].mxu1 %v18570_v49 }
 0x182   :  { %15923 = vmatpush3.bf16.msra.mxu1 %v18044_v13  ;;  %12824 = vmatprep.mubr.msk.f32.mxu1 %vm17961_vm0, %v17962_v12 }
 0x183   :  { %15848 = vmatpush3.bf16.msra.mxu0 %v18137_v54  ;;  %15924 = vmatprep.subr.bf16.mxu1 %v17960_v3 }
 0x184   :  { %15993 = vmatprep.subr.bf16.mxu0 %v17960_v3 }
 0x186   :  { %12685 = vmatmul.mubr.f32.vlgmr.msra.gmra.mrb[2].mxu0 %v18440_v58  ;;  %15926 = vmatpush3.bf16.msra.mxu1 %v18049_v14 }
 0x187   :  { %15995 = vmatpush3.bf16.msra.mxu0 %v18044_v13  ;;  %15927 = vmatprep.subr.bf16.mxu1 %v17960_v3 }
 0x188   :  { %15996 = vmatprep.subr.bf16.mxu0 %v17960_v3  ;;  %12929 = vmatprep.mubr.msk.f32.mxu0 %vm17961_vm0, %v17962_v12 }
 0x18a   :  { %15929 = vmatpush3.bf16.msra.mxu1 %v18070_v20 }
 0x18b   :  { %15998 = vmatpush3.bf16.msra.mxu0 %v18049_v14  ;;  %15930 = vmatprep.subr.bf16.mxu1 %v17960_v3 }
 0x18c   :  { %15999 = vmatprep.subr.bf16.mxu0 %v17960_v3 }
 0x18e   :  { %15932 = vmatpush3.bf16.msra.mxu1 %v18088_v27 }
 0x18f   :  { %16001 = vmatpush3.bf16.msra.mxu0 %v18070_v20  ;;  %15933 = vmatprep.subr.bf16.mxu1 %v17960_v3 }
 0x190   :  { %16002 = vmatprep.subr.bf16.mxu0 %v17960_v3 }
 0x192   :  { %15935 = vmatpush3.bf16.msra.mxu1 %v18117_v43 }
 0x193   :  { %16004 = vmatpush3.bf16.msra.mxu0 %v18088_v27  ;;  %15936 = vmatprep.subr.bf16.mxu1 %v17960_v3 }
 0x194   :  { %16005 = vmatprep.subr.bf16.mxu0 %v17960_v3 }
 0x196   :  { %15938 = vmatpush3.bf16.msra.mxu1 %v18131_v51 }
 0x197   :  { %16007 = vmatpush3.bf16.msra.mxu0 %v18117_v43  ;;  %15939 = vmatprep.subr.bf16.mxu1 %v17960_v3 }
 0x198   :  { %16008 = vmatprep.subr.bf16.mxu0 %v17960_v3 }
 0x199   :  { %v18713_v26 = vpop.f32.mrb[0].mxu0 }
 0x19a   :  { %v12266_v28 = vpop.f32.mrb[1].mxu0  ;;  %15941 = vmatpush3.bf16.msra.mxu1 %v18133_v52  ;;  %v684_v47 = vmul.f32 %v18713_v26, %v18713_v26  ;;  %v4563_v26 = vpop.permute.xlu0 %4562 }
 0x19b   :  { %16010 = vmatpush3.bf16.msra.mxu0 %v18131_v51  ;;  %15942 = vmatprep.subr.bf16.mxu1 %v17960_v3 }
 0x19c   :  { %16011 = vmatprep.subr.bf16.mxu0 %v17960_v3 }
 0x19e   :  { %15944 = vmatpush3.bf16.msra.mxu1 %v18137_v54 }
 0x19f   :  { %16013 = vmatpush3.bf16.msra.mxu0 %v18133_v52  ;;  %15945 = vmatprep.subr.bf16.mxu1 %v17960_v3 }
 0x1a0   :  { %16014 = vmatprep.subr.bf16.mxu0 %v17960_v3 }
 0x1a1   :  { %12825 = vmatmul.mubr.f32.vlgmr.msra.gmra.mrb[2].mxu1 %v2064_v19 }
 0x1a2   :  { %15947 = vmatpush3.bf16.msra.mxu1 %v18189_v29  ;;  %12859 = vmatprep.mubr.msk.f32.mxu1 %vm17961_vm0, %v17962_v12 }
 0x1a3   :  { %16016 = vmatpush3.bf16.msra.mxu0 %v18137_v54  ;;  %15948 = vmatprep.subr.bf16.mxu1 %v17960_v3 }
 0x1a4   :  { %16017 = vmatprep.subr.bf16.mxu0 %v17960_v3 }
 0x1a6   :  { %12930 = vmatmul.mubr.f32.vlgmr.msra.gmra.mrb[4].mxu0 %v2712_v62  ;;  %15950 = vmatpush3.bf16.msra.mxu1 %v18194_v31 }
 0x1a7   :  { %16019 = vmatpush3.bf16.msra.mxu0 %v18213_v48  ;;  %15951 = vmatprep.subr.bf16.mxu1 %v17960_v3 }
 0x1a8   :  { %16020 = vmatprep.subr.bf16.mxu0 %v17960_v3  ;;  %12964 = vmatprep.mubr.msk.f32.mxu0 %vm17961_vm0, %v17962_v12 }
 0x1aa   :  { %15953 = vmatpush3.bf16.msra.mxu1 %v18196_v32 }
 0x1ab   :  { %16022 = vmatpush3.bf16.msra.mxu0 %v18221_v60  ;;  %15954 = vmatprep.subr.bf16.mxu1 %v17960_v3 }
 0x1ac   :  { %16023 = vmatprep.subr.bf16.mxu0 %v17960_v3 }
 0x1ae   :  { %15956 = vmatpush3.bf16.msra.mxu1 %v18198_v33 }
 0x1af   :  { %16025 = vmatpush3.bf16.msra.mxu0 %v18228_v9  ;;  %15957 = vmatprep.subr.bf16.mxu1 %v17960_v3 }
 0x1b0   :  { %16026 = vmatprep.subr.bf16.mxu0 %v17960_v3 }
 0x1b2   :  { %15959 = vmatpush3.bf16.msra.mxu1 %v18203_v38 }
 0x1b3   :  { %16028 = vmatpush3.bf16.msra.mxu0 %v18235_v21  ;;  %15960 = vmatprep.subr.bf16.mxu1 %v17960_v3 }
 0x1b4   :  { %16029 = vmatprep.subr.bf16.mxu0 %v17960_v3 }
 0x1b6   :  { %15962 = vmatpush3.bf16.msra.mxu1 %v18205_v39 }
 0x1b7   :  { %16031 = vmatpush3.bf16.msra.mxu0 %v18241_v22  ;;  %15963 = vmatprep.subr.bf16.mxu1 %v17960_v3 }
 0x1b8   :  { %16032 = vmatprep.subr.bf16.mxu0 %v17960_v3 }
 0x1ba   :  { %15965 = vmatpush3.bf16.msra.mxu1 %v18207_v40 }
 0x1bb   :  { %16034 = vmatpush3.bf16.msra.mxu0 %v18246_v15  ;;  %15966 = vmatprep.subr.bf16.mxu1 %v17960_v3 }
 0x1bc   :  { %16035 = vmatprep.subr.bf16.mxu0 %v17960_v3 }
 0x1be   :  { %15968 = vmatpush3.bf16.msra.mxu1 %v18210_v45 }
 0x1bf   :  { %16037 = vmatpush3.bf16.msra.mxu0 %v18252_v8  ;;  %15969 = vmatprep.subr.bf16.mxu1 %v17960_v3 }
 0x1c0   :  { %16038 = vmatprep.subr.bf16.mxu0 %v17960_v3 }
 0x1c1   :  { %12860 = vmatmul.mubr.f32.vlgmr.msra.gmra.mrb[2].mxu1 %v18563_v44 }
 0x1c2   :  { %15971 = vmatpush3.bf16.msra.mxu1 %v18044_v13  ;;  %12894 = vmatprep.mubr.msk.f32.mxu1 %vm17961_vm0, %v17962_v12 }
 0x1c3   :  { %16040 = vmatpush3.bf16.msra.mxu0 %v18256_v10  ;;  %15972 = vmatprep.subr.bf16.mxu1 %v17960_v3 }
 0x1c4   :  { %16041 = vmatprep.subr.bf16.mxu0 %v17960_v3 }
 0x1c6   :  { %12965 = vmatmul.mubr.f32.vlgmr.msra.gmra.mrb[4].mxu0 %v18700_v25  ;;  %15974 = vmatpush3.bf16.msra.mxu1 %v18049_v14 }
 0x1c7   :  { %16043 = vmatpush3.bf16.msra.mxu0 %v18263_v30  ;;  %15975 = vmatprep.subr.bf16.mxu1 %v17960_v3 }
 0x1c8   :  { %16044 = vmatprep.subr.bf16.mxu0 %v17960_v3  ;;  %12999 = vmatprep.mubr.msk.f32.mxu0 %vm17961_vm0, %v17962_v12 }
 0x1ca   :  { %15977 = vmatpush3.bf16.msra.mxu1 %v18070_v20 }
 0x1cb   :  { %16046 = vmatpush3.bf16.msra.mxu0 %v18270_v34  ;;  %15978 = vmatprep.subr.bf16.mxu1 %v17960_v3 }
 0x1cc   :  { %16047 = vmatprep.subr.bf16.mxu0 %v17960_v3 }
 0x1ce   :  { %15980 = vmatpush3.bf16.msra.mxu1 %v18088_v27 }
 0x1cf   :  { %16049 = vmatpush3.bf16.msra.mxu0 %v18278_v36  ;;  %15981 = vmatprep.subr.bf16.mxu1 %v17960_v3 }
 0x1d0   :  { %16050 = vmatprep.subr.bf16.mxu0 %v17960_v3 }
 0x1d2   :  { %15983 = vmatpush3.bf16.msra.mxu1 %v18117_v43 }
 0x1d3   :  { %16052 = vmatpush3.bf16.msra.mxu0 %v18284_v37  ;;  %15984 = vmatprep.subr.bf16.mxu1 %v17960_v3 }
 0x1d4   :  { %16053 = vmatprep.subr.bf16.mxu0 %v17960_v3 }
 0x1d6   :  { %15986 = vmatpush3.bf16.msra.mxu1 %v18131_v51 }
 0x1d7   :  { %16055 = vmatpush3.bf16.msra.mxu0 %v18290_v42  ;;  %15987 = vmatprep.subr.bf16.mxu1 %v17960_v3 }
 0x1d8   :  { %16056 = vmatprep.subr.bf16.mxu0 %v17960_v3 }
 0x1da   :  { %15989 = vmatpush3.bf16.msra.mxu1 %v18133_v52 }
 0x1db   :  { %16058 = vmatpush3.bf16.msra.mxu0 %v18296_v46  ;;  %15990 = vmatprep.subr.bf16.mxu1 %v17960_v3 }
 0x1dc   :  { %16059 = vmatprep.subr.bf16.mxu0 %v17960_v3 }
 0x1de   :  { %15992 = vmatpush3.bf16.msra.mxu1 %v18137_v54 }
 0x1df   :  { %16061 = vmatpush3.bf16.msra.mxu0 %v18302_v50  ;;  %16137 = vmatprep.subr.bf16.mxu1 %v17960_v3 }
 0x1e0   :  { %16062 = vmatprep.subr.bf16.mxu0 %v17960_v3 }
 0x1e1   :  { %12895 = vmatmul.mubr.f32.vlgmr.msra.gmra.mrb[2].mxu1 %v18563_v44  ;;  %v18956_v44 = vand.u32 4294901760, %v3918_v41 }
 0x1e2   :  { %16139 = vmatpush3.bf16.msra.mxu1 %v18044_v13  ;;  %13139 = vmatprep.mubr.msk.f32.mxu1 %vm17961_vm0, %v17962_v12 }
 0x1e3   :  { %16064 = vmatpush3.bf16.msra.mxu0 %v18308_v56  ;;  %16140 = vmatprep.subr.bf16.mxu1 %v17960_v3  ;;  %v18963_v49 = vsub.f32 %v3918_v41, %v18956_v44 }
 0x1e4   :  { %16065 = vmatprep.subr.bf16.mxu0 %v17960_v3 }
 0x1e5   :  { %v4002_v55 = vand.u32 4294901760, %v18963_v49 }
 0x1e6   :  { %13000 = vmatmul.mubr.f32.vlgmr.msra.gmra.mrb[4].mxu0 %v18707_v4  ;;  %16142 = vmatpush3.bf16.msra.mxu1 %v18049_v14 }
 0x1e7   :  { %16067 = vmatpush3.bf16.msra.mxu0 %v18044_v13  ;;  %16143 = vmatprep.subr.bf16.mxu1 %v17960_v3 }
 0x1e8   :  { %16068 = vmatprep.subr.bf16.mxu0 %v17960_v3  ;;  %13034 = vmatprep.mubr.msk.f32.mxu0 %vm17961_vm0, %v17962_v12 }
 0x1ea   :  { %16145 = vmatpush3.bf16.msra.mxu1 %v18070_v20 }
 0x1eb   :  { %16070 = vmatpush3.bf16.msra.mxu0 %v18049_v14  ;;  %16146 = vmatprep.subr.bf16.mxu1 %v17960_v3 }
 0x1ec   :  { %16071 = vmatprep.subr.bf16.mxu0 %v17960_v3 }
 0x1ee   :  { %16148 = vmatpush3.bf16.msra.mxu1 %v18088_v27 }
 0x1ef   :  { %16073 = vmatpush3.bf16.msra.mxu0 %v18070_v20  ;;  %16149 = vmatprep.subr.bf16.mxu1 %v17960_v3 }
 0x1f0   :  { %16074 = vmatprep.subr.bf16.mxu0 %v17960_v3 }
 0x1f2   :  { %16151 = vmatpush3.bf16.msra.mxu1 %v18117_v43 }
 0x1f3   :  { %16076 = vmatpush3.bf16.msra.mxu0 %v18088_v27  ;;  %16152 = vmatprep.subr.bf16.mxu1 %v17960_v3 }
 0x1f4   :  { %16077 = vmatprep.subr.bf16.mxu0 %v17960_v3  ;;  %v1326_v6 = vpop.f32.mrb[0].mxu1 }
 0x1f5   :  { %v1330_v35 = vmul.f32 %v1326_v6, %v1326_v6  ;;  %v12476_v58 = vpop.f32.mrb[1].mxu1 }
 0x1f6   :  { %16154 = vmatpush3.bf16.msra.mxu1 %v18131_v51 }
 0x1f7   :  { %16079 = vmatpush3.bf16.msra.mxu0 %v18117_v43  ;;  %v18841_v11 = vadd.f32 %v1330_v35, %v684_v47  ;;  %16155 = vmatprep.subr.bf16.mxu1 %v17960_v3  ;;  %v5210_v35 = vmul.f32 %v18693_v24, %v5209_v23 }
 0x1f8   :  { %16080 = vmatprep.subr.bf16.mxu0 %v17960_v3 }
 0x1f9   :  { %v19212_v58 = vand.u32 4294901760, %v5210_v35 }
 0x1fa   :  { %16157 = vmatpush3.bf16.msra.mxu1 %v18133_v52 }
 0x1fb   :  { %16082 = vmatpush3.bf16.msra.mxu0 %v18131_v51  ;;  %16158 = vmatprep.subr.bf16.mxu1 %v17960_v3 }
 0x1fc   :  { %16083 = vmatprep.subr.bf16.mxu0 %v17960_v3 }
 0x1fe   :  { %16160 = vmatpush3.bf16.msra.mxu1 %v18137_v54 }
 0x1ff   :  { %16085 = vmatpush3.bf16.msra.mxu0 %v18133_v52  ;;  %16161 = vmatprep.subr.bf16.mxu1 %v17960_v3 }
 0x200   :  { %16086 = vmatprep.subr.bf16.mxu0 %v17960_v3 }
 0x201   :  { %13140 = vmatmul.mubr.f32.vlgmr.msra.gmra.mrb[4].mxu1 %v3358_v17 }
 0x202   :  { %16163 = vmatpush3.bf16.msra.mxu1 %v18213_v48  ;;  %13174 = vmatprep.mubr.msk.f32.mxu1 %vm17961_vm0, %v17962_v12 }
 0x203   :  { %16088 = vmatpush3.bf16.msra.mxu0 %v18137_v54  ;;  %16164 = vmatprep.subr.bf16.mxu1 %v17960_v3 }
 0x204   :  { %16089 = vmatprep.subr.bf16.mxu0 %v17960_v3 }
 0x206   :  { %13035 = vmatmul.mubr.f32.vlgmr.msra.gmra.mrb[4].mxu0 %v2710_v16  ;;  %16166 = vmatpush3.bf16.msra.mxu1 %v18221_v60  ;;  %v4564_v16 = vmul.f32 %v18693_v24, %v4563_v26  ;;  %v19219_v24 = vsub.f32 %v5210_v35, %v19212_v58 }
 0x207   :  { %16091 = vmatpush3.bf16.msra.mxu0 %v18189_v29  ;;  %16167 = vmatprep.subr.bf16.mxu1 %v17960_v3 }
 0x208   :  { %16092 = vmatprep.subr.bf16.mxu0 %v17960_v3  ;;  %13069 = vmatprep.mubr.msk.f32.mxu0 %vm17961_vm0, %v17962_v12  ;;  %v19082_v28 = vand.u32 4294901760, %v4564_v16  ;;  %v5294_v18 = vand.u32 4294901760, %v19219_v24 }
 0x20a   :  { %16169 = vmatpush3.bf16.msra.mxu1 %v18228_v9  ;;  %v19089_v57 = vsub.f32 %v4564_v16, %v19082_v28  ;;  %v5295_v41 = vsub.f32 %v19219_v24, %v5294_v18 }
 0x20b   :  { %16094 = vmatpush3.bf16.msra.mxu0 %v18194_v31  ;;  %16170 = vmatprep.subr.bf16.mxu1 %v17960_v3 }
 0x20c   :  { %16095 = vmatprep.subr.bf16.mxu0 %v17960_v3 }
 0x20e   :  { %16172 = vmatpush3.bf16.msra.mxu1 %v18235_v21 }
 0x20f   :  { %16097 = vmatpush3.bf16.msra.mxu0 %v18196_v32  ;;  %16173 = vmatprep.subr.bf16.mxu1 %v17960_v3 }
 0x210   :  { %16098 = vmatprep.subr.bf16.mxu0 %v17960_v3 }
 0x212   :  { %16175 = vmatpush3.bf16.msra.mxu1 %v18241_v22 }
 0x213   :  { %16100 = vmatpush3.bf16.msra.mxu0 %v18198_v33  ;;  %16176 = vmatprep.subr.bf16.mxu1 %v17960_v3 }
 0x214   :  { %16101 = vmatprep.subr.bf16.mxu0 %v17960_v3 }
 0x216   :  { %16178 = vmatpush3.bf16.msra.mxu1 %v18246_v15 }
 0x217   :  { %16103 = vmatpush3.bf16.msra.mxu0 %v18203_v38  ;;  %16179 = vmatprep.subr.bf16.mxu1 %v17960_v3 }
 0x218   :  { %16104 = vmatprep.subr.bf16.mxu0 %v17960_v3 }
 0x21a   :  { %16181 = vmatpush3.bf16.msra.mxu1 %v18252_v8 }
 0x21b   :  { %16106 = vmatpush3.bf16.msra.mxu0 %v18205_v39  ;;  %16182 = vmatprep.subr.bf16.mxu1 %v17960_v3 }
 0x21c   :  { %16107 = vmatprep.subr.bf16.mxu0 %v17960_v3 }
 0x21e   :  { %16184 = vmatpush3.bf16.msra.mxu1 %v18256_v10 }
 0x21f   :  { %16109 = vmatpush3.bf16.msra.mxu0 %v18207_v40  ;;  %16185 = vmatprep.subr.bf16.mxu1 %v17960_v3 }
 0x220   :  { %16110 = vmatprep.subr.bf16.mxu0 %v17960_v3 }
 0x221   :  { %13175 = vmatmul.mubr.f32.vlgmr.msra.gmra.mrb[4].mxu1 %v18825_v2 }
 0x222   :  { %16187 = vmatpush3.bf16.msra.mxu1 %v18263_v30  ;;  %13209 = vmatprep.mubr.msk.f32.mxu1 %vm17961_vm0, %v17962_v12 }
 0x223   :  { %16112 = vmatpush3.bf16.msra.mxu0 %v18210_v45  ;;  %16188 = vmatprep.subr.bf16.mxu1 %v17960_v3 }
 0x224   :  { %16113 = vmatprep.subr.bf16.mxu0 %v17960_v3 }
 0x226   :  { %13070 = vmatmul.mubr.f32.vlgmr.msra.gmra.mrb[4].mxu0 %v18700_v25  ;;  %16190 = vmatpush3.bf16.msra.mxu1 %v18270_v34 }
 0x227   :  { %16115 = vmatpush3.bf16.msra.mxu0 %v18044_v13  ;;  %16191 = vmatprep.subr.bf16.mxu1 %v17960_v3 }
 0x228   :  { %16116 = vmatprep.subr.bf16.mxu0 %v17960_v3  ;;  %13104 = vmatprep.mubr.msk.f32.mxu0 %vm17961_vm0, %v17962_v12 }
 0x22a   :  { %16193 = vmatpush3.bf16.msra.mxu1 %v18278_v36 }
 0x22b   :  { %16118 = vmatpush3.bf16.msra.mxu0 %v18049_v14  ;;  %16194 = vmatprep.subr.bf16.mxu1 %v17960_v3 }
 0x22c   :  { %16119 = vmatprep.subr.bf16.mxu0 %v17960_v3 }
 0x22e   :  { %16196 = vmatpush3.bf16.msra.mxu1 %v18284_v37 }
 0x22f   :  { %16121 = vmatpush3.bf16.msra.mxu0 %v18070_v20  ;;  %16197 = vmatprep.subr.bf16.mxu1 %v17960_v3 }
 0x230   :  { %16122 = vmatprep.subr.bf16.mxu0 %v17960_v3 }
 0x232   :  { %16199 = vmatpush3.bf16.msra.mxu1 %v18290_v42 }
 0x233   :  { %16124 = vmatpush3.bf16.msra.mxu0 %v18088_v27  ;;  %16200 = vmatprep.subr.bf16.mxu1 %v17960_v3 }
 0x234   :  { %16125 = vmatprep.subr.bf16.mxu0 %v17960_v3 }
 0x236   :  { %16202 = vmatpush3.bf16.msra.mxu1 %v18296_v46 }
 0x237   :  { %16127 = vmatpush3.bf16.msra.mxu0 %v18117_v43  ;;  %16203 = vmatprep.subr.bf16.mxu1 %v17960_v3 }
 0x238   :  { %16128 = vmatprep.subr.bf16.mxu0 %v17960_v3 }
 0x23a   :  { %16205 = vmatpush3.bf16.msra.mxu1 %v18302_v50 }
 0x23b   :  { %16130 = vmatpush3.bf16.msra.mxu0 %v18131_v51  ;;  %16206 = vmatprep.subr.bf16.mxu1 %v17960_v3 }
 0x23c   :  { %16131 = vmatprep.subr.bf16.mxu0 %v17960_v3 }
 0x23e   :  { %16208 = vmatpush3.bf16.msra.mxu1 %v18308_v56 }
 0x23f   :  { %16133 = vmatpush3.bf16.msra.mxu0 %v18133_v52  ;;  %16209 = vmatprep.subr.bf16.mxu1 %v17960_v3 }
 0x240   :  { %16134 = vmatprep.subr.bf16.mxu0 %v17960_v3 }
 0x241   :  { %13210 = vmatmul.mubr.f32.vlgmr.msra.gmra.mrb[4].mxu1 %v18832_v5 }
 0x242   :  { %16211 = vmatpush3.bf16.msra.mxu1 %v18044_v13  ;;  %13244 = vmatprep.mubr.msk.f32.mxu1 %vm17961_vm0, %v17962_v12 }
 0x243   :  { %16136 = vmatpush3.bf16.msra.mxu0 %v18137_v54  ;;  %16212 = vmatprep.subr.bf16.mxu1 %v17960_v3 }
 0x244   :  { %16281 = vmatprep.subr.bf16.mxu0 %v17960_v3 }
 0x246   :  { %13105 = vmatmul.mubr.f32.vlgmr.msra.gmra.mrb[4].mxu0 %v18700_v25  ;;  %16214 = vmatpush3.bf16.msra.mxu1 %v18049_v14  ;;  %v4003_v25 = vsub.f32 %v18963_v49, %v4002_v55 }
 0x247   :  { %16283 = vmatpush3.bf16.msra.mxu0 %v18044_v13  ;;  %16215 = vmatprep.subr.bf16.mxu1 %v17960_v3 }
 0x248   :  { %16284 = vmatprep.subr.bf16.mxu0 %v17960_v3  ;;  %13349 = vmatprep.mubr.msk.f32.mxu0 %vm17961_vm0, %v17962_v12  ;;  %v4004_v4 = vand.u32 4294901760, %v4003_v25 }
 0x24a   :  { %16217 = vmatpush3.bf16.msra.mxu1 %v18070_v20 }
 0x24b   :  { %16286 = vmatpush3.bf16.msra.mxu0 %v18049_v14  ;;  %16218 = vmatprep.subr.bf16.mxu1 %v17960_v3 }
 0x24c   :  { %16287 = vmatprep.subr.bf16.mxu0 %v17960_v3 }
 0x24e   :  { %16220 = vmatpush3.bf16.msra.mxu1 %v18088_v27 }
 0x24f   :  { %16289 = vmatpush3.bf16.msra.mxu0 %v18070_v20  ;;  %16221 = vmatprep.subr.bf16.mxu1 %v17960_v3 }
 0x250   :  { %16290 = vmatprep.subr.bf16.mxu0 %v17960_v3 }
 0x252   :  { %16223 = vmatpush3.bf16.msra.mxu1 %v18117_v43 }
 0x253   :  { %16292 = vmatpush3.bf16.msra.mxu0 %v18088_v27  ;;  %16224 = vmatprep.subr.bf16.mxu1 %v17960_v3 }
 0x254   :  { %16293 = vmatprep.subr.bf16.mxu0 %v17960_v3 }
 0x256   :  { %16226 = vmatpush3.bf16.msra.mxu1 %v18131_v51 }
 0x257   :  { %16295 = vmatpush3.bf16.msra.mxu0 %v18117_v43  ;;  %16227 = vmatprep.subr.bf16.mxu1 %v17960_v3 }
 0x258   :  { %16296 = vmatprep.subr.bf16.mxu0 %v17960_v3 }
 0x259   :  { %v1972_v19 = vpop.f32.mrb[2].mxu0 }
 0x25a   :  { %v1976_v53 = vmul.f32 %v1972_v19, %v1972_v19  ;;  %v12686_v59 = vpop.f32.mrb[3].mxu0  ;;  %16229 = vmatpush3.bf16.msra.mxu1 %v18133_v52  ;;  %v5855_v19 = vpop.permute.xlu0 %5854 }
 0x25b   :  { %16298 = vmatpush3.bf16.msra.mxu0 %v18131_v51  ;;  %16230 = vmatprep.subr.bf16.mxu1 %v17960_v3 }
 0x25c   :  { %v18973_v61 = vadd.f32 %v1976_v53, %v18841_v11  ;;  %16299 = vmatprep.subr.bf16.mxu0 %v17960_v3  ;;  %v19343_v53 = vld [vmem:[%s20323_s3] sm:$0xff] }
 0x25e   :  { %16232 = vmatpush3.bf16.msra.mxu1 %v18137_v54 }
 0x25f   :  { %16301 = vmatpush3.bf16.msra.mxu0 %v18133_v52  ;;  %16233 = vmatprep.subr.bf16.mxu1 %v17960_v3 }
 0x260   :  { %16302 = vmatprep.subr.bf16.mxu0 %v17960_v3 }
 0x261   :  { %13245 = vmatmul.mubr.f32.vlgmr.msra.gmra.mrb[4].mxu1 %v3356_v7 }
 0x262   :  { %16235 = vmatpush3.bf16.msra.mxu1 %v18189_v29  ;;  %13279 = vmatprep.mubr.msk.f32.mxu1 %vm17961_vm0, %v17962_v12 }
 0x263   :  { %16304 = vmatpush3.bf16.msra.mxu0 %v18137_v54  ;;  %16236 = vmatprep.subr.bf16.mxu1 %v17960_v3 }
 0x264   :  { %16305 = vmatprep.subr.bf16.mxu0 %v17960_v3 }
 0x266   :  { %13350 = vmatmul.mubr.f32.vlgmr.msra.gmra.mrb[6].mxu0 %v4004_v4  ;;  %16238 = vmatpush3.bf16.msra.mxu1 %v18194_v31 }
 0x267   :  { %16307 = vmatpush3.bf16.msra.mxu0 %v18213_v48  ;;  %16239 = vmatprep.subr.bf16.mxu1 %v17960_v3 }
 0x268   :  { %16308 = vmatprep.subr.bf16.mxu0 %v17960_v3  ;;  %13384 = vmatprep.mubr.msk.f32.mxu0 %vm17961_vm0, %v17962_v12 }
 0x26a   :  { %16241 = vmatpush3.bf16.msra.mxu1 %v18196_v32 }
 0x26b   :  { %16310 = vmatpush3.bf16.msra.mxu0 %v18221_v60  ;;  %16242 = vmatprep.subr.bf16.mxu1 %v17960_v3 }
 0x26c   :  { %16311 = vmatprep.subr.bf16.mxu0 %v17960_v3 }
 0x26e   :  { %16244 = vmatpush3.bf16.msra.mxu1 %v18198_v33 }
 0x26f   :  { %16313 = vmatpush3.bf16.msra.mxu0 %v18228_v9  ;;  %16245 = vmatprep.subr.bf16.mxu1 %v17960_v3 }
 0x270   :  { %16314 = vmatprep.subr.bf16.mxu0 %v17960_v3 }
 0x272   :  { %16247 = vmatpush3.bf16.msra.mxu1 %v18203_v38 }
 0x273   :  { %16316 = vmatpush3.bf16.msra.mxu0 %v18235_v21  ;;  %16248 = vmatprep.subr.bf16.mxu1 %v17960_v3 }
 0x274   :  { %16317 = vmatprep.subr.bf16.mxu0 %v17960_v3 }
 0x276   :  { %16250 = vmatpush3.bf16.msra.mxu1 %v18205_v39 }
 0x277   :  { %16319 = vmatpush3.bf16.msra.mxu0 %v18241_v22  ;;  %16251 = vmatprep.subr.bf16.mxu1 %v17960_v3 }
 0x278   :  { %16320 = vmatprep.subr.bf16.mxu0 %v17960_v3 }
 0x27a   :  { %16253 = vmatpush3.bf16.msra.mxu1 %v18207_v40 }
 0x27b   :  { %16322 = vmatpush3.bf16.msra.mxu0 %v18246_v15  ;;  %16254 = vmatprep.subr.bf16.mxu1 %v17960_v3 }
 0x27c   :  { %16323 = vmatprep.subr.bf16.mxu0 %v17960_v3 }
 0x27e   :  { %16256 = vmatpush3.bf16.msra.mxu1 %v18210_v45 }
 0x27f   :  { %16325 = vmatpush3.bf16.msra.mxu0 %v18252_v8  ;;  %16257 = vmatprep.subr.bf16.mxu1 %v17960_v3 }
 0x280   :  { %16326 = vmatprep.subr.bf16.mxu0 %v17960_v3 }
 0x281   :  { %13280 = vmatmul.mubr.f32.vlgmr.msra.gmra.mrb[4].mxu1 %v18825_v2 }
 0x282   :  { %16259 = vmatpush3.bf16.msra.mxu1 %v18044_v13  ;;  %13314 = vmatprep.mubr.msk.f32.mxu1 %vm17961_vm0, %v17962_v12 }
 0x283   :  { %16328 = vmatpush3.bf16.msra.mxu0 %v18256_v10  ;;  %16260 = vmatprep.subr.bf16.mxu1 %v17960_v3 }
 0x284   :  { %16329 = vmatprep.subr.bf16.mxu0 %v17960_v3 }
 0x286   :  { %13385 = vmatmul.mubr.f32.vlgmr.msra.gmra.mrb[6].mxu0 %v18956_v44  ;;  %16262 = vmatpush3.bf16.msra.mxu1 %v18049_v14 }
 0x287   :  { %16331 = vmatpush3.bf16.msra.mxu0 %v18263_v30  ;;  %16263 = vmatprep.subr.bf16.mxu1 %v17960_v3 }
 0x288   :  { %16332 = vmatprep.subr.bf16.mxu0 %v17960_v3  ;;  %13419 = vmatprep.mubr.msk.f32.mxu0 %vm17961_vm0, %v17962_v12 }
 0x28a   :  { %16265 = vmatpush3.bf16.msra.mxu1 %v18070_v20 }
 0x28b   :  { %16334 = vmatpush3.bf16.msra.mxu0 %v18270_v34  ;;  %16266 = vmatprep.subr.bf16.mxu1 %v17960_v3 }
 0x28c   :  { %16335 = vmatprep.subr.bf16.mxu0 %v17960_v3 }
 0x28e   :  { %16268 = vmatpush3.bf16.msra.mxu1 %v18088_v27 }
 0x28f   :  { %16337 = vmatpush3.bf16.msra.mxu0 %v18278_v36  ;;  %16269 = vmatprep.subr.bf16.mxu1 %v17960_v3 }
 0x290   :  { %16338 = vmatprep.subr.bf16.mxu0 %v17960_v3 }
 0x292   :  { %16271 = vmatpush3.bf16.msra.mxu1 %v18117_v43 }
 0x293   :  { %16340 = vmatpush3.bf16.msra.mxu0 %v18284_v37  ;;  %16272 = vmatprep.subr.bf16.mxu1 %v17960_v3 }
 0x294   :  { %16341 = vmatprep.subr.bf16.mxu0 %v17960_v3 }
 0x296   :  { %16274 = vmatpush3.bf16.msra.mxu1 %v18131_v51 }
 0x297   :  { %16343 = vmatpush3.bf16.msra.mxu0 %v18290_v42  ;;  %16275 = vmatprep.subr.bf16.mxu1 %v17960_v3 }
 0x298   :  { %16344 = vmatprep.subr.bf16.mxu0 %v17960_v3 }
 0x29a   :  { %16277 = vmatpush3.bf16.msra.mxu1 %v18133_v52 }
 0x29b   :  { %16346 = vmatpush3.bf16.msra.mxu0 %v18296_v46  ;;  %16278 = vmatprep.subr.bf16.mxu1 %v17960_v3 }
 0x29c   :  { %16347 = vmatprep.subr.bf16.mxu0 %v17960_v3 }
 0x29e   :  { %16280 = vmatpush3.bf16.msra.mxu1 %v18137_v54 }
 0x29f   :  { %16349 = vmatpush3.bf16.msra.mxu0 %v18302_v50  ;;  %16425 = vmatprep.subr.bf16.mxu1 %v17960_v3 }
 0x2a0   :  { %16350 = vmatprep.subr.bf16.mxu0 %v17960_v3 }
 0x2a1   :  { %13315 = vmatmul.mubr.f32.vlgmr.msra.gmra.mrb[4].mxu1 %v18825_v2  ;;  %v4648_v2 = vand.u32 4294901760, %v19089_v57 }
 0x2a2   :  { %16427 = vmatpush3.bf16.msra.mxu1 %v18044_v13  ;;  %13559 = vmatprep.mubr.msk.f32.mxu1 %vm17961_vm0, %v17962_v12 }
 0x2a3   :  { %16352 = vmatpush3.bf16.msra.mxu0 %v18308_v56  ;;  %16428 = vmatprep.subr.bf16.mxu1 %v17960_v3  ;;  %v4649_v6 = vsub.f32 %v19089_v57, %v4648_v2 }
 0x2a4   :  { %16353 = vmatprep.subr.bf16.mxu0 %v17960_v3 }
 0x2a5   :  { %v4650_v47 = vand.u32 4294901760, %v4649_v6 }
 0x2a6   :  { %13420 = vmatmul.mubr.f32.vlgmr.msra.gmra.mrb[6].mxu0 %v18963_v49  ;;  %16430 = vmatpush3.bf16.msra.mxu1 %v18049_v14  ;;  %v19281_v49 = vld [vmem:[%s20324_s4] sm:$0xff] }
 0x2a7   :  { %16355 = vmatpush3.bf16.msra.mxu0 %v18044_v13  ;;  %16431 = vmatprep.subr.bf16.mxu1 %v17960_v3 }
 0x2a8   :  { %16356 = vmatprep.subr.bf16.mxu0 %v17960_v3  ;;  %13454 = vmatprep.mubr.msk.f32.mxu0 %vm17961_vm0, %v17962_v12 }
 0x2a9   :  { %7146 = vrot.lane.b32.xlu0 %v19281_v49, %s17972_s24  ;;  %7792 = vrot.lane.b32.xlu1 %v19281_v49, %s17973_s27 }
 0x2aa   :  { %16433 = vmatpush3.bf16.msra.mxu1 %v18070_v20 }
 0x2ab   :  { %16358 = vmatpush3.bf16.msra.mxu0 %v18049_v14  ;;  %16434 = vmatprep.subr.bf16.mxu1 %v17960_v3 }
 0x2ac   :  { %16359 = vmatprep.subr.bf16.mxu0 %v17960_v3 }
 0x2ad   :  { %8438 = vrot.lane.b32.xlu0 %v19281_v49, %s17974_s28  ;;  %9084 = vrot.lane.b32.xlu1 %v19281_v49, %s17975_s29 }
 0x2ae   :  { %16436 = vmatpush3.bf16.msra.mxu1 %v18088_v27 }
 0x2af   :  { %16361 = vmatpush3.bf16.msra.mxu0 %v18070_v20  ;;  %16437 = vmatprep.subr.bf16.mxu1 %v17960_v3 }
 0x2b0   :  { %16362 = vmatprep.subr.bf16.mxu0 %v17960_v3 }
 0x2b1   :  { %9730 = vrot.lane.b32.xlu0 %v19281_v49, %s17976_s30 }
 0x2b2   :  { %16439 = vmatpush3.bf16.msra.mxu1 %v18117_v43 }
 0x2b3   :  { %16364 = vmatpush3.bf16.msra.mxu0 %v18088_v27  ;;  %16440 = vmatprep.subr.bf16.mxu1 %v17960_v3 }
 0x2b4   :  { %16365 = vmatprep.subr.bf16.mxu0 %v17960_v3  ;;  %v2618_v62 = vpop.f32.mrb[2].mxu1 }
 0x2b5   :  { %v2622_v63 = vmul.f32 %v2618_v62, %v2618_v62  ;;  %v12896_v1 = vpop.f32.mrb[3].mxu1 }
 0x2b6   :  { %16442 = vmatpush3.bf16.msra.mxu1 %v18131_v51 }
 0x2b7   :  { %16367 = vmatpush3.bf16.msra.mxu0 %v18117_v43  ;;  %v19097_v5 = vadd.f32 %v2622_v63, %v18973_v61  ;;  %16443 = vmatprep.subr.bf16.mxu1 %v17960_v3  ;;  %v6501_v63 = vpop.permute.xlu1 %6500 }
 0x2b8   :  { %16368 = vmatprep.subr.bf16.mxu0 %v17960_v3  ;;  %v6502_v1 = vmul.f32 %v19343_v53, %v6501_v63 }
 0x2ba   :  { %16445 = vmatpush3.bf16.msra.mxu1 %v18133_v52 }
 0x2bb   :  { %16370 = vmatpush3.bf16.msra.mxu0 %v18131_v51  ;;  %16446 = vmatprep.subr.bf16.mxu1 %v17960_v3 }
 0x2bc   :  { %16371 = vmatprep.subr.bf16.mxu0 %v17960_v3 }
 0x2be   :  { %16448 = vmatpush3.bf16.msra.mxu1 %v18137_v54 }
 0x2bf   :  { %16373 = vmatpush3.bf16.msra.mxu0 %v18133_v52  ;;  %16449 = vmatprep.subr.bf16.mxu1 %v17960_v3 }
 0x2c0   :  { %16374 = vmatprep.subr.bf16.mxu0 %v17960_v3 }
 0x2c1   :  { %13560 = vmatmul.mubr.f32.vlgmr.msra.gmra.mrb[6].mxu1 %v4650_v47 }
 0x2c2   :  { %16451 = vmatpush3.bf16.msra.mxu1 %v18213_v48  ;;  %13594 = vmatprep.mubr.msk.f32.mxu1 %vm17961_vm0, %v17962_v12 }
 0x2c3   :  { %16376 = vmatpush3.bf16.msra.mxu0 %v18137_v54  ;;  %16452 = vmatprep.subr.bf16.mxu1 %v17960_v3 }
 0x2c4   :  { %16377 = vmatprep.subr.bf16.mxu0 %v17960_v3 }
 0x2c6   :  { %13455 = vmatmul.mubr.f32.vlgmr.msra.gmra.mrb[6].mxu0 %v4002_v55  ;;  %16454 = vmatpush3.bf16.msra.mxu1 %v18221_v60  ;;  %v5856_v55 = vmul.f32 %v19343_v53, %v5855_v19 }
 0x2c7   :  { %16379 = vmatpush3.bf16.msra.mxu0 %v18189_v29  ;;  %16455 = vmatprep.subr.bf16.mxu1 %v17960_v3 }
 0x2c8   :  { %16380 = vmatprep.subr.bf16.mxu0 %v17960_v3  ;;  %13489 = vmatprep.mubr.msk.f32.mxu0 %vm17961_vm0, %v17962_v12  ;;  %v19348_v59 = vand.u32 4294901760, %v5856_v55 }
 0x2ca   :  { %16457 = vmatpush3.bf16.msra.mxu1 %v18228_v9  ;;  %v19355_v61 = vsub.f32 %v5856_v55, %v19348_v59 }
 0x2cb   :  { %16382 = vmatpush3.bf16.msra.mxu0 %v18194_v31  ;;  %16458 = vmatprep.subr.bf16.mxu1 %v17960_v3 }
 0x2cc   :  { %16383 = vmatprep.subr.bf16.mxu0 %v17960_v3  ;;  %v5940_v16 = vand.u32 4294901760, %v19355_v61 }
 0x2ce   :  { %16460 = vmatpush3.bf16.msra.mxu1 %v18235_v21 }
 0x2cf   :  { %16385 = vmatpush3.bf16.msra.mxu0 %v18196_v32  ;;  %16461 = vmatprep.subr.bf16.mxu1 %v17960_v3 }
 0x2d0   :  { %16386 = vmatprep.subr.bf16.mxu0 %v17960_v3 }
 0x2d2   :  { %16463 = vmatpush3.bf16.msra.mxu1 %v18241_v22 }
 0x2d3   :  { %16388 = vmatpush3.bf16.msra.mxu0 %v18198_v33  ;;  %16464 = vmatprep.subr.bf16.mxu1 %v17960_v3 }
 0x2d4   :  { %16389 = vmatprep.subr.bf16.mxu0 %v17960_v3 }
 0x2d6   :  { %16466 = vmatpush3.bf16.msra.mxu1 %v18246_v15 }
 0x2d7   :  { %16391 = vmatpush3.bf16.msra.mxu0 %v18203_v38  ;;  %16467 = vmatprep.subr.bf16.mxu1 %v17960_v3 }
 0x2d8   :  { %16392 = vmatprep.subr.bf16.mxu0 %v17960_v3 }
 0x2da   :  { %16469 = vmatpush3.bf16.msra.mxu1 %v18252_v8 }
 0x2db   :  { %16394 = vmatpush3.bf16.msra.mxu0 %v18205_v39  ;;  %16470 = vmatprep.subr.bf16.mxu1 %v17960_v3 }
 0x2dc   :  { %16395 = vmatprep.subr.bf16.mxu0 %v17960_v3 }
 0x2de   :  { %16472 = vmatpush3.bf16.msra.mxu1 %v18256_v10 }
 0x2df   :  { %16397 = vmatpush3.bf16.msra.mxu0 %v18207_v40  ;;  %16473 = vmatprep.subr.bf16.mxu1 %v17960_v3 }
 0x2e0   :  { %16398 = vmatprep.subr.bf16.mxu0 %v17960_v3 }
 0x2e1   :  { %13595 = vmatmul.mubr.f32.vlgmr.msra.gmra.mrb[6].mxu1 %v19082_v28 }
 0x2e2   :  { %16475 = vmatpush3.bf16.msra.mxu1 %v18263_v30  ;;  %13629 = vmatprep.mubr.msk.f32.mxu1 %vm17961_vm0, %v17962_v12 }
 0x2e3   :  { %16400 = vmatpush3.bf16.msra.mxu0 %v18210_v45  ;;  %16476 = vmatprep.subr.bf16.mxu1 %v17960_v3 }
 0x2e4   :  { %16401 = vmatprep.subr.bf16.mxu0 %v17960_v3 }
 0x2e6   :  { %13490 = vmatmul.mubr.f32.vlgmr.msra.gmra.mrb[6].mxu0 %v18956_v44  ;;  %16478 = vmatpush3.bf16.msra.mxu1 %v18270_v34 }
 0x2e7   :  { %16403 = vmatpush3.bf16.msra.mxu0 %v18044_v13  ;;  %16479 = vmatprep.subr.bf16.mxu1 %v17960_v3 }
 0x2e8   :  { %16404 = vmatprep.subr.bf16.mxu0 %v17960_v3  ;;  %13524 = vmatprep.mubr.msk.f32.mxu0 %vm17961_vm0, %v17962_v12 }
 0x2ea   :  { %16481 = vmatpush3.bf16.msra.mxu1 %v18278_v36 }
 0x2eb   :  { %16406 = vmatpush3.bf16.msra.mxu0 %v18049_v14  ;;  %16482 = vmatprep.subr.bf16.mxu1 %v17960_v3 }
 0x2ec   :  { %16407 = vmatprep.subr.bf16.mxu0 %v17960_v3 }
 0x2ee   :  { %16484 = vmatpush3.bf16.msra.mxu1 %v18284_v37 }
 0x2ef   :  { %16409 = vmatpush3.bf16.msra.mxu0 %v18070_v20  ;;  %16485 = vmatprep.subr.bf16.mxu1 %v17960_v3 }
 0x2f0   :  { %16410 = vmatprep.subr.bf16.mxu0 %v17960_v3 }
 0x2f2   :  { %16487 = vmatpush3.bf16.msra.mxu1 %v18290_v42 }
 0x2f3   :  { %16412 = vmatpush3.bf16.msra.mxu0 %v18088_v27  ;;  %16488 = vmatprep.subr.bf16.mxu1 %v17960_v3 }
 0x2f4   :  { %16413 = vmatprep.subr.bf16.mxu0 %v17960_v3 }
 0x2f6   :  { %16490 = vmatpush3.bf16.msra.mxu1 %v18296_v46 }
 0x2f7   :  { %16415 = vmatpush3.bf16.msra.mxu0 %v18117_v43  ;;  %16491 = vmatprep.subr.bf16.mxu1 %v17960_v3 }
 0x2f8   :  { %16416 = vmatprep.subr.bf16.mxu0 %v17960_v3 }
 0x2fa   :  { %16493 = vmatpush3.bf16.msra.mxu1 %v18302_v50 }
 0x2fb   :  { %16418 = vmatpush3.bf16.msra.mxu0 %v18131_v51  ;;  %16494 = vmatprep.subr.bf16.mxu1 %v17960_v3 }
 0x2fc   :  { %16419 = vmatprep.subr.bf16.mxu0 %v17960_v3 }
 0x2fe   :  { %16496 = vmatpush3.bf16.msra.mxu1 %v18308_v56 }
 0x2ff   :  { %16421 = vmatpush3.bf16.msra.mxu0 %v18133_v52  ;;  %16497 = vmatprep.subr.bf16.mxu1 %v17960_v3 }
 0x300   :  { %16422 = vmatprep.subr.bf16.mxu0 %v17960_v3 }
 0x301   :  { %13630 = vmatmul.mubr.f32.vlgmr.msra.gmra.mrb[6].mxu1 %v19089_v57  ;;  %v5941_v57 = vsub.f32 %v19355_v61, %v5940_v16 }
 0x302   :  { %16499 = vmatpush3.bf16.msra.mxu1 %v18044_v13  ;;  %13664 = vmatprep.mubr.msk.f32.mxu1 %vm17961_vm0, %v17962_v12 }
 0x303   :  { %16424 = vmatpush3.bf16.msra.mxu0 %v18137_v54  ;;  %16500 = vmatprep.subr.bf16.mxu1 %v17960_v3  ;;  %v5942_v62 = vand.u32 4294901760, %v5941_v57 }
 0x304   :  { %16569 = vmatprep.subr.bf16.mxu0 %v17960_v3 }
 0x306   :  { %13525 = vmatmul.mubr.f32.vlgmr.msra.gmra.mrb[6].mxu0 %v18956_v44  ;;  %16502 = vmatpush3.bf16.msra.mxu1 %v18049_v14  ;;  %v5296_v44 = vand.u32 4294901760, %v5295_v41 }
 0x307   :  { %16571 = vmatpush3.bf16.msra.mxu0 %v18044_v13  ;;  %16503 = vmatprep.subr.bf16.mxu1 %v17960_v3 }
 0x308   :  { %16572 = vmatprep.subr.bf16.mxu0 %v17960_v3  ;;  %13769 = vmatprep.mubr.msk.f32.mxu0 %vm17961_vm0, %v17962_v12 }
 0x30a   :  { %16505 = vmatpush3.bf16.msra.mxu1 %v18070_v20 }
 0x30b   :  { %16574 = vmatpush3.bf16.msra.mxu0 %v18049_v14  ;;  %16506 = vmatprep.subr.bf16.mxu1 %v17960_v3 }
 0x30c   :  { %16575 = vmatprep.subr.bf16.mxu0 %v17960_v3 }
 0x30e   :  { %16508 = vmatpush3.bf16.msra.mxu1 %v18088_v27 }
 0x30f   :  { %16577 = vmatpush3.bf16.msra.mxu0 %v18070_v20  ;;  %16509 = vmatprep.subr.bf16.mxu1 %v17960_v3 }
 0x310   :  { %16578 = vmatprep.subr.bf16.mxu0 %v17960_v3 }
 0x312   :  { %16511 = vmatpush3.bf16.msra.mxu1 %v18117_v43 }
 0x313   :  { %16580 = vmatpush3.bf16.msra.mxu0 %v18088_v27  ;;  %16512 = vmatprep.subr.bf16.mxu1 %v17960_v3 }
 0x314   :  { %16581 = vmatprep.subr.bf16.mxu0 %v17960_v3 }
 0x316   :  { %16514 = vmatpush3.bf16.msra.mxu1 %v18131_v51 }
 0x317   :  { %16583 = vmatpush3.bf16.msra.mxu0 %v18117_v43  ;;  %16515 = vmatprep.subr.bf16.mxu1 %v17960_v3 }
 0x318   :  { %16584 = vmatprep.subr.bf16.mxu0 %v17960_v3 }
 0x319   :  { %v3264_v7 = vpop.f32.mrb[4].mxu0 }
 0x31a   :  { %v3268_v11 = vmul.f32 %v3264_v7, %v3264_v7  ;;  %v13106_v17 = vpop.f32.mrb[5].mxu0  ;;  %16517 = vmatpush3.bf16.msra.mxu1 %v18133_v52 }
 0x31b   :  { %16586 = vmatpush3.bf16.msra.mxu0 %v18131_v51  ;;  %16518 = vmatprep.subr.bf16.mxu1 %v17960_v3 }
 0x31c   :  { %v19229_v0 = vadd.f32 %v3268_v11, %v19097_v5  ;;  %16587 = vmatprep.subr.bf16.mxu0 %v17960_v3  ;;  %v7147_v11 = vpop.permute.xlu0 %7146 }
 0x31e   :  { %16520 = vmatpush3.bf16.msra.mxu1 %v18137_v54 }
 0x31f   :  { %16589 = vmatpush3.bf16.msra.mxu0 %v18133_v52  ;;  %16521 = vmatprep.subr.bf16.mxu1 %v17960_v3 }
 0x320   :  { %16590 = vmatprep.subr.bf16.mxu0 %v17960_v3  ;;  %v8439_v49 = vpop.permute.xlu0 %8438 }
 0x321   :  { %13665 = vmatmul.mubr.f32.vlgmr.msra.gmra.mrb[6].mxu1 %v4648_v2  ;;  %v19478_v2 = vand.u32 4294901760, %v6502_v1 }
 0x322   :  { %16523 = vmatpush3.bf16.msra.mxu1 %v18189_v29  ;;  %13699 = vmatprep.mubr.msk.f32.mxu1 %vm17961_vm0, %v17962_v12 }
 0x323   :  { %16592 = vmatpush3.bf16.msra.mxu0 %v18137_v54  ;;  %16524 = vmatprep.subr.bf16.mxu1 %v17960_v3  ;;  %v19485_v5 = vsub.f32 %v6502_v1, %v19478_v2 }
 0x324   :  { %16593 = vmatprep.subr.bf16.mxu0 %v17960_v3 }
 0x325   :  { %v6586_v23 = vand.u32 4294901760, %v19485_v5 }
 0x326   :  { %13770 = vmatmul.mubr.f32.vlgmr.msra.gmra.mrb[8].mxu0 %v5296_v44  ;;  %16526 = vmatpush3.bf16.msra.mxu1 %v18194_v31 }
 0x327   :  { %16595 = vmatpush3.bf16.msra.mxu0 %v18213_v48  ;;  %16527 = vmatprep.subr.bf16.mxu1 %v17960_v3 }
 0x328   :  { %16596 = vmatprep.subr.bf16.mxu0 %v17960_v3  ;;  %13804 = vmatprep.mubr.msk.f32.mxu0 %vm17961_vm0, %v17962_v12 }
 0x32a   :  { %16529 = vmatpush3.bf16.msra.mxu1 %v18196_v32 }
 0x32b   :  { %16598 = vmatpush3.bf16.msra.mxu0 %v18221_v60  ;;  %16530 = vmatprep.subr.bf16.mxu1 %v17960_v3 }
 0x32c   :  { %16599 = vmatprep.subr.bf16.mxu0 %v17960_v3 }
 0x32e   :  { %16532 = vmatpush3.bf16.msra.mxu1 %v18198_v33 }
 0x32f   :  { %16601 = vmatpush3.bf16.msra.mxu0 %v18228_v9  ;;  %16533 = vmatprep.subr.bf16.mxu1 %v17960_v3 }
 0x330   :  { %16602 = vmatprep.subr.bf16.mxu0 %v17960_v3 }
 0x332   :  { %16535 = vmatpush3.bf16.msra.mxu1 %v18203_v38 }
 0x333   :  { %16604 = vmatpush3.bf16.msra.mxu0 %v18235_v21  ;;  %16536 = vmatprep.subr.bf16.mxu1 %v17960_v3 }
 0x334   :  { %16605 = vmatprep.subr.bf16.mxu0 %v17960_v3 }
 0x336   :  { %16538 = vmatpush3.bf16.msra.mxu1 %v18205_v39 }
 0x337   :  { %16607 = vmatpush3.bf16.msra.mxu0 %v18241_v22  ;;  %16539 = vmatprep.subr.bf16.mxu1 %v17960_v3 }
 0x338   :  { %16608 = vmatprep.subr.bf16.mxu0 %v17960_v3 }
 0x33a   :  { %16541 = vmatpush3.bf16.msra.mxu1 %v18207_v40 }
 0x33b   :  { %16610 = vmatpush3.bf16.msra.mxu0 %v18246_v15  ;;  %16542 = vmatprep.subr.bf16.mxu1 %v17960_v3 }
 0x33c   :  { %16611 = vmatprep.subr.bf16.mxu0 %v17960_v3 }
 0x33e   :  { %16544 = vmatpush3.bf16.msra.mxu1 %v18210_v45 }
 0x33f   :  { %16613 = vmatpush3.bf16.msra.mxu0 %v18252_v8  ;;  %16545 = vmatprep.subr.bf16.mxu1 %v17960_v3 }
 0x340   :  { %16614 = vmatprep.subr.bf16.mxu0 %v17960_v3 }
 0x341   :  { %13700 = vmatmul.mubr.f32.vlgmr.msra.gmra.mrb[6].mxu1 %v19082_v28 }
 0x342   :  { %16547 = vmatpush3.bf16.msra.mxu1 %v18044_v13  ;;  %13734 = vmatprep.mubr.msk.f32.mxu1 %vm17961_vm0, %v17962_v12 }
 0x343   :  { %16616 = vmatpush3.bf16.msra.mxu0 %v18256_v10  ;;  %16548 = vmatprep.subr.bf16.mxu1 %v17960_v3 }
 0x344   :  { %16617 = vmatprep.subr.bf16.mxu0 %v17960_v3 }
 0x346   :  { %13805 = vmatmul.mubr.f32.vlgmr.msra.gmra.mrb[8].mxu0 %v19212_v58  ;;  %16550 = vmatpush3.bf16.msra.mxu1 %v18049_v14 }
 0x347   :  { %16619 = vmatpush3.bf16.msra.mxu0 %v18263_v30  ;;  %16551 = vmatprep.subr.bf16.mxu1 %v17960_v3 }
 0x348   :  { %16620 = vmatprep.subr.bf16.mxu0 %v17960_v3  ;;  %13839 = vmatprep.mubr.msk.f32.mxu0 %vm17961_vm0, %v17962_v12 }
 0x34a   :  { %16553 = vmatpush3.bf16.msra.mxu1 %v18070_v20 }
 0x34b   :  { %16622 = vmatpush3.bf16.msra.mxu0 %v18270_v34  ;;  %16554 = vmatprep.subr.bf16.mxu1 %v17960_v3 }
 0x34c   :  { %16623 = vmatprep.subr.bf16.mxu0 %v17960_v3 }
 0x34e   :  { %16556 = vmatpush3.bf16.msra.mxu1 %v18088_v27 }
 0x34f   :  { %16625 = vmatpush3.bf16.msra.mxu0 %v18278_v36  ;;  %16557 = vmatprep.subr.bf16.mxu1 %v17960_v3 }
 0x350   :  { %16626 = vmatprep.subr.bf16.mxu0 %v17960_v3 }
 0x352   :  { %16559 = vmatpush3.bf16.msra.mxu1 %v18117_v43 }
 0x353   :  { %16628 = vmatpush3.bf16.msra.mxu0 %v18284_v37  ;;  %16560 = vmatprep.subr.bf16.mxu1 %v17960_v3 }
 0x354   :  { %16629 = vmatprep.subr.bf16.mxu0 %v17960_v3 }
 0x356   :  { %16562 = vmatpush3.bf16.msra.mxu1 %v18131_v51 }
 0x357   :  { %16631 = vmatpush3.bf16.msra.mxu0 %v18290_v42  ;;  %16563 = vmatprep.subr.bf16.mxu1 %v17960_v3 }
 0x358   :  { %16632 = vmatprep.subr.bf16.mxu0 %v17960_v3 }
 0x35a   :  { %16565 = vmatpush3.bf16.msra.mxu1 %v18133_v52 }
 0x35b   :  { %16634 = vmatpush3.bf16.msra.mxu0 %v18296_v46  ;;  %16566 = vmatprep.subr.bf16.mxu1 %v17960_v3 }
 0x35c   :  { %16635 = vmatprep.subr.bf16.mxu0 %v17960_v3 }
 0x35e   :  { %16568 = vmatpush3.bf16.msra.mxu1 %v18137_v54 }
 0x35f   :  { %16637 = vmatpush3.bf16.msra.mxu0 %v18302_v50  ;;  %16713 = vmatprep.subr.bf16.mxu1 %v17960_v3 }
 0x360   :  { %16638 = vmatprep.subr.bf16.mxu0 %v17960_v3 }
 0x361   :  { %13735 = vmatmul.mubr.f32.vlgmr.msra.gmra.mrb[6].mxu1 %v19082_v28 }
 0x362   :  { %16715 = vmatpush3.bf16.msra.mxu1 %v18044_v13  ;;  %13979 = vmatprep.mubr.msk.f32.mxu1 %vm17961_vm0, %v17962_v12 }
 0x363   :  { %16640 = vmatpush3.bf16.msra.mxu0 %v18308_v56  ;;  %16716 = vmatprep.subr.bf16.mxu1 %v17960_v3 }
 0x364   :  { %16641 = vmatprep.subr.bf16.mxu0 %v17960_v3 }
 0x366   :  { %13840 = vmatmul.mubr.f32.vlgmr.msra.gmra.mrb[8].mxu0 %v19219_v24  ;;  %16718 = vmatpush3.bf16.msra.mxu1 %v18049_v14  ;;  %v6587_v24 = vsub.f32 %v19485_v5, %v6586_v23 }
 0x367   :  { %16643 = vmatpush3.bf16.msra.mxu0 %v18044_v13  ;;  %16719 = vmatprep.subr.bf16.mxu1 %v17960_v3 }
 0x368   :  { %16644 = vmatprep.subr.bf16.mxu0 %v17960_v3  ;;  %13874 = vmatprep.mubr.msk.f32.mxu0 %vm17961_vm0, %v17962_v12  ;;  %v6588_v7 = vand.u32 4294901760, %v6587_v24 }
 0x36a   :  { %16721 = vmatpush3.bf16.msra.mxu1 %v18070_v20 }
 0x36b   :  { %16646 = vmatpush3.bf16.msra.mxu0 %v18049_v14  ;;  %16722 = vmatprep.subr.bf16.mxu1 %v17960_v3 }
 0x36c   :  { %16647 = vmatprep.subr.bf16.mxu0 %v17960_v3 }
 0x36e   :  { %16724 = vmatpush3.bf16.msra.mxu1 %v18088_v27 }
 0x36f   :  { %16649 = vmatpush3.bf16.msra.mxu0 %v18070_v20  ;;  %16725 = vmatprep.subr.bf16.mxu1 %v17960_v3 }
 0x370   :  { %16650 = vmatprep.subr.bf16.mxu0 %v17960_v3 }
 0x372   :  { %16727 = vmatpush3.bf16.msra.mxu1 %v18117_v43 }
 0x373   :  { %16652 = vmatpush3.bf16.msra.mxu0 %v18088_v27  ;;  %16728 = vmatprep.subr.bf16.mxu1 %v17960_v3 }
 0x374   :  { %16653 = vmatprep.subr.bf16.mxu0 %v17960_v3  ;;  %v3910_v25 = vpop.f32.mrb[4].mxu1 }
 0x375   :  { %v3914_v4 = vmul.f32 %v3910_v25, %v3910_v25  ;;  %v13316_v26 = vpop.f32.mrb[5].mxu1 }
 0x376   :  { %16730 = vmatpush3.bf16.msra.mxu1 %v18131_v51 }
 0x377   :  { %16655 = vmatpush3.bf16.msra.mxu0 %v18117_v43  ;;  %v19363_v28 = vadd.f32 %v3914_v4, %v19229_v0  ;;  %16731 = vmatprep.subr.bf16.mxu1 %v17960_v3  ;;  %v7793_v4 = vpop.permute.xlu1 %7792 }
 0x378   :  { %16656 = vmatprep.subr.bf16.mxu0 %v17960_v3  ;;  %v7794_v26 = vmul.f32 %v19343_v53, %v7793_v4 }
 0x37a   :  { %16733 = vmatpush3.bf16.msra.mxu1 %v18133_v52 }
 0x37b   :  { %16658 = vmatpush3.bf16.msra.mxu0 %v18131_v51  ;;  %16734 = vmatprep.subr.bf16.mxu1 %v17960_v3 }
 0x37c   :  { %16659 = vmatprep.subr.bf16.mxu0 %v17960_v3 }
 0x37e   :  { %16736 = vmatpush3.bf16.msra.mxu1 %v18137_v54 }
 0x37f   :  { %16661 = vmatpush3.bf16.msra.mxu0 %v18133_v52  ;;  %16737 = vmatprep.subr.bf16.mxu1 %v17960_v3 }
 0x380   :  { %16662 = vmatprep.subr.bf16.mxu0 %v17960_v3 }
 0x381   :  { %13980 = vmatmul.mubr.f32.vlgmr.msra.gmra.mrb[8].mxu1 %v5942_v62 }
 0x382   :  { %16739 = vmatpush3.bf16.msra.mxu1 %v18213_v48  ;;  %14014 = vmatprep.mubr.msk.f32.mxu1 %vm17961_vm0, %v17962_v12 }
 0x383   :  { %16664 = vmatpush3.bf16.msra.mxu0 %v18137_v54  ;;  %16740 = vmatprep.subr.bf16.mxu1 %v17960_v3 }
 0x384   :  { %16665 = vmatprep.subr.bf16.mxu0 %v17960_v3 }
 0x386   :  { %13875 = vmatmul.mubr.f32.vlgmr.msra.gmra.mrb[8].mxu0 %v5294_v18  ;;  %16742 = vmatpush3.bf16.msra.mxu1 %v18221_v60  ;;  %v7148_v18 = vmul.f32 %v19343_v53, %v7147_v11 }
 0x387   :  { %16667 = vmatpush3.bf16.msra.mxu0 %v18189_v29  ;;  %16743 = vmatprep.subr.bf16.mxu1 %v17960_v3 }
 0x388   :  { %16668 = vmatprep.subr.bf16.mxu0 %v17960_v3  ;;  %13909 = vmatprep.mubr.msk.f32.mxu0 %vm17961_vm0, %v17962_v12  ;;  %v19604_v17 = vand.u32 4294901760, %v7148_v18 }
 0x38a   :  { %16745 = vmatpush3.bf16.msra.mxu1 %v18228_v9  ;;  %v19611_v0 = vsub.f32 %v7148_v18, %v19604_v17 }
 0x38b   :  { %16670 = vmatpush3.bf16.msra.mxu0 %v18194_v31  ;;  %16746 = vmatprep.subr.bf16.mxu1 %v17960_v3 }
 0x38c   :  { %16671 = vmatprep.subr.bf16.mxu0 %v17960_v3  ;;  %v7232_v55 = vand.u32 4294901760, %v19611_v0 }
 0x38e   :  { %16748 = vmatpush3.bf16.msra.mxu1 %v18235_v21 }
 0x38f   :  { %16673 = vmatpush3.bf16.msra.mxu0 %v18196_v32  ;;  %16749 = vmatprep.subr.bf16.mxu1 %v17960_v3 }
 0x390   :  { %16674 = vmatprep.subr.bf16.mxu0 %v17960_v3 }
 0x392   :  { %16751 = vmatpush3.bf16.msra.mxu1 %v18241_v22 }
 0x393   :  { %16676 = vmatpush3.bf16.msra.mxu0 %v18198_v33  ;;  %16752 = vmatprep.subr.bf16.mxu1 %v17960_v3 }
 0x394   :  { %16677 = vmatprep.subr.bf16.mxu0 %v17960_v3 }
 0x396   :  { %16754 = vmatpush3.bf16.msra.mxu1 %v18246_v15 }
 0x397   :  { %16679 = vmatpush3.bf16.msra.mxu0 %v18203_v38  ;;  %16755 = vmatprep.subr.bf16.mxu1 %v17960_v3 }
 0x398   :  { %16680 = vmatprep.subr.bf16.mxu0 %v17960_v3 }
 0x39a   :  { %16757 = vmatpush3.bf16.msra.mxu1 %v18252_v8 }
 0x39b   :  { %16682 = vmatpush3.bf16.msra.mxu0 %v18205_v39  ;;  %16758 = vmatprep.subr.bf16.mxu1 %v17960_v3 }
 0x39c   :  { %16683 = vmatprep.subr.bf16.mxu0 %v17960_v3 }
 0x39e   :  { %16760 = vmatpush3.bf16.msra.mxu1 %v18256_v10 }
 0x39f   :  { %16685 = vmatpush3.bf16.msra.mxu0 %v18207_v40  ;;  %16761 = vmatprep.subr.bf16.mxu1 %v17960_v3 }
 0x3a0   :  { %16686 = vmatprep.subr.bf16.mxu0 %v17960_v3 }
 0x3a1   :  { %14015 = vmatmul.mubr.f32.vlgmr.msra.gmra.mrb[8].mxu1 %v19348_v59 }
 0x3a2   :  { %16763 = vmatpush3.bf16.msra.mxu1 %v18263_v30  ;;  %14049 = vmatprep.mubr.msk.f32.mxu1 %vm17961_vm0, %v17962_v12 }
 0x3a3   :  { %16688 = vmatpush3.bf16.msra.mxu0 %v18210_v45  ;;  %16764 = vmatprep.subr.bf16.mxu1 %v17960_v3 }
 0x3a4   :  { %16689 = vmatprep.subr.bf16.mxu0 %v17960_v3 }
 0x3a6   :  { %13910 = vmatmul.mubr.f32.vlgmr.msra.gmra.mrb[8].mxu0 %v19212_v58  ;;  %16766 = vmatpush3.bf16.msra.mxu1 %v18270_v34 }
 0x3a7   :  { %16691 = vmatpush3.bf16.msra.mxu0 %v18044_v13  ;;  %16767 = vmatprep.subr.bf16.mxu1 %v17960_v3 }
 0x3a8   :  { %16692 = vmatprep.subr.bf16.mxu0 %v17960_v3  ;;  %13944 = vmatprep.mubr.msk.f32.mxu0 %vm17961_vm0, %v17962_v12 }
 0x3aa   :  { %16769 = vmatpush3.bf16.msra.mxu1 %v18278_v36 }
 0x3ab   :  { %16694 = vmatpush3.bf16.msra.mxu0 %v18049_v14  ;;  %16770 = vmatprep.subr.bf16.mxu1 %v17960_v3 }
 0x3ac   :  { %16695 = vmatprep.subr.bf16.mxu0 %v17960_v3 }
 0x3ae   :  { %16772 = vmatpush3.bf16.msra.mxu1 %v18284_v37 }
 0x3af   :  { %16697 = vmatpush3.bf16.msra.mxu0 %v18070_v20  ;;  %16773 = vmatprep.subr.bf16.mxu1 %v17960_v3 }
 0x3b0   :  { %16698 = vmatprep.subr.bf16.mxu0 %v17960_v3 }
 0x3b2   :  { %16775 = vmatpush3.bf16.msra.mxu1 %v18290_v42 }
 0x3b3   :  { %16700 = vmatpush3.bf16.msra.mxu0 %v18088_v27  ;;  %16776 = vmatprep.subr.bf16.mxu1 %v17960_v3 }
 0x3b4   :  { %16701 = vmatprep.subr.bf16.mxu0 %v17960_v3 }
 0x3b6   :  { %16778 = vmatpush3.bf16.msra.mxu1 %v18296_v46 }
 0x3b7   :  { %16703 = vmatpush3.bf16.msra.mxu0 %v18117_v43  ;;  %16779 = vmatprep.subr.bf16.mxu1 %v17960_v3 }
 0x3b8   :  { %16704 = vmatprep.subr.bf16.mxu0 %v17960_v3 }
 0x3ba   :  { %16781 = vmatpush3.bf16.msra.mxu1 %v18302_v50 }
 0x3bb   :  { %16706 = vmatpush3.bf16.msra.mxu0 %v18131_v51  ;;  %16782 = vmatprep.subr.bf16.mxu1 %v17960_v3 }
 0x3bc   :  { %16707 = vmatprep.subr.bf16.mxu0 %v17960_v3 }
 0x3be   :  { %16784 = vmatpush3.bf16.msra.mxu1 %v18308_v56 }
 0x3bf   :  { %16709 = vmatpush3.bf16.msra.mxu0 %v18133_v52  ;;  %16785 = vmatprep.subr.bf16.mxu1 %v17960_v3 }
 0x3c0   :  { %16710 = vmatprep.subr.bf16.mxu0 %v17960_v3 }
 0x3c1   :  { %14050 = vmatmul.mubr.f32.vlgmr.msra.gmra.mrb[8].mxu1 %v19355_v61  ;;  %v7233_v61 = vsub.f32 %v19611_v0, %v7232_v55 }
 0x3c2   :  { %16787 = vmatpush3.bf16.msra.mxu1 %v18044_v13  ;;  %14084 = vmatprep.mubr.msk.f32.mxu1 %vm17961_vm0, %v17962_v12 }
 0x3c3   :  { %16712 = vmatpush3.bf16.msra.mxu0 %v18137_v54  ;;  %16788 = vmatprep.subr.bf16.mxu1 %v17960_v3  ;;  %v7234_v25 = vand.u32 4294901760, %v7233_v61 }
 0x3c4   :  { %16857 = vmatprep.subr.bf16.mxu0 %v17960_v3 }
 0x3c6   :  { %13945 = vmatmul.mubr.f32.vlgmr.msra.gmra.mrb[8].mxu0 %v19212_v58  ;;  %16790 = vmatpush3.bf16.msra.mxu1 %v18049_v14 }
 0x3c7   :  { %16859 = vmatpush3.bf16.msra.mxu0 %v18044_v13  ;;  %16791 = vmatprep.subr.bf16.mxu1 %v17960_v3 }
 0x3c8   :  { %16860 = vmatprep.subr.bf16.mxu0 %v17960_v3  ;;  %14189 = vmatprep.mubr.msk.f32.mxu0 %vm17961_vm0, %v17962_v12 }
 0x3ca   :  { %16793 = vmatpush3.bf16.msra.mxu1 %v18070_v20 }
 0x3cb   :  { %16862 = vmatpush3.bf16.msra.mxu0 %v18049_v14  ;;  %16794 = vmatprep.subr.bf16.mxu1 %v17960_v3 }
 0x3cc   :  { %16863 = vmatprep.subr.bf16.mxu0 %v17960_v3 }
 0x3ce   :  { %16796 = vmatpush3.bf16.msra.mxu1 %v18088_v27 }
 0x3cf   :  { %16865 = vmatpush3.bf16.msra.mxu0 %v18070_v20  ;;  %16797 = vmatprep.subr.bf16.mxu1 %v17960_v3 }
 0x3d0   :  { %16866 = vmatprep.subr.bf16.mxu0 %v17960_v3 }
 0x3d2   :  { %16799 = vmatpush3.bf16.msra.mxu1 %v18117_v43 }
 0x3d3   :  { %16868 = vmatpush3.bf16.msra.mxu0 %v18088_v27  ;;  %16800 = vmatprep.subr.bf16.mxu1 %v17960_v3 }
 0x3d4   :  { %16869 = vmatprep.subr.bf16.mxu0 %v17960_v3 }
 0x3d6   :  { %16802 = vmatpush3.bf16.msra.mxu1 %v18131_v51 }
 0x3d7   :  { %16871 = vmatpush3.bf16.msra.mxu0 %v18117_v43  ;;  %16803 = vmatprep.subr.bf16.mxu1 %v17960_v3 }
 0x3d8   :  { %16872 = vmatprep.subr.bf16.mxu0 %v17960_v3 }
 0x3d9   :  { %v4556_v6 = vpop.f32.mrb[6].mxu0 }
 0x3da   :  { %v4560_v47 = vmul.f32 %v4556_v6, %v4556_v6  ;;  %v13526_v35 = vpop.f32.mrb[7].mxu0  ;;  %16805 = vmatpush3.bf16.msra.mxu1 %v18133_v52 }
 0x3db   :  { %16874 = vmatpush3.bf16.msra.mxu0 %v18131_v51  ;;  %16806 = vmatprep.subr.bf16.mxu1 %v17960_v3 }
 0x3dc   :  { %v19495_v58 = vadd.f32 %v4560_v47, %v19363_v28  ;;  %16875 = vmatprep.subr.bf16.mxu0 %v17960_v3  ;;  %v8440_v47 = vmul.f32 %v19343_v53, %v8439_v49 }
 0x3de   :  { %16808 = vmatpush3.bf16.msra.mxu1 %v18137_v54 }
 0x3df   :  { %16877 = vmatpush3.bf16.msra.mxu0 %v18133_v52  ;;  %16809 = vmatprep.subr.bf16.mxu1 %v17960_v3 }
 0x3e0   :  { %16878 = vmatprep.subr.bf16.mxu0 %v17960_v3 }
 0x3e1   :  { %14085 = vmatmul.mubr.f32.vlgmr.msra.gmra.mrb[8].mxu1 %v5940_v16  ;;  %v19734_v16 = vand.u32 4294901760, %v7794_v26 }
 0x3e2   :  { %16811 = vmatpush3.bf16.msra.mxu1 %v18189_v29  ;;  %14119 = vmatprep.mubr.msk.f32.mxu1 %vm17961_vm0, %v17962_v12 }
 0x3e3   :  { %16880 = vmatpush3.bf16.msra.mxu0 %v18137_v54  ;;  %16812 = vmatprep.subr.bf16.mxu1 %v17960_v3  ;;  %v19741_v28 = vsub.f32 %v7794_v26, %v19734_v16 }
 0x3e4   :  { %16881 = vmatprep.subr.bf16.mxu0 %v17960_v3 }
 0x3e5   :  { %v7878_v63 = vand.u32 4294901760, %v19741_v28 }
 0x3e6   :  { %14190 = vmatmul.mubr.f32.vlgmr.msra.gmra.mrb[10].mxu0 %v6588_v7  ;;  %16814 = vmatpush3.bf16.msra.mxu1 %v18194_v31 }
 0x3e7   :  { %16883 = vmatpush3.bf16.msra.mxu0 %v18213_v48  ;;  %16815 = vmatprep.subr.bf16.mxu1 %v17960_v3 }
 0x3e8   :  { %16884 = vmatprep.subr.bf16.mxu0 %v17960_v3  ;;  %14224 = vmatprep.mubr.msk.f32.mxu0 %vm17961_vm0, %v17962_v12 }
 0x3ea   :  { %16817 = vmatpush3.bf16.msra.mxu1 %v18196_v32 }
 0x3eb   :  { %16886 = vmatpush3.bf16.msra.mxu0 %v18221_v60  ;;  %16818 = vmatprep.subr.bf16.mxu1 %v17960_v3 }
 0x3ec   :  { %16887 = vmatprep.subr.bf16.mxu0 %v17960_v3 }
 0x3ee   :  { %16820 = vmatpush3.bf16.msra.mxu1 %v18198_v33 }
 0x3ef   :  { %16889 = vmatpush3.bf16.msra.mxu0 %v18228_v9  ;;  %16821 = vmatprep.subr.bf16.mxu1 %v17960_v3 }
 0x3f0   :  { %16890 = vmatprep.subr.bf16.mxu0 %v17960_v3 }
 0x3f2   :  { %16823 = vmatpush3.bf16.msra.mxu1 %v18203_v38 }
 0x3f3   :  { %16892 = vmatpush3.bf16.msra.mxu0 %v18235_v21  ;;  %16824 = vmatprep.subr.bf16.mxu1 %v17960_v3 }
 0x3f4   :  { %16893 = vmatprep.subr.bf16.mxu0 %v17960_v3 }
 0x3f6   :  { %16826 = vmatpush3.bf16.msra.mxu1 %v18205_v39 }
 0x3f7   :  { %16895 = vmatpush3.bf16.msra.mxu0 %v18241_v22  ;;  %16827 = vmatprep.subr.bf16.mxu1 %v17960_v3 }
 0x3f8   :  { %16896 = vmatprep.subr.bf16.mxu0 %v17960_v3 }
 0x3fa   :  { %16829 = vmatpush3.bf16.msra.mxu1 %v18207_v40 }
 0x3fb   :  { %16898 = vmatpush3.bf16.msra.mxu0 %v18246_v15  ;;  %16830 = vmatprep.subr.bf16.mxu1 %v17960_v3 }
 0x3fc   :  { %16899 = vmatprep.subr.bf16.mxu0 %v17960_v3 }
 0x3fe   :  { %16832 = vmatpush3.bf16.msra.mxu1 %v18210_v45 }
 0x3ff   :  { %16901 = vmatpush3.bf16.msra.mxu0 %v18252_v8  ;;  %16833 = vmatprep.subr.bf16.mxu1 %v17960_v3 }
 0x400   :  { %16902 = vmatprep.subr.bf16.mxu0 %v17960_v3 }
 0x401   :  { %14120 = vmatmul.mubr.f32.vlgmr.msra.gmra.mrb[8].mxu1 %v19348_v59 }
 0x402   :  { %16835 = vmatpush3.bf16.msra.mxu1 %v18044_v13  ;;  %14154 = vmatprep.mubr.msk.f32.mxu1 %vm17961_vm0, %v17962_v12 }
 0x403   :  { %16904 = vmatpush3.bf16.msra.mxu0 %v18256_v10  ;;  %16836 = vmatprep.subr.bf16.mxu1 %v17960_v3 }
 0x404   :  { %16905 = vmatprep.subr.bf16.mxu0 %v17960_v3 }
 0x406   :  { %14225 = vmatmul.mubr.f32.vlgmr.msra.gmra.mrb[10].mxu0 %v19478_v2  ;;  %16838 = vmatpush3.bf16.msra.mxu1 %v18049_v14 }
 0x407   :  { %16907 = vmatpush3.bf16.msra.mxu0 %v18263_v30  ;;  %16839 = vmatprep.subr.bf16.mxu1 %v17960_v3 }
 0x408   :  { %16908 = vmatprep.subr.bf16.mxu0 %v17960_v3  ;;  %14259 = vmatprep.mubr.msk.f32.mxu0 %vm17961_vm0, %v17962_v12 }
 0x40a   :  { %16841 = vmatpush3.bf16.msra.mxu1 %v18070_v20 }
 0x40b   :  { %16910 = vmatpush3.bf16.msra.mxu0 %v18270_v34  ;;  %16842 = vmatprep.subr.bf16.mxu1 %v17960_v3 }
 0x40c   :  { %16911 = vmatprep.subr.bf16.mxu0 %v17960_v3 }
 0x40e   :  { %16844 = vmatpush3.bf16.msra.mxu1 %v18088_v27 }
 0x40f   :  { %16913 = vmatpush3.bf16.msra.mxu0 %v18278_v36  ;;  %16845 = vmatprep.subr.bf16.mxu1 %v17960_v3 }
 0x410   :  { %16914 = vmatprep.subr.bf16.mxu0 %v17960_v3 }
 0x412   :  { %16847 = vmatpush3.bf16.msra.mxu1 %v18117_v43 }
 0x413   :  { %16916 = vmatpush3.bf16.msra.mxu0 %v18284_v37  ;;  %16848 = vmatprep.subr.bf16.mxu1 %v17960_v3 }
 0x414   :  { %16917 = vmatprep.subr.bf16.mxu0 %v17960_v3 }
 0x416   :  { %16850 = vmatpush3.bf16.msra.mxu1 %v18131_v51 }
 0x417   :  { %16919 = vmatpush3.bf16.msra.mxu0 %v18290_v42  ;;  %16851 = vmatprep.subr.bf16.mxu1 %v17960_v3 }
 0x418   :  { %16920 = vmatprep.subr.bf16.mxu0 %v17960_v3 }
 0x41a   :  { %16853 = vmatpush3.bf16.msra.mxu1 %v18133_v52 }
 0x41b   :  { %16922 = vmatpush3.bf16.msra.mxu0 %v18296_v46  ;;  %16854 = vmatprep.subr.bf16.mxu1 %v17960_v3 }
 0x41c   :  { %16923 = vmatprep.subr.bf16.mxu0 %v17960_v3 }
 0x41e   :  { %16856 = vmatpush3.bf16.msra.mxu1 %v18137_v54 }
 0x41f   :  { %16925 = vmatpush3.bf16.msra.mxu0 %v18302_v50  ;;  %17001 = vmatprep.subr.bf16.mxu1 %v17960_v3 }
 0x420   :  { %16926 = vmatprep.subr.bf16.mxu0 %v17960_v3 }
 0x421   :  { %14155 = vmatmul.mubr.f32.vlgmr.msra.gmra.mrb[8].mxu1 %v19348_v59 }
 0x422   :  { %17003 = vmatpush3.bf16.msra.mxu1 %v18044_v13  ;;  %14399 = vmatprep.mubr.msk.f32.mxu1 %vm17961_vm0, %v17962_v12 }
 0x423   :  { %16928 = vmatpush3.bf16.msra.mxu0 %v18308_v56  ;;  %17004 = vmatprep.subr.bf16.mxu1 %v17960_v3 }
 0x424   :  { %16929 = vmatprep.subr.bf16.mxu0 %v17960_v3 }
 0x426   :  { %14260 = vmatmul.mubr.f32.vlgmr.msra.gmra.mrb[10].mxu0 %v19485_v5  ;;  %17006 = vmatpush3.bf16.msra.mxu1 %v18049_v14  ;;  %v7879_v5 = vsub.f32 %v19741_v28, %v7878_v63 }
 0x427   :  { %16931 = vmatpush3.bf16.msra.mxu0 %v18044_v13  ;;  %17007 = vmatprep.subr.bf16.mxu1 %v17960_v3 }
 0x428   :  { %16932 = vmatprep.subr.bf16.mxu0 %v17960_v3  ;;  %14294 = vmatprep.mubr.msk.f32.mxu0 %vm17961_vm0, %v17962_v12  ;;  %v7880_v6 = vand.u32 4294901760, %v7879_v5 }
 0x42a   :  { %17009 = vmatpush3.bf16.msra.mxu1 %v18070_v20 }
 0x42b   :  { %16934 = vmatpush3.bf16.msra.mxu0 %v18049_v14  ;;  %17010 = vmatprep.subr.bf16.mxu1 %v17960_v3 }
 0x42c   :  { %16935 = vmatprep.subr.bf16.mxu0 %v17960_v3 }
 0x42e   :  { %17012 = vmatpush3.bf16.msra.mxu1 %v18088_v27 }
 0x42f   :  { %16937 = vmatpush3.bf16.msra.mxu0 %v18070_v20  ;;  %17013 = vmatprep.subr.bf16.mxu1 %v17960_v3 }
 0x430   :  { %16938 = vmatprep.subr.bf16.mxu0 %v17960_v3 }
 0x432   :  { %17015 = vmatpush3.bf16.msra.mxu1 %v18117_v43 }
 0x433   :  { %16940 = vmatpush3.bf16.msra.mxu0 %v18088_v27  ;;  %17016 = vmatprep.subr.bf16.mxu1 %v17960_v3 }
 0x434   :  { %16941 = vmatprep.subr.bf16.mxu0 %v17960_v3  ;;  %v5202_v41 = vpop.f32.mrb[6].mxu1 }
 0x435   :  { %v5206_v44 = vmul.f32 %v5202_v41, %v5202_v41  ;;  %v13736_v19 = vpop.f32.mrb[7].mxu1  ;;  %v19987_v41 = vld [vmem:[%s20323_s3] sm:$0xff] }
 0x436   :  { %17018 = vmatpush3.bf16.msra.mxu1 %v18131_v51 }
 0x437   :  { %16943 = vmatpush3.bf16.msra.mxu0 %v18117_v43  ;;  %v19619_v59 = vadd.f32 %v5206_v44, %v19495_v58  ;;  %17019 = vmatprep.subr.bf16.mxu1 %v17960_v3 }
 0x438   :  { %16944 = vmatprep.subr.bf16.mxu0 %v17960_v3 }
 0x43a   :  { %17021 = vmatpush3.bf16.msra.mxu1 %v18133_v52 }
 0x43b   :  { %16946 = vmatpush3.bf16.msra.mxu0 %v18131_v51  ;;  %17022 = vmatprep.subr.bf16.mxu1 %v17960_v3 }
 0x43c   :  { %16947 = vmatprep.subr.bf16.mxu0 %v17960_v3 }
 0x43e   :  { %17024 = vmatpush3.bf16.msra.mxu1 %v18137_v54 }
 0x43f   :  { %16949 = vmatpush3.bf16.msra.mxu0 %v18133_v52  ;;  %17025 = vmatprep.subr.bf16.mxu1 %v17960_v3 }
 0x440   :  { %16950 = vmatprep.subr.bf16.mxu0 %v17960_v3 }
 0x441   :  { %14400 = vmatmul.mubr.f32.vlgmr.msra.gmra.mrb[10].mxu1 %v7234_v25 }
 0x442   :  { %17027 = vmatpush3.bf16.msra.mxu1 %v18213_v48  ;;  %14434 = vmatprep.mubr.msk.f32.mxu1 %vm17961_vm0, %v17962_v12 }
 0x443   :  { %16952 = vmatpush3.bf16.msra.mxu0 %v18137_v54  ;;  %17028 = vmatprep.subr.bf16.mxu1 %v17960_v3 }
 0x444   :  { %16953 = vmatprep.subr.bf16.mxu0 %v17960_v3 }
 0x446   :  { %14295 = vmatmul.mubr.f32.vlgmr.msra.gmra.mrb[10].mxu0 %v6586_v23  ;;  %17030 = vmatpush3.bf16.msra.mxu1 %v18221_v60  ;;  %v19860_v23 = vand.u32 4294901760, %v8440_v47 }
 0x447   :  { %16955 = vmatpush3.bf16.msra.mxu0 %v18189_v29  ;;  %17031 = vmatprep.subr.bf16.mxu1 %v17960_v3 }
 0x448   :  { %16956 = vmatprep.subr.bf16.mxu0 %v17960_v3  ;;  %14329 = vmatprep.mubr.msk.f32.mxu0 %vm17961_vm0, %v17962_v12  ;;  %v19867_v35 = vsub.f32 %v8440_v47, %v19860_v23 }
 0x44a   :  { %17033 = vmatpush3.bf16.msra.mxu1 %v18228_v9  ;;  %v8524_v7 = vand.u32 4294901760, %v19867_v35 }
 0x44b   :  { %16958 = vmatpush3.bf16.msra.mxu0 %v18194_v31  ;;  %17034 = vmatprep.subr.bf16.mxu1 %v17960_v3 }
 0x44c   :  { %16959 = vmatprep.subr.bf16.mxu0 %v17960_v3  ;;  %v8525_v18 = vsub.f32 %v19867_v35, %v8524_v7 }
 0x44e   :  { %17036 = vmatpush3.bf16.msra.mxu1 %v18235_v21 }
 0x44f   :  { %16961 = vmatpush3.bf16.msra.mxu0 %v18196_v32  ;;  %17037 = vmatprep.subr.bf16.mxu1 %v17960_v3 }
 0x450   :  { %16962 = vmatprep.subr.bf16.mxu0 %v17960_v3 }
 0x452   :  { %17039 = vmatpush3.bf16.msra.mxu1 %v18241_v22 }
 0x453   :  { %16964 = vmatpush3.bf16.msra.mxu0 %v18198_v33  ;;  %17040 = vmatprep.subr.bf16.mxu1 %v17960_v3 }
 0x454   :  { %16965 = vmatprep.subr.bf16.mxu0 %v17960_v3 }
 0x456   :  { %17042 = vmatpush3.bf16.msra.mxu1 %v18246_v15 }
 0x457   :  { %16967 = vmatpush3.bf16.msra.mxu0 %v18203_v38  ;;  %17043 = vmatprep.subr.bf16.mxu1 %v17960_v3 }
 0x458   :  { %16968 = vmatprep.subr.bf16.mxu0 %v17960_v3 }
 0x45a   :  { %17045 = vmatpush3.bf16.msra.mxu1 %v18252_v8 }
 0x45b   :  { %16970 = vmatpush3.bf16.msra.mxu0 %v18205_v39  ;;  %17046 = vmatprep.subr.bf16.mxu1 %v17960_v3 }
 0x45c   :  { %16971 = vmatprep.subr.bf16.mxu0 %v17960_v3 }
 0x45e   :  { %17048 = vmatpush3.bf16.msra.mxu1 %v18256_v10 }
 0x45f   :  { %16973 = vmatpush3.bf16.msra.mxu0 %v18207_v40  ;;  %17049 = vmatprep.subr.bf16.mxu1 %v17960_v3 }
 0x460   :  { %16974 = vmatprep.subr.bf16.mxu0 %v17960_v3 }
 0x461   :  { %14435 = vmatmul.mubr.f32.vlgmr.msra.gmra.mrb[10].mxu1 %v19604_v17 }
 0x462   :  { %17051 = vmatpush3.bf16.msra.mxu1 %v18263_v30  ;;  %14469 = vmatprep.mubr.msk.f32.mxu1 %vm17961_vm0, %v17962_v12 }
 0x463   :  { %16976 = vmatpush3.bf16.msra.mxu0 %v18210_v45  ;;  %17052 = vmatprep.subr.bf16.mxu1 %v17960_v3 }
 0x464   :  { %16977 = vmatprep.subr.bf16.mxu0 %v17960_v3 }
 0x466   :  { %14330 = vmatmul.mubr.f32.vlgmr.msra.gmra.mrb[10].mxu0 %v19478_v2  ;;  %17054 = vmatpush3.bf16.msra.mxu1 %v18270_v34 }
 0x467   :  { %16979 = vmatpush3.bf16.msra.mxu0 %v18044_v13  ;;  %17055 = vmatprep.subr.bf16.mxu1 %v17960_v3 }
 0x468   :  { %16980 = vmatprep.subr.bf16.mxu0 %v17960_v3  ;;  %14364 = vmatprep.mubr.msk.f32.mxu0 %vm17961_vm0, %v17962_v12 }
 0x46a   :  { %17057 = vmatpush3.bf16.msra.mxu1 %v18278_v36 }
 0x46b   :  { %16982 = vmatpush3.bf16.msra.mxu0 %v18049_v14  ;;  %17058 = vmatprep.subr.bf16.mxu1 %v17960_v3 }
 0x46c   :  { %16983 = vmatprep.subr.bf16.mxu0 %v17960_v3 }
 0x46e   :  { %17060 = vmatpush3.bf16.msra.mxu1 %v18284_v37 }
 0x46f   :  { %16985 = vmatpush3.bf16.msra.mxu0 %v18070_v20  ;;  %17061 = vmatprep.subr.bf16.mxu1 %v17960_v3 }
 0x470   :  { %16986 = vmatprep.subr.bf16.mxu0 %v17960_v3 }
 0x472   :  { %17063 = vmatpush3.bf16.msra.mxu1 %v18290_v42 }
 0x473   :  { %16988 = vmatpush3.bf16.msra.mxu0 %v18088_v27  ;;  %17064 = vmatprep.subr.bf16.mxu1 %v17960_v3 }
 0x474   :  { %16989 = vmatprep.subr.bf16.mxu0 %v17960_v3 }
 0x476   :  { %17066 = vmatpush3.bf16.msra.mxu1 %v18296_v46 }
 0x477   :  { %16991 = vmatpush3.bf16.msra.mxu0 %v18117_v43  ;;  %17067 = vmatprep.subr.bf16.mxu1 %v17960_v3 }
 0x478   :  { %16992 = vmatprep.subr.bf16.mxu0 %v17960_v3 }
 0x47a   :  { %17069 = vmatpush3.bf16.msra.mxu1 %v18302_v50 }
 0x47b   :  { %16994 = vmatpush3.bf16.msra.mxu0 %v18131_v51  ;;  %17070 = vmatprep.subr.bf16.mxu1 %v17960_v3 }
 0x47c   :  { %16995 = vmatprep.subr.bf16.mxu0 %v17960_v3 }
 0x47e   :  { %17072 = vmatpush3.bf16.msra.mxu1 %v18308_v56 }
 0x47f   :  { %16997 = vmatpush3.bf16.msra.mxu0 %v18133_v52  ;;  %17073 = vmatprep.subr.bf16.mxu1 %v17960_v3 }
 0x480   :  { %16998 = vmatprep.subr.bf16.mxu0 %v17960_v3 }
 0x481   :  { %14470 = vmatmul.mubr.f32.vlgmr.msra.gmra.mrb[10].mxu1 %v19611_v0  ;;  %v9085_v0 = vpop.permute.xlu1 %9084 }
 0x482   :  { %17075 = vmatpush3.bf16.msra.mxu1 %v18044_v13  ;;  %14504 = vmatprep.mubr.msk.f32.mxu1 %vm17961_vm0, %v17962_v12  ;;  %v9086_v44 = vmul.f32 %v19987_v41, %v9085_v0 }
 0x483   :  { %17000 = vmatpush3.bf16.msra.mxu0 %v18137_v54  ;;  %17076 = vmatprep.subr.bf16.mxu1 %v17960_v3 }
 0x484   :  { %17145 = vmatprep.subr.bf16.mxu0 %v17960_v3  ;;  %v19994_v19 = vand.u32 4294901760, %v9086_v44 }
 0x486   :  { %14365 = vmatmul.mubr.f32.vlgmr.msra.gmra.mrb[10].mxu0 %v19478_v2  ;;  %17078 = vmatpush3.bf16.msra.mxu1 %v18049_v14 }
 0x487   :  { %17147 = vmatpush3.bf16.msra.mxu0 %v18044_v13  ;;  %17079 = vmatprep.subr.bf16.mxu1 %v17960_v3 }
 0x488   :  { %17148 = vmatprep.subr.bf16.mxu0 %v17960_v3  ;;  %14609 = vmatprep.mubr.msk.f32.mxu0 %vm17961_vm0, %v17962_v12 }
 0x48a   :  { %17081 = vmatpush3.bf16.msra.mxu1 %v18070_v20 }
 0x48b   :  { %17150 = vmatpush3.bf16.msra.mxu0 %v18049_v14  ;;  %17082 = vmatprep.subr.bf16.mxu1 %v17960_v3 }
 0x48c   :  { %17151 = vmatprep.subr.bf16.mxu0 %v17960_v3 }
 0x48e   :  { %17084 = vmatpush3.bf16.msra.mxu1 %v18088_v27 }
 0x48f   :  { %17153 = vmatpush3.bf16.msra.mxu0 %v18070_v20  ;;  %17085 = vmatprep.subr.bf16.mxu1 %v17960_v3 }
 0x490   :  { %17154 = vmatprep.subr.bf16.mxu0 %v17960_v3 }
 0x492   :  { %17087 = vmatpush3.bf16.msra.mxu1 %v18117_v43 }
 0x493   :  { %17156 = vmatpush3.bf16.msra.mxu0 %v18088_v27  ;;  %17088 = vmatprep.subr.bf16.mxu1 %v17960_v3 }
 0x494   :  { %17157 = vmatprep.subr.bf16.mxu0 %v17960_v3 }
 0x496   :  { %17090 = vmatpush3.bf16.msra.mxu1 %v18131_v51 }
 0x497   :  { %17159 = vmatpush3.bf16.msra.mxu0 %v18117_v43  ;;  %17091 = vmatprep.subr.bf16.mxu1 %v17960_v3 }
 0x498   :  { %17160 = vmatprep.subr.bf16.mxu0 %v17960_v3 }
 0x499   :  { %v5848_v57 = vpop.f32.mrb[8].mxu0 }
 0x49a   :  { %v5852_v62 = vmul.f32 %v5848_v57, %v5848_v57  ;;  %v13946_v1 = vpop.f32.mrb[9].mxu0  ;;  %17093 = vmatpush3.bf16.msra.mxu1 %v18133_v52  ;;  %v9731_v57 = vpop.permute.xlu0 %9730 }
 0x49b   :  { %17162 = vmatpush3.bf16.msra.mxu0 %v18131_v51  ;;  %17094 = vmatprep.subr.bf16.mxu1 %v17960_v3 }
 0x49c   :  { %v19751_v2 = vadd.f32 %v5852_v62, %v19619_v59  ;;  %17163 = vmatprep.subr.bf16.mxu0 %v17960_v3  ;;  %v9732_v62 = vmul.f32 %v19987_v41, %v9731_v57 }
 0x49e   :  { %17096 = vmatpush3.bf16.msra.mxu1 %v18137_v54 }
 0x49f   :  { %17165 = vmatpush3.bf16.msra.mxu0 %v18133_v52  ;;  %17097 = vmatprep.subr.bf16.mxu1 %v17960_v3 }
 0x4a0   :  { %17166 = vmatprep.subr.bf16.mxu0 %v17960_v3 }
 0x4a1   :  { %14505 = vmatmul.mubr.f32.vlgmr.msra.gmra.mrb[10].mxu1 %v7232_v55  ;;  %v20001_v55 = vsub.f32 %v9086_v44, %v19994_v19 }
 0x4a2   :  { %17099 = vmatpush3.bf16.msra.mxu1 %v18189_v29  ;;  %14539 = vmatprep.mubr.msk.f32.mxu1 %vm17961_vm0, %v17962_v12 }
 0x4a3   :  { %17168 = vmatpush3.bf16.msra.mxu0 %v18137_v54  ;;  %17100 = vmatprep.subr.bf16.mxu1 %v17960_v3  ;;  %v9170_v25 = vand.u32 4294901760, %v20001_v55 }
 0x4a4   :  { %17169 = vmatprep.subr.bf16.mxu0 %v17960_v3 }
 0x4a6   :  { %14610 = vmatmul.mubr.f32.vlgmr.msra.gmra.mrb[12].mxu0 %v7880_v6  ;;  %17102 = vmatpush3.bf16.msra.mxu1 %v18194_v31 }
 0x4a7   :  { %17171 = vmatpush3.bf16.msra.mxu0 %v18213_v48  ;;  %17103 = vmatprep.subr.bf16.mxu1 %v17960_v3 }
 0x4a8   :  { %17172 = vmatprep.subr.bf16.mxu0 %v17960_v3  ;;  %14644 = vmatprep.mubr.msk.f32.mxu0 %vm17961_vm0, %v17962_v12 }
 0x4aa   :  { %17105 = vmatpush3.bf16.msra.mxu1 %v18196_v32 }
 0x4ab   :  { %17174 = vmatpush3.bf16.msra.mxu0 %v18221_v60  ;;  %17106 = vmatprep.subr.bf16.mxu1 %v17960_v3 }
 0x4ac   :  { %17175 = vmatprep.subr.bf16.mxu0 %v17960_v3 }
 0x4ae   :  { %17108 = vmatpush3.bf16.msra.mxu1 %v18198_v33 }
 0x4af   :  { %17177 = vmatpush3.bf16.msra.mxu0 %v18228_v9  ;;  %17109 = vmatprep.subr.bf16.mxu1 %v17960_v3 }
 0x4b0   :  { %17178 = vmatprep.subr.bf16.mxu0 %v17960_v3 }
 0x4b2   :  { %17111 = vmatpush3.bf16.msra.mxu1 %v18203_v38 }
 0x4b3   :  { %17180 = vmatpush3.bf16.msra.mxu0 %v18235_v21  ;;  %17112 = vmatprep.subr.bf16.mxu1 %v17960_v3 }
 0x4b4   :  { %17181 = vmatprep.subr.bf16.mxu0 %v17960_v3 }
 0x4b6   :  { %17114 = vmatpush3.bf16.msra.mxu1 %v18205_v39 }
 0x4b7   :  { %17183 = vmatpush3.bf16.msra.mxu0 %v18241_v22  ;;  %17115 = vmatprep.subr.bf16.mxu1 %v17960_v3 }
 0x4b8   :  { %17184 = vmatprep.subr.bf16.mxu0 %v17960_v3 }
 0x4ba   :  { %17117 = vmatpush3.bf16.msra.mxu1 %v18207_v40 }
 0x4bb   :  { %17186 = vmatpush3.bf16.msra.mxu0 %v18246_v15  ;;  %17118 = vmatprep.subr.bf16.mxu1 %v17960_v3 }
 0x4bc   :  { %17187 = vmatprep.subr.bf16.mxu0 %v17960_v3 }
 0x4be   :  { %17120 = vmatpush3.bf16.msra.mxu1 %v18210_v45 }
 0x4bf   :  { %17189 = vmatpush3.bf16.msra.mxu0 %v18252_v8  ;;  %17121 = vmatprep.subr.bf16.mxu1 %v17960_v3 }
 0x4c0   :  { %17190 = vmatprep.subr.bf16.mxu0 %v17960_v3 }
 0x4c1   :  { %14540 = vmatmul.mubr.f32.vlgmr.msra.gmra.mrb[10].mxu1 %v19604_v17 }
 0x4c2   :  { %17123 = vmatpush3.bf16.msra.mxu1 %v18044_v13  ;;  %14574 = vmatprep.mubr.msk.f32.mxu1 %vm17961_vm0, %v17962_v12 }
 0x4c3   :  { %17192 = vmatpush3.bf16.msra.mxu0 %v18256_v10  ;;  %17124 = vmatprep.subr.bf16.mxu1 %v17960_v3 }
 0x4c4   :  { %17193 = vmatprep.subr.bf16.mxu0 %v17960_v3 }
 0x4c6   :  { %14645 = vmatmul.mubr.f32.vlgmr.msra.gmra.mrb[12].mxu0 %v19734_v16  ;;  %17126 = vmatpush3.bf16.msra.mxu1 %v18049_v14 }
 0x4c7   :  { %17195 = vmatpush3.bf16.msra.mxu0 %v18263_v30  ;;  %17127 = vmatprep.subr.bf16.mxu1 %v17960_v3 }
 0x4c8   :  { %17196 = vmatprep.subr.bf16.mxu0 %v17960_v3  ;;  %14679 = vmatprep.mubr.msk.f32.mxu0 %vm17961_vm0, %v17962_v12 }
 0x4ca   :  { %17129 = vmatpush3.bf16.msra.mxu1 %v18070_v20 }
 0x4cb   :  { %17198 = vmatpush3.bf16.msra.mxu0 %v18270_v34  ;;  %17130 = vmatprep.subr.bf16.mxu1 %v17960_v3 }
 0x4cc   :  { %17199 = vmatprep.subr.bf16.mxu0 %v17960_v3 }
 0x4ce   :  { %17132 = vmatpush3.bf16.msra.mxu1 %v18088_v27 }
 0x4cf   :  { %17201 = vmatpush3.bf16.msra.mxu0 %v18278_v36  ;;  %17133 = vmatprep.subr.bf16.mxu1 %v17960_v3 }
 0x4d0   :  { %17202 = vmatprep.subr.bf16.mxu0 %v17960_v3 }
 0x4d2   :  { %17135 = vmatpush3.bf16.msra.mxu1 %v18117_v43 }
 0x4d3   :  { %17204 = vmatpush3.bf16.msra.mxu0 %v18284_v37  ;;  %17136 = vmatprep.subr.bf16.mxu1 %v17960_v3 }
 0x4d4   :  { %17205 = vmatprep.subr.bf16.mxu0 %v17960_v3 }
 0x4d6   :  { %17138 = vmatpush3.bf16.msra.mxu1 %v18131_v51 }
 0x4d7   :  { %17207 = vmatpush3.bf16.msra.mxu0 %v18290_v42  ;;  %17139 = vmatprep.subr.bf16.mxu1 %v17960_v3 }
 0x4d8   :  { %17208 = vmatprep.subr.bf16.mxu0 %v17960_v3 }
 0x4da   :  { %17141 = vmatpush3.bf16.msra.mxu1 %v18133_v52 }
 0x4db   :  { %17210 = vmatpush3.bf16.msra.mxu0 %v18296_v46  ;;  %17142 = vmatprep.subr.bf16.mxu1 %v17960_v3 }
 0x4dc   :  { %17211 = vmatprep.subr.bf16.mxu0 %v17960_v3 }
 0x4de   :  { %17144 = vmatpush3.bf16.msra.mxu1 %v18137_v54 }
 0x4df   :  { %17213 = vmatpush3.bf16.msra.mxu0 %v18302_v50  ;;  %17289 = vmatprep.subr.bf16.mxu1 %v17960_v3 }
 0x4e0   :  { %17214 = vmatprep.subr.bf16.mxu0 %v17960_v3 }
 0x4e1   :  { %14575 = vmatmul.mubr.f32.vlgmr.msra.gmra.mrb[10].mxu1 %v19604_v17  ;;  %v8526_v17 = vand.u32 4294901760, %v8525_v18 }
 0x4e2   :  { %17291 = vmatpush3.bf16.msra.mxu1 %v18044_v13  ;;  %14819 = vmatprep.mubr.msk.f32.mxu1 %vm17961_vm0, %v17962_v12 }
 0x4e3   :  { %17216 = vmatpush3.bf16.msra.mxu0 %v18308_v56  ;;  %17292 = vmatprep.subr.bf16.mxu1 %v17960_v3 }
 0x4e4   :  { %17217 = vmatprep.subr.bf16.mxu0 %v17960_v3 }
 0x4e6   :  { %14680 = vmatmul.mubr.f32.vlgmr.msra.gmra.mrb[12].mxu0 %v19741_v28  ;;  %17294 = vmatpush3.bf16.msra.mxu1 %v18049_v14 }
 0x4e7   :  { %17219 = vmatpush3.bf16.msra.mxu0 %v18044_v13  ;;  %17295 = vmatprep.subr.bf16.mxu1 %v17960_v3 }
 0x4e8   :  { %17220 = vmatprep.subr.bf16.mxu0 %v17960_v3  ;;  %14714 = vmatprep.mubr.msk.f32.mxu0 %vm17961_vm0, %v17962_v12 }
 0x4ea   :  { %17297 = vmatpush3.bf16.msra.mxu1 %v18070_v20 }
 0x4eb   :  { %17222 = vmatpush3.bf16.msra.mxu0 %v18049_v14  ;;  %17298 = vmatprep.subr.bf16.mxu1 %v17960_v3 }
 0x4ec   :  { %17223 = vmatprep.subr.bf16.mxu0 %v17960_v3 }
 0x4ee   :  { %17300 = vmatpush3.bf16.msra.mxu1 %v18088_v27 }
 0x4ef   :  { %17225 = vmatpush3.bf16.msra.mxu0 %v18070_v20  ;;  %17301 = vmatprep.subr.bf16.mxu1 %v17960_v3 }
 0x4f0   :  { %17226 = vmatprep.subr.bf16.mxu0 %v17960_v3 }
 0x4f2   :  { %17303 = vmatpush3.bf16.msra.mxu1 %v18117_v43 }
 0x4f3   :  { %17228 = vmatpush3.bf16.msra.mxu0 %v18088_v27  ;;  %17304 = vmatprep.subr.bf16.mxu1 %v17960_v3 }
 0x4f4   :  { %17229 = vmatprep.subr.bf16.mxu0 %v17960_v3  ;;  %v6494_v53 = vpop.f32.mrb[8].mxu1 }
 0x4f5   :  { %v6498_v58 = vmul.f32 %v6494_v53, %v6494_v53  ;;  %v14156_v24 = vpop.f32.mrb[9].mxu1 }
 0x4f6   :  { %17306 = vmatpush3.bf16.msra.mxu1 %v18131_v51 }
 0x4f7   :  { %17231 = vmatpush3.bf16.msra.mxu0 %v18117_v43  ;;  %v19875_v11 = vadd.f32 %v6498_v58, %v19751_v2  ;;  %17307 = vmatprep.subr.bf16.mxu1 %v17960_v3 }
 0x4f8   :  { %17232 = vmatprep.subr.bf16.mxu0 %v17960_v3 }
 0x4fa   :  { %17309 = vmatpush3.bf16.msra.mxu1 %v18133_v52 }
 0x4fb   :  { %17234 = vmatpush3.bf16.msra.mxu0 %v18131_v51  ;;  %17310 = vmatprep.subr.bf16.mxu1 %v17960_v3 }
 0x4fc   :  { %17235 = vmatprep.subr.bf16.mxu0 %v17960_v3 }
 0x4fe   :  { %17312 = vmatpush3.bf16.msra.mxu1 %v18137_v54 }
 0x4ff   :  { %17237 = vmatpush3.bf16.msra.mxu0 %v18133_v52  ;;  %17313 = vmatprep.subr.bf16.mxu1 %v17960_v3 }
 0x500   :  { %17238 = vmatprep.subr.bf16.mxu0 %v17960_v3 }
 0x501   :  { %14820 = vmatmul.mubr.f32.vlgmr.msra.gmra.mrb[12].mxu1 %v8526_v17 }
 0x502   :  { %17315 = vmatpush3.bf16.msra.mxu1 %v18213_v48  ;;  %14854 = vmatprep.mubr.msk.f32.mxu1 %vm17961_vm0, %v17962_v12 }
 0x503   :  { %17240 = vmatpush3.bf16.msra.mxu0 %v18137_v54  ;;  %17316 = vmatprep.subr.bf16.mxu1 %v17960_v3 }
 0x504   :  { %17241 = vmatprep.subr.bf16.mxu0 %v17960_v3 }
 0x506   :  { %14715 = vmatmul.mubr.f32.vlgmr.msra.gmra.mrb[12].mxu0 %v7878_v63  ;;  %17318 = vmatpush3.bf16.msra.mxu1 %v18221_v60  ;;  %v20119_v63 = vand.u32 4294901760, %v9732_v62 }
 0x507   :  { %17243 = vmatpush3.bf16.msra.mxu0 %v18189_v29  ;;  %17319 = vmatprep.subr.bf16.mxu1 %v17960_v3 }
 0x508   :  { %17244 = vmatprep.subr.bf16.mxu0 %v17960_v3  ;;  %14749 = vmatprep.mubr.msk.f32.mxu0 %vm17961_vm0, %v17962_v12  ;;  %v20126_v1 = vsub.f32 %v9732_v62, %v20119_v63 }
 0x50a   :  { %17321 = vmatpush3.bf16.msra.mxu1 %v18228_v9  ;;  %v9816_v49 = vand.u32 4294901760, %v20126_v1 }
 0x50b   :  { %17246 = vmatpush3.bf16.msra.mxu0 %v18194_v31  ;;  %17322 = vmatprep.subr.bf16.mxu1 %v17960_v3 }
 0x50c   :  { %17247 = vmatprep.subr.bf16.mxu0 %v17960_v3 }
 0x50e   :  { %17324 = vmatpush3.bf16.msra.mxu1 %v18235_v21 }
 0x50f   :  { %17249 = vmatpush3.bf16.msra.mxu0 %v18196_v32  ;;  %17325 = vmatprep.subr.bf16.mxu1 %v17960_v3 }
 0x510   :  { %17250 = vmatprep.subr.bf16.mxu0 %v17960_v3 }
 0x512   :  { %17327 = vmatpush3.bf16.msra.mxu1 %v18241_v22 }
 0x513   :  { %17252 = vmatpush3.bf16.msra.mxu0 %v18198_v33  ;;  %17328 = vmatprep.subr.bf16.mxu1 %v17960_v3 }
 0x514   :  { %17253 = vmatprep.subr.bf16.mxu0 %v17960_v3 }
 0x516   :  { %17330 = vmatpush3.bf16.msra.mxu1 %v18246_v15 }
 0x517   :  { %17255 = vmatpush3.bf16.msra.mxu0 %v18203_v38  ;;  %17331 = vmatprep.subr.bf16.mxu1 %v17960_v3 }
 0x518   :  { %17256 = vmatprep.subr.bf16.mxu0 %v17960_v3 }
 0x51a   :  { %17333 = vmatpush3.bf16.msra.mxu1 %v18252_v8 }
 0x51b   :  { %17258 = vmatpush3.bf16.msra.mxu0 %v18205_v39  ;;  %17334 = vmatprep.subr.bf16.mxu1 %v17960_v3 }
 0x51c   :  { %17259 = vmatprep.subr.bf16.mxu0 %v17960_v3 }
 0x51e   :  { %17336 = vmatpush3.bf16.msra.mxu1 %v18256_v10 }
 0x51f   :  { %17261 = vmatpush3.bf16.msra.mxu0 %v18207_v40  ;;  %17337 = vmatprep.subr.bf16.mxu1 %v17960_v3 }
 0x520   :  { %17262 = vmatprep.subr.bf16.mxu0 %v17960_v3 }
 0x521   :  { %14855 = vmatmul.mubr.f32.vlgmr.msra.gmra.mrb[12].mxu1 %v19860_v23 }
 0x522   :  { %17339 = vmatpush3.bf16.msra.mxu1 %v18263_v30  ;;  %14889 = vmatprep.mubr.msk.f32.mxu1 %vm17961_vm0, %v17962_v12 }
 0x523   :  { %17264 = vmatpush3.bf16.msra.mxu0 %v18210_v45  ;;  %17340 = vmatprep.subr.bf16.mxu1 %v17960_v3 }
 0x524   :  { %17265 = vmatprep.subr.bf16.mxu0 %v17960_v3 }
 0x526   :  { %14750 = vmatmul.mubr.f32.vlgmr.msra.gmra.mrb[12].mxu0 %v19734_v16  ;;  %17342 = vmatpush3.bf16.msra.mxu1 %v18270_v34 }
 0x527   :  { %17267 = vmatpush3.bf16.msra.mxu0 %v18044_v13  ;;  %17343 = vmatprep.subr.bf16.mxu1 %v17960_v3 }
 0x528   :  { %17268 = vmatprep.subr.bf16.mxu0 %v17960_v3  ;;  %14784 = vmatprep.mubr.msk.f32.mxu0 %vm17961_vm0, %v17962_v12 }
 0x52a   :  { %17345 = vmatpush3.bf16.msra.mxu1 %v18278_v36 }
 0x52b   :  { %17270 = vmatpush3.bf16.msra.mxu0 %v18049_v14  ;;  %17346 = vmatprep.subr.bf16.mxu1 %v17960_v3 }
 0x52c   :  { %17271 = vmatprep.subr.bf16.mxu0 %v17960_v3 }
 0x52e   :  { %17348 = vmatpush3.bf16.msra.mxu1 %v18284_v37 }
 0x52f   :  { %17273 = vmatpush3.bf16.msra.mxu0 %v18070_v20  ;;  %17349 = vmatprep.subr.bf16.mxu1 %v17960_v3 }
 0x530   :  { %17274 = vmatprep.subr.bf16.mxu0 %v17960_v3 }
 0x532   :  { %17351 = vmatpush3.bf16.msra.mxu1 %v18290_v42 }
 0x533   :  { %17276 = vmatpush3.bf16.msra.mxu0 %v18088_v27  ;;  %17352 = vmatprep.subr.bf16.mxu1 %v17960_v3 }
 0x534   :  { %17277 = vmatprep.subr.bf16.mxu0 %v17960_v3 }
 0x536   :  { %17354 = vmatpush3.bf16.msra.mxu1 %v18296_v46 }
 0x537   :  { %17279 = vmatpush3.bf16.msra.mxu0 %v18117_v43  ;;  %17355 = vmatprep.subr.bf16.mxu1 %v17960_v3 }
 0x538   :  { %17280 = vmatprep.subr.bf16.mxu0 %v17960_v3 }
 0x53a   :  { %17357 = vmatpush3.bf16.msra.mxu1 %v18302_v50 }
 0x53b   :  { %17282 = vmatpush3.bf16.msra.mxu0 %v18131_v51  ;;  %17358 = vmatprep.subr.bf16.mxu1 %v17960_v3 }
 0x53c   :  { %17283 = vmatprep.subr.bf16.mxu0 %v17960_v3 }
 0x53e   :  { %17360 = vmatpush3.bf16.msra.mxu1 %v18308_v56 }
 0x53f   :  { %17285 = vmatpush3.bf16.msra.mxu0 %v18133_v52  ;;  %17361 = vmatprep.subr.bf16.mxu1 %v17960_v3 }
 0x540   :  { %17286 = vmatprep.subr.bf16.mxu0 %v17960_v3 }
 0x541   :  { %14890 = vmatmul.mubr.f32.vlgmr.msra.gmra.mrb[12].mxu1 %v19867_v35 }
 0x542   :  { %17363 = vmatpush3.bf16.msra.mxu1 %v18044_v13  ;;  %14924 = vmatprep.mubr.msk.f32.mxu1 %vm17961_vm0, %v17962_v12 }
 0x543   :  { %17288 = vmatpush3.bf16.msra.mxu0 %v18137_v54  ;;  %17364 = vmatprep.subr.bf16.mxu1 %v17960_v3 }
 0x544   :  { %17433 = vmatprep.subr.bf16.mxu0 %v17960_v3 }
 0x546   :  { %14785 = vmatmul.mubr.f32.vlgmr.msra.gmra.mrb[12].mxu0 %v19734_v16  ;;  %17366 = vmatpush3.bf16.msra.mxu1 %v18049_v14  ;;  %v9171_v16 = vsub.f32 %v20001_v55, %v9170_v25 }
 0x547   :  { %17435 = vmatpush3.bf16.msra.mxu0 %v18044_v13  ;;  %17367 = vmatprep.subr.bf16.mxu1 %v17960_v3 }
 0x548   :  { %17436 = vmatprep.subr.bf16.mxu0 %v17960_v3  ;;  %15029 = vmatprep.mubr.msk.f32.mxu0 %vm17961_vm0, %v17962_v12  ;;  %v9172_v28 = vand.u32 4294901760, %v9171_v16 }
 0x54a   :  { %17369 = vmatpush3.bf16.msra.mxu1 %v18070_v20 }
 0x54b   :  { %17438 = vmatpush3.bf16.msra.mxu0 %v18049_v14  ;;  %17370 = vmatprep.subr.bf16.mxu1 %v17960_v3 }
 0x54c   :  { %17439 = vmatprep.subr.bf16.mxu0 %v17960_v3 }
 0x54e   :  { %17372 = vmatpush3.bf16.msra.mxu1 %v18088_v27 }
 0x54f   :  { %17441 = vmatpush3.bf16.msra.mxu0 %v18070_v20  ;;  %17373 = vmatprep.subr.bf16.mxu1 %v17960_v3 }
 0x550   :  { %17442 = vmatprep.subr.bf16.mxu0 %v17960_v3 }
 0x552   :  { %17375 = vmatpush3.bf16.msra.mxu1 %v18117_v43 }
 0x553   :  { %17444 = vmatpush3.bf16.msra.mxu0 %v18088_v27  ;;  %17376 = vmatprep.subr.bf16.mxu1 %v17960_v3 }
 0x554   :  { %17445 = vmatprep.subr.bf16.mxu0 %v17960_v3 }
 0x556   :  { %17378 = vmatpush3.bf16.msra.mxu1 %v18131_v51 }
 0x557   :  { %17447 = vmatpush3.bf16.msra.mxu0 %v18117_v43  ;;  %17379 = vmatprep.subr.bf16.mxu1 %v17960_v3 }
 0x558   :  { %17448 = vmatprep.subr.bf16.mxu0 %v17960_v3 }
 0x559   :  { %v7140_v59 = vpop.f32.mrb[10].mxu0 }
 0x55a   :  { %v7144_v61 = vmul.f32 %v7140_v59, %v7140_v59  ;;  %v14366_v4 = vpop.f32.mrb[11].mxu0  ;;  %17381 = vmatpush3.bf16.msra.mxu1 %v18133_v52 }
 0x55b   :  { %17450 = vmatpush3.bf16.msra.mxu0 %v18131_v51  ;;  %17382 = vmatprep.subr.bf16.mxu1 %v17960_v3 }
 0x55c   :  { %v20011_v26 = vadd.f32 %v7144_v61, %v19875_v11  ;;  %17451 = vmatprep.subr.bf16.mxu0 %v17960_v3 }
 0x55e   :  { %17384 = vmatpush3.bf16.msra.mxu1 %v18137_v54 }
 0x55f   :  { %17453 = vmatpush3.bf16.msra.mxu0 %v18133_v52  ;;  %17385 = vmatprep.subr.bf16.mxu1 %v17960_v3 }
 0x560   :  { %17454 = vmatprep.subr.bf16.mxu0 %v17960_v3 }
 0x561   :  { %14925 = vmatmul.mubr.f32.vlgmr.msra.gmra.mrb[12].mxu1 %v8524_v7 }
 0x562   :  { %17387 = vmatpush3.bf16.msra.mxu1 %v18189_v29  ;;  %14959 = vmatprep.mubr.msk.f32.mxu1 %vm17961_vm0, %v17962_v12 }
 0x563   :  { %17456 = vmatpush3.bf16.msra.mxu0 %v18137_v54  ;;  %17388 = vmatprep.subr.bf16.mxu1 %v17960_v3 }
 0x564   :  { %17457 = vmatprep.subr.bf16.mxu0 %v17960_v3 }
 0x566   :  { %15030 = vmatmul.mubr.f32.vlgmr.msra.gmra.mrb[14].mxu0 %v9172_v28  ;;  %17390 = vmatpush3.bf16.msra.mxu1 %v18194_v31 }
 0x567   :  { %17459 = vmatpush3.bf16.msra.mxu0 %v18213_v48  ;;  %17391 = vmatprep.subr.bf16.mxu1 %v17960_v3 }
 0x568   :  { %17460 = vmatprep.subr.bf16.mxu0 %v17960_v3  ;;  %15064 = vmatprep.mubr.msk.f32.mxu0 %vm17961_vm0, %v17962_v12 }
 0x56a   :  { %17393 = vmatpush3.bf16.msra.mxu1 %v18196_v32 }
 0x56b   :  { %17462 = vmatpush3.bf16.msra.mxu0 %v18221_v60  ;;  %17394 = vmatprep.subr.bf16.mxu1 %v17960_v3 }
 0x56c   :  { %17463 = vmatprep.subr.bf16.mxu0 %v17960_v3 }
 0x56e   :  { %17396 = vmatpush3.bf16.msra.mxu1 %v18198_v33 }
 0x56f   :  { %17465 = vmatpush3.bf16.msra.mxu0 %v18228_v9  ;;  %17397 = vmatprep.subr.bf16.mxu1 %v17960_v3 }
 0x570   :  { %17466 = vmatprep.subr.bf16.mxu0 %v17960_v3 }
 0x572   :  { %17399 = vmatpush3.bf16.msra.mxu1 %v18203_v38 }
 0x573   :  { %17468 = vmatpush3.bf16.msra.mxu0 %v18235_v21  ;;  %17400 = vmatprep.subr.bf16.mxu1 %v17960_v3 }
 0x574   :  { %17469 = vmatprep.subr.bf16.mxu0 %v17960_v3 }
 0x576   :  { %17402 = vmatpush3.bf16.msra.mxu1 %v18205_v39 }
 0x577   :  { %17471 = vmatpush3.bf16.msra.mxu0 %v18241_v22  ;;  %17403 = vmatprep.subr.bf16.mxu1 %v17960_v3 }
 0x578   :  { %17472 = vmatprep.subr.bf16.mxu0 %v17960_v3 }
 0x57a   :  { %17405 = vmatpush3.bf16.msra.mxu1 %v18207_v40 }
 0x57b   :  { %17474 = vmatpush3.bf16.msra.mxu0 %v18246_v15  ;;  %17406 = vmatprep.subr.bf16.mxu1 %v17960_v3 }
 0x57c   :  { %17475 = vmatprep.subr.bf16.mxu0 %v17960_v3 }
 0x57e   :  { %17408 = vmatpush3.bf16.msra.mxu1 %v18210_v45 }
 0x57f   :  { %17477 = vmatpush3.bf16.msra.mxu0 %v18252_v8  ;;  %17409 = vmatprep.subr.bf16.mxu1 %v17960_v3 }
 0x580   :  { %17478 = vmatprep.subr.bf16.mxu0 %v17960_v3 }
 0x581   :  { %14960 = vmatmul.mubr.f32.vlgmr.msra.gmra.mrb[12].mxu1 %v19860_v23 }
 0x582   :  { %17411 = vmatpush3.bf16.msra.mxu1 %v18044_v13  ;;  %14994 = vmatprep.mubr.msk.f32.mxu1 %vm17961_vm0, %v17962_v12 }
 0x583   :  { %17480 = vmatpush3.bf16.msra.mxu0 %v18256_v10  ;;  %17412 = vmatprep.subr.bf16.mxu1 %v17960_v3 }
 0x584   :  { %17481 = vmatprep.subr.bf16.mxu0 %v17960_v3 }
 0x586   :  { %15065 = vmatmul.mubr.f32.vlgmr.msra.gmra.mrb[14].mxu0 %v19994_v19  ;;  %17414 = vmatpush3.bf16.msra.mxu1 %v18049_v14 }
 0x587   :  { %17483 = vmatpush3.bf16.msra.mxu0 %v18263_v30  ;;  %17415 = vmatprep.subr.bf16.mxu1 %v17960_v3 }
 0x588   :  { %17484 = vmatprep.subr.bf16.mxu0 %v17960_v3  ;;  %15099 = vmatprep.mubr.msk.f32.mxu0 %vm17961_vm0, %v17962_v12 }
 0x58a   :  { %17417 = vmatpush3.bf16.msra.mxu1 %v18070_v20 }
 0x58b   :  { %17486 = vmatpush3.bf16.msra.mxu0 %v18270_v34  ;;  %17418 = vmatprep.subr.bf16.mxu1 %v17960_v3 }
 0x58c   :  { %17487 = vmatprep.subr.bf16.mxu0 %v17960_v3 }
 0x58e   :  { %17420 = vmatpush3.bf16.msra.mxu1 %v18088_v27 }
 0x58f   :  { %17489 = vmatpush3.bf16.msra.mxu0 %v18278_v36  ;;  %17421 = vmatprep.subr.bf16.mxu1 %v17960_v3 }
 0x590   :  { %17490 = vmatprep.subr.bf16.mxu0 %v17960_v3 }
 0x592   :  { %17423 = vmatpush3.bf16.msra.mxu1 %v18117_v43 }
 0x593   :  { %17492 = vmatpush3.bf16.msra.mxu0 %v18284_v37  ;;  %17424 = vmatprep.subr.bf16.mxu1 %v17960_v3 }
 0x594   :  { %17493 = vmatprep.subr.bf16.mxu0 %v17960_v3 }
 0x596   :  { %17426 = vmatpush3.bf16.msra.mxu1 %v18131_v51 }
 0x597   :  { %17495 = vmatpush3.bf16.msra.mxu0 %v18290_v42  ;;  %17427 = vmatprep.subr.bf16.mxu1 %v17960_v3 }
 0x598   :  { %17496 = vmatprep.subr.bf16.mxu0 %v17960_v3 }
 0x59a   :  { %17429 = vmatpush3.bf16.msra.mxu1 %v18133_v52 }
 0x59b   :  { %17498 = vmatpush3.bf16.msra.mxu0 %v18296_v46  ;;  %17430 = vmatprep.subr.bf16.mxu1 %v17960_v3 }
 0x59c   :  { %17499 = vmatprep.subr.bf16.mxu0 %v17960_v3 }
 0x59e   :  { %17432 = vmatpush3.bf16.msra.mxu1 %v18137_v54 }
 0x59f   :  { %17501 = vmatpush3.bf16.msra.mxu0 %v18302_v50  ;;  %17577 = vmatprep.subr.bf16.mxu1 %v17960_v3 }
 0x5a0   :  { %17502 = vmatprep.subr.bf16.mxu0 %v17960_v3 }
 0x5a1   :  { %14995 = vmatmul.mubr.f32.vlgmr.msra.gmra.mrb[12].mxu1 %v19860_v23  ;;  %v9817_v23 = vsub.f32 %v20126_v1, %v9816_v49 }
 0x5a2   :  { %17579 = vmatpush3.bf16.msra.mxu1 %v18044_v13  ;;  %15239 = vmatprep.mubr.msk.f32.mxu1 %vm17961_vm0, %v17962_v12 }
 0x5a3   :  { %17504 = vmatpush3.bf16.msra.mxu0 %v18308_v56  ;;  %17580 = vmatprep.subr.bf16.mxu1 %v17960_v3  ;;  %v9818_v35 = vand.u32 4294901760, %v9817_v23 }
 0x5a4   :  { %17505 = vmatprep.subr.bf16.mxu0 %v17960_v3 }
 0x5a6   :  { %15100 = vmatmul.mubr.f32.vlgmr.msra.gmra.mrb[14].mxu0 %v20001_v55  ;;  %17582 = vmatpush3.bf16.msra.mxu1 %v18049_v14 }
 0x5a7   :  { %17507 = vmatpush3.bf16.msra.mxu0 %v18044_v13  ;;  %17583 = vmatprep.subr.bf16.mxu1 %v17960_v3 }
 0x5a8   :  { %17508 = vmatprep.subr.bf16.mxu0 %v17960_v3  ;;  %15134 = vmatprep.mubr.msk.f32.mxu0 %vm17961_vm0, %v17962_v12 }
 0x5aa   :  { %17585 = vmatpush3.bf16.msra.mxu1 %v18070_v20 }
 0x5ab   :  { %17510 = vmatpush3.bf16.msra.mxu0 %v18049_v14  ;;  %17586 = vmatprep.subr.bf16.mxu1 %v17960_v3 }
 0x5ac   :  { %17511 = vmatprep.subr.bf16.mxu0 %v17960_v3 }
 0x5ae   :  { %17588 = vmatpush3.bf16.msra.mxu1 %v18088_v27 }
 0x5af   :  { %17513 = vmatpush3.bf16.msra.mxu0 %v18070_v20  ;;  %17589 = vmatprep.subr.bf16.mxu1 %v17960_v3 }
 0x5b0   :  { %17514 = vmatprep.subr.bf16.mxu0 %v17960_v3 }
 0x5b2   :  { %17591 = vmatpush3.bf16.msra.mxu1 %v18117_v43 }
 0x5b3   :  { %17516 = vmatpush3.bf16.msra.mxu0 %v18088_v27  ;;  %17592 = vmatprep.subr.bf16.mxu1 %v17960_v3 }
 0x5b4   :  { %17517 = vmatprep.subr.bf16.mxu0 %v17960_v3  ;;  %v7786_v2 = vpop.f32.mrb[10].mxu1 }
 0x5b5   :  { %v7790_v5 = vmul.f32 %v7786_v2, %v7786_v2  ;;  %v14576_v6 = vpop.f32.mrb[11].mxu1 }
 0x5b6   :  { %17594 = vmatpush3.bf16.msra.mxu1 %v18131_v51 }
 0x5b7   :  { %17519 = vmatpush3.bf16.msra.mxu0 %v18117_v43  ;;  %v20134_v47 = vadd.f32 %v7790_v5, %v20011_v26  ;;  %17595 = vmatprep.subr.bf16.mxu1 %v17960_v3 }
 0x5b8   :  { %17520 = vmatprep.subr.bf16.mxu0 %v17960_v3 }
 0x5ba   :  { %17597 = vmatpush3.bf16.msra.mxu1 %v18133_v52 }
 0x5bb   :  { %17522 = vmatpush3.bf16.msra.mxu0 %v18131_v51  ;;  %17598 = vmatprep.subr.bf16.mxu1 %v17960_v3 }
 0x5bc   :  { %17523 = vmatprep.subr.bf16.mxu0 %v17960_v3 }
 0x5be   :  { %17600 = vmatpush3.bf16.msra.mxu1 %v18137_v54 }
 0x5bf   :  { %17525 = vmatpush3.bf16.msra.mxu0 %v18133_v52  ;;  %17601 = vmatprep.subr.bf16.mxu1 %v17960_v3 }
 0x5c0   :  { %17526 = vmatprep.subr.bf16.mxu0 %v17960_v3 }
 0x5c1   :  { %15240 = vmatmul.mubr.f32.vlgmr.msra.gmra.mrb[14].mxu1 %v9818_v35 }
 0x5c2   :  { %17603 = vmatpush3.bf16.msra.mxu1 %v18213_v48  ;;  %15274 = vmatprep.mubr.msk.f32.mxu1 %vm17961_vm0, %v17962_v12 }
 0x5c3   :  { %17528 = vmatpush3.bf16.msra.mxu0 %v18137_v54  ;;  %17604 = vmatprep.subr.bf16.mxu1 %v17960_v3 }
 0x5c4   :  { %17529 = vmatprep.subr.bf16.mxu0 %v17960_v3 }
 0x5c6   :  { %15135 = vmatmul.mubr.f32.vlgmr.msra.gmra.mrb[14].mxu0 %v9170_v25  ;;  %17606 = vmatpush3.bf16.msra.mxu1 %v18221_v60 }
 0x5c7   :  { %17531 = vmatpush3.bf16.msra.mxu0 %v18189_v29  ;;  %17607 = vmatprep.subr.bf16.mxu1 %v17960_v3 }
 0x5c8   :  { %17532 = vmatprep.subr.bf16.mxu0 %v17960_v3  ;;  %15169 = vmatprep.mubr.msk.f32.mxu0 %vm17961_vm0, %v17962_v12 }
 0x5ca   :  { %17609 = vmatpush3.bf16.msra.mxu1 %v18228_v9 }
 0x5cb   :  { %17534 = vmatpush3.bf16.msra.mxu0 %v18194_v31  ;;  %17610 = vmatprep.subr.bf16.mxu1 %v17960_v3 }
 0x5cc   :  { %17535 = vmatprep.subr.bf16.mxu0 %v17960_v3 }
 0x5ce   :  { %17612 = vmatpush3.bf16.msra.mxu1 %v18235_v21 }
 0x5cf   :  { %17537 = vmatpush3.bf16.msra.mxu0 %v18196_v32  ;;  %17613 = vmatprep.subr.bf16.mxu1 %v17960_v3 }
 0x5d0   :  { %17538 = vmatprep.subr.bf16.mxu0 %v17960_v3 }
 0x5d2   :  { %17615 = vmatpush3.bf16.msra.mxu1 %v18241_v22 }
 0x5d3   :  { %17540 = vmatpush3.bf16.msra.mxu0 %v18198_v33  ;;  %17616 = vmatprep.subr.bf16.mxu1 %v17960_v3 }
 0x5d4   :  { %17541 = vmatprep.subr.bf16.mxu0 %v17960_v3 }
 0x5d6   :  { %17618 = vmatpush3.bf16.msra.mxu1 %v18246_v15 }
 0x5d7   :  { %17543 = vmatpush3.bf16.msra.mxu0 %v18203_v38  ;;  %17619 = vmatprep.subr.bf16.mxu1 %v17960_v3 }
 0x5d8   :  { %17544 = vmatprep.subr.bf16.mxu0 %v17960_v3 }
 0x5da   :  { %17621 = vmatpush3.bf16.msra.mxu1 %v18252_v8  ;;  %v10389_v8 = vld [vmem:[%s20321_s1] sm:$0xff]  ;;  %s17911_s1 = scalar_lea.vmem %s10404_s14, 128 }
 0x5db   :  { %17546 = vmatpush3.bf16.msra.mxu0 %v18205_v39  ;;  %17622 = vmatprep.subr.bf16.mxu1 %v17960_v3  ;;  %p17912_p0 = scmp.ne.s32.totalorder %s10404_s14, %s17911_s1  ;;  %p17917_p2 = scmp.lt.s32.totalorder %s17911_s1, %s17911_s1 }
 0x5dc   :  { %17547 = vmatprep.subr.bf16.mxu0 %v17960_v3 }
 0x5dd   :  { %p17918_p3 = por %p17917_p2, %p17916_p1 }
 0x5de   :  { %17624 = vmatpush3.bf16.msra.mxu1 %v18256_v10  ;;  %v10391_v10 = vld [vmem:[%s20322_s2] sm:$0xff] }
 0x5df   :  { %17549 = vmatpush3.bf16.msra.mxu0 %v18207_v40  ;;  %17625 = vmatprep.subr.bf16.mxu1 %v17960_v3  ;;  %p17919_p4 = pnand %p17918_p3, %p17912_p0 }
 0x5e0   :  { %17550 = vmatprep.subr.bf16.mxu0 %v17960_v3 }
 0x5e1   :  { %15275 = vmatmul.mubr.f32.vlgmr.msra.gmra.mrb[14].mxu1 %v20119_v63 }
 0x5e2   :  { %17627 = vmatpush3.bf16.msra.mxu1 %v18263_v30  ;;  %15309 = vmatprep.mubr.msk.f32.mxu1 %vm17961_vm0, %v17962_v12  ;;  %v10390_v30 = vmul.f32 %v19987_v41, %v10389_v8 }
 0x5e3   :  { %17552 = vmatpush3.bf16.msra.mxu0 %v18210_v45  ;;  %17628 = vmatprep.subr.bf16.mxu1 %v17960_v3 }
 0x5e4   :  { %17553 = vmatprep.subr.bf16.mxu0 %v17960_v3 }
 0x5e6   :  { %15170 = vmatmul.mubr.f32.vlgmr.msra.gmra.mrb[14].mxu0 %v19994_v19  ;;  %17630 = vmatpush3.bf16.msra.mxu1 %v18270_v34  ;;  %v17910_v34 = vld [vmem:[%s20324_s4] sm:$0xff] }
 0x5e7   :  { %17555 = vmatpush3.bf16.msra.mxu0 %v18044_v13  ;;  %17631 = vmatprep.subr.bf16.mxu1 %v17960_v3 }
 0x5e8   :  { %17556 = vmatprep.subr.bf16.mxu0 %v17960_v3  ;;  %15204 = vmatprep.mubr.msk.f32.mxu0 %vm17961_vm0, %v17962_v12 }
 0x5ea   :  { %17633 = vmatpush3.bf16.msra.mxu1 %v18278_v36  ;;  %v10392_v36 = vmul.f32 %v17910_v34, %v10391_v10 }
 0x5eb   :  { %17558 = vmatpush3.bf16.msra.mxu0 %v18049_v14  ;;  %17634 = vmatprep.subr.bf16.mxu1 %v17960_v3 }
 0x5ec   :  { %17559 = vmatprep.subr.bf16.mxu0 %v17960_v3 }
 0x5ee   :  { %17636 = vmatpush3.bf16.msra.mxu1 %v18284_v37 }
 0x5ef   :  { %17561 = vmatpush3.bf16.msra.mxu0 %v18070_v20  ;;  %17637 = vmatprep.subr.bf16.mxu1 %v17960_v3 }
 0x5f0   :  { %17562 = vmatprep.subr.bf16.mxu0 %v17960_v3 }
 0x5f2   :  { %17639 = vmatpush3.bf16.msra.mxu1 %v18290_v42 }
 0x5f3   :  { %17564 = vmatpush3.bf16.msra.mxu0 %v18088_v27  ;;  %17640 = vmatprep.subr.bf16.mxu1 %v17960_v3 }
 0x5f4   :  { %17565 = vmatprep.subr.bf16.mxu0 %v17960_v3 }
 0x5f6   :  { %17642 = vmatpush3.bf16.msra.mxu1 %v18296_v46 }
 0x5f7   :  { %17567 = vmatpush3.bf16.msra.mxu0 %v18117_v43  ;;  %17643 = vmatprep.subr.bf16.mxu1 %v17960_v3 }
 0x5f8   :  { %17568 = vmatprep.subr.bf16.mxu0 %v17960_v3 }
 0x5fa   :  { %17645 = vmatpush3.bf16.msra.mxu1 %v18302_v50 }
 0x5fb   :  { %17570 = vmatpush3.bf16.msra.mxu0 %v18131_v51  ;;  %17646 = vmatprep.subr.bf16.mxu1 %v17960_v3 }
 0x5fc   :  { %17571 = vmatprep.subr.bf16.mxu0 %v17960_v3 }
 0x5fe   :  { %17648 = vmatpush3.bf16.msra.mxu1 %v18308_v56 }
 0x5ff   :  { %17573 = vmatpush3.bf16.msra.mxu0 %v18133_v52  ;;  %17649 = vmatprep.subr.bf16.mxu1 %v17960_v3 }
 0x600   :  { %17574 = vmatprep.subr.bf16.mxu0 %v17960_v3 }
 0x601   :  { %15310 = vmatmul.mubr.f32.vlgmr.msra.gmra.mrb[14].mxu1 %v20126_v1 }
 0x602   :  { %17651 = vmatpush3.bf16.msra.mxu1 %v18044_v13  ;;  %15344 = vmatprep.mubr.msk.f32.mxu1 %vm17961_vm0, %v17962_v12 }
 0x603   :  { %17576 = vmatpush3.bf16.msra.mxu0 %v18137_v54  ;;  %17652 = vmatprep.subr.bf16.mxu1 %v17960_v3 }
 0x606   :  { %15205 = vmatmul.mubr.f32.vlgmr.msra.gmra.mrb[14].mxu0 %v19994_v19  ;;  %17654 = vmatpush3.bf16.msra.mxu1 %v18049_v14 }
 0x607   :  { %17655 = vmatprep.subr.bf16.mxu1 %v17960_v3 }
 0x60a   :  { %17657 = vmatpush3.bf16.msra.mxu1 %v18070_v20 }
 0x60b   :  { %17658 = vmatprep.subr.bf16.mxu1 %v17960_v3 }
 0x60e   :  { %17660 = vmatpush3.bf16.msra.mxu1 %v18088_v27 }
 0x60f   :  { %17661 = vmatprep.subr.bf16.mxu1 %v17960_v3 }
 0x612   :  { %17663 = vmatpush3.bf16.msra.mxu1 %v18117_v43 }
 0x613   :  { %17664 = vmatprep.subr.bf16.mxu1 %v17960_v3 }
 0x616   :  { %17666 = vmatpush3.bf16.msra.mxu1 %v18131_v51 }
 0x617   :  { %17667 = vmatprep.subr.bf16.mxu1 %v17960_v3 }
 0x619   :  { %v8432_v48 = vpop.f32.mrb[12].mxu0 }
 0x61a   :  { %v8436_v60 = vmul.f32 %v8432_v48, %v8432_v48  ;;  %v14786_v9 = vpop.f32.mrb[13].mxu0  ;;  %17669 = vmatpush3.bf16.msra.mxu1 %v18133_v52 }
 0x61b   :  { %17670 = vmatprep.subr.bf16.mxu1 %v17960_v3 }
 0x61c   :  { %v8437_v21 = vadd.f32 %v8436_v60, %v20134_v47 }
 0x61e   :  { %17672 = vmatpush3.bf16.msra.mxu1 %v18137_v54 }
 0x61f   :  { %17673 = vmatprep.subr.bf16.mxu1 %v17960_v3 }
 0x621   :  { %15345 = vmatmul.mubr.f32.vlgmr.msra.gmra.mrb[14].mxu1 %v9816_v49 }
 0x622   :  { %17675 = vmatpush3.bf16.msra.mxu1 %v18189_v29  ;;  %15379 = vmatprep.mubr.msk.f32.mxu1 %vm17961_vm0, %v17962_v12 }
 0x623   :  { %17676 = vmatprep.subr.bf16.mxu1 %v17960_v3 }
 0x626   :  { %17678 = vmatpush3.bf16.msra.mxu1 %v18194_v31 }
 0x627   :  { %17679 = vmatprep.subr.bf16.mxu1 %v17960_v3 }
 0x62a   :  { %17681 = vmatpush3.bf16.msra.mxu1 %v18196_v32 }
 0x62b   :  { %17682 = vmatprep.subr.bf16.mxu1 %v17960_v3 }
 0x62e   :  { %17684 = vmatpush3.bf16.msra.mxu1 %v18198_v33 }
 0x62f   :  { %17685 = vmatprep.subr.bf16.mxu1 %v17960_v3 }
 0x632   :  { %17687 = vmatpush3.bf16.msra.mxu1 %v18203_v38 }
 0x633   :  { %17688 = vmatprep.subr.bf16.mxu1 %v17960_v3 }
 0x636   :  { %17690 = vmatpush3.bf16.msra.mxu1 %v18205_v39 }
 0x637   :  { %17691 = vmatprep.subr.bf16.mxu1 %v17960_v3 }
 0x63a   :  { %17693 = vmatpush3.bf16.msra.mxu1 %v18207_v40 }
 0x63b   :  { %17694 = vmatprep.subr.bf16.mxu1 %v17960_v3 }
 0x63e   :  { %17696 = vmatpush3.bf16.msra.mxu1 %v18210_v45 }
 0x63f   :  { %17697 = vmatprep.subr.bf16.mxu1 %v17960_v3 }
 0x641   :  { %15380 = vmatmul.mubr.f32.vlgmr.msra.gmra.mrb[14].mxu1 %v20119_v63 }
 0x642   :  { %17699 = vmatpush3.bf16.msra.mxu1 %v18044_v13  ;;  %15414 = vmatprep.mubr.msk.f32.mxu1 %vm17961_vm0, %v17962_v12 }
 0x643   :  { %17700 = vmatprep.subr.bf16.mxu1 %v17960_v3 }
 0x646   :  { %17702 = vmatpush3.bf16.msra.mxu1 %v18049_v14 }
 0x647   :  { %17703 = vmatprep.subr.bf16.mxu1 %v17960_v3 }
 0x64a   :  { %17705 = vmatpush3.bf16.msra.mxu1 %v18070_v20 }
 0x64b   :  { %17706 = vmatprep.subr.bf16.mxu1 %v17960_v3 }
 0x64e   :  { %17708 = vmatpush3.bf16.msra.mxu1 %v18088_v27 }
 0x64f   :  { %17709 = vmatprep.subr.bf16.mxu1 %v17960_v3 }
 0x652   :  { %17711 = vmatpush3.bf16.msra.mxu1 %v18117_v43 }
 0x653   :  { %17712 = vmatprep.subr.bf16.mxu1 %v17960_v3 }
 0x656   :  { %17714 = vmatpush3.bf16.msra.mxu1 %v18131_v51 }
 0x657   :  { %17715 = vmatprep.subr.bf16.mxu1 %v17960_v3 }
 0x65a   :  { %17717 = vmatpush3.bf16.msra.mxu1 %v18133_v52 }
 0x65b   :  { %17718 = vmatprep.subr.bf16.mxu1 %v17960_v3 }
 0x65e   :  { %17720 = vmatpush3.bf16.msra.mxu1 %v18137_v54 }
 0x661   :  { %15415 = vmatmul.mubr.f32.vlgmr.msra.gmra.mrb[14].mxu1 %v20119_v63 }
 0x674   :  { %v9078_v12 = vpop.f32.mrb[12].mxu1 }
 0x675   :  { %v9082_v13 = vmul.f32 %v9078_v12, %v9078_v12  ;;  %v14996_v14 = vpop.f32.mrb[13].mxu1 }
 0x677   :  { %v9083_v20 = vadd.f32 %v9082_v13, %v8437_v21 }
 0x6d9   :  { %v9724_v27 = vpop.f32.mrb[14].mxu0 }
 0x6da   :  { %v9728_v43 = vmul.f32 %v9724_v27, %v9724_v27  ;;  %v15206_v29 = vpop.f32.mrb[15].mxu0 }
 0x6dc   :  { %v9729_v31 = vadd.f32 %v9728_v43, %v9083_v20 }
 0x734   :  { %v10370_v32 = vpop.f32.mrb[14].mxu1 }
 0x735   :  { %v10374_v51 = vmul.f32 %v10370_v32, %v10370_v32  ;;  %v15416_v33 = vpop.f32.mrb[15].mxu1 }
 0x737   :  { %v10375_v38 = vadd.f32 %v10374_v51, %v9729_v31 }
 0x739   :  { %v10377_v52 = vsel %vm10376_vm1, %v10375_v38, 0.0 }
 0x73a   :  { %10378 = vadd.xlane.f32.xlu1 %v10377_v52 }
 0x7c7   :  { %v10379_v3 = vpop.xlane.xlu1 %10378 }
 0x7c8   :  { %17901 = vrsqrt.f32 %v10379_v3  ;;  %vm10382_vm2 = vcmp.eq.f32.partialorder %v10379_v3, inf  ;;  %v10385_v40 = vand.u32 2147483648, %v10379_v3  ;;  %vm10384_vm3 = vcmp.eq.f32.partialorder %v10379_v3, 0.0 }
 0x7d2   :  { %v17902_v54 = vpop.eup %17901 }
 0x7d3   :  { %v10381_v39 = vmul.f32 %v17902_v54, %v10379_v3 }
 0x7d5   :  { %v10383_v45 = vsel %vm10382_vm2, %v10379_v3, %v10381_v39 }
 0x7d6   :  { %v10386_v22 = vsel %vm10384_vm3, %v10385_v40, %v10383_v45 }
 0x7d7   :  { %v10387_v15 = vadd.f32 1e-06, %v10386_v22 }
 0x7d9   :  { %17903 = vrsqrt.f32 %v10387_v15 }
 0x7e3   :  { %v17904_v37 = vpop.eup %17903 }
 0x7e4   :  { %v10393_v42 = vmul.f32 %v17904_v37, %v10390_v30  ;;  %v10395_v46 = vmul.f32 %v17904_v37, %v10392_v36 }
 0x7e6   :  { %10394 = vst [vmem:[#allocation2] sm:$0xff] %v10393_v42  ;;  %10396 = vst [vmem:[#allocation4] sm:$0xff] %v10395_v46 }
 0x7e7   :  { %17922 = shalt.err (!%p17919_p4)
}
 0x7e8   :  { %s17923_s17 = scalar_lea.hbm %s20325_s5, 128 }
 0x7e9   :  { %p17924_p5 = scmp.ne.s32.totalorder %s20325_s5, %s17923_s17  ;;  %p17927_p6 = scmp.lt.u32.totalorder %s17923_s17, %s20325_s5 }
 0x7eb   :  { %p17929_p7 = pnand %p17927_p6, %p17924_p5 }
 0x7ed   :  { %17932 = shalt.err (!%p17929_p7)
}
 0x7ee   :  { %10406 = dma.vmem_to_hbm [thread:$0]  %s10404_s14, 128, %s20325_s5, [#allocation3]  }
 0x7ef   :  { %s17933_s24 = scalar_lea.vmem %s10414_s16, 128  ;;  %p17938_p9 = scmp.lt.s32.totalorder %s10414_s16, %s10414_s16 }
 0x7f0   :  { %p17934_p8 = scmp.ne.s32.totalorder %s10414_s16, %s17933_s24  ;;  %p17939_p10 = scmp.lt.s32.totalorder %s17933_s24, %s17933_s24 }
 0x7f2   :  { %p17940_p11 = por %p17939_p10, %p17938_p9 }
 0x7f4   :  { %p17941_p12 = pnand %p17940_p11, %p17934_p8 }
 0x7f6   :  { %17944 = shalt.err (!%p17941_p12)
}
 0x7f7   :  { %s17945_s27 = scalar_lea.hbm %s20326_s6, 128 }
 0x7f8   :  { %p17946_p13 = scmp.ne.s32.totalorder %s20326_s6, %s17945_s27  ;;  %p17949_p0 = scmp.lt.u32.totalorder %s17945_s27, %s20326_s6 }
 0x7fa   :  { %p17951_p1 = pnand %p17949_p0, %p17946_p13 }
 0x7fc   :  { %17954 = shalt.err (!%p17951_p1)
}
 0x7fd   :  { %10416 = dma.vmem_to_hbm [thread:$0]  %s10414_s16, 128, %s20326_s6, [#allocation5]  }
 0x7fe   :  { %17955 = dma.done.wait [#allocation3], 128  }
 0x7ff   :  { %17956 = vsyncadd [#allocation3], 4294967168 }
 0x800   :  { %17957 = dma.done.wait [#allocation5], 128  }
 0x801   :  { %17958 = vsyncadd [#allocation5], 4294967168 }
 0x802   :  { %10423 = vsyncpa [#allocation3], 1 }
 0x803   :  { %10424 = vsyncpa [#allocation5], 1 }

</bundles_post_ra>
